<compile_context>
chip_gen: v5e
topology: v5e:2x2
jax: 0.10.0
libtpu: 0.0.40
codegen_flags: <defaults>
</compile_context>

<pallas_src>
import functools

import jax
import jax.numpy as jnp
from jax.experimental import pallas as pl
from jax.experimental.pallas import tpu as pltpu


def _softmax(x):
    m = jnp.max(x, axis=-1, keepdims=True)
    e = jnp.exp(x - m)
    return e / jnp.sum(e, axis=-1, keepdims=True)


def _softplus(x):
    return jnp.log(1.0 + jnp.exp(-jnp.abs(x))) + jnp.maximum(x, 0.0)


def ntm_processor_kernel(
    x_ref, state0_ref, mem_ref, memcat_ref, inv_mnorm_ref,
    w_x_ref, w_r_ref, b_gate_ref, w_hb_ref, b_hb_ref, p_comb_ref,
    out_ref, state_ref,
    *, T, B, H, M, N, P, OUT,
):
    f32 = jnp.float32
    G = 4 * H          # LSTM gate width
    OFF = G            # lane offset of head params inside hp / of mem in mem_cat

    state0 = state0_ref[...]                       # (B, M + 2H + N)
    read = state0[:, 0:M]
    h = state0[:, M:M + H]
    c = state0[:, M + H:M + 2 * H]
    w = state0[:, M + 2 * H:M + 2 * H + N]

    # ---- hoisted off the recurrent critical chain ---------------------------
    # input->gate contributions for all T steps in one matmul (x not recurrent)
    gx_all = jnp.dot(x_ref[...], w_x_ref[...],
                     preferred_element_type=f32)   # (T*B, 4H)
    # initial read / h gate contributions; later steps get them for free as
    # extra columns of the fused per-step matmuls below.
    gr = jnp.dot(read, w_r_ref[...], preferred_element_type=f32)       # (B, 4H)
    gh = jnp.dot(h, w_hb_ref[:, 0:G], preferred_element_type=f32)      # (B, 4H)

    for t in range(T):     # fully unrolled; state carried in registers
        # ---- controller: LSTM cell on inp = concat([x_t, prev_read]) --------
        gates = gx_all[t * B:(t + 1) * B, :] + gr + gh + b_gate_ref[...]
        sig_g = jax.nn.sigmoid(gates)              # full-vreg pass (4H = 128)
        tanh_g = jnp.tanh(gates)                   # full-vreg pass
        i_g = sig_g[:, 0:H]
        f_g = sig_g[:, H:2 * H]
        g_g = tanh_g[:, 2 * H:3 * H]
        o_g = sig_g[:, 3 * H:4 * H]
        c = f_g * c + i_g * g_g
        h = o_g * jnp.tanh(c)                      # c_output

        # ---- fused matmul: h @ [whh | w_head | wp_h] + [0 | b_head | b_p] ---
        hp = jnp.dot(h, w_hb_ref[...], preferred_element_type=f32) \
            + b_hb_ref[...]                        # (B, 4H + P + OUT)
        gh = hp[:, 0:G]                            # next step's h gate term
        k = jnp.tanh(hp[:, OFF:OFF + M])           # key           (B, M)
        beta = _softplus(hp[:, OFF + M:OFF + M + 1])           # strength (B,1)
        g_gate = jax.nn.sigmoid(hp[:, OFF + M + 1:OFF + M + 2])  # interp  (B,1)
        s = _softmax(hp[:, OFF + M + 2:OFF + M + 5])             # shifts  (B,3)
        gamma = 1.0 + _softplus(hp[:, OFF + M + 5:OFF + M + 6])  # sharpen (B,1)
        out_h = hp[:, OFF + P:OFF + P + OUT]       # h @ wp_h + b_p

        # ---- content addressing via cosine similarity -----------------------
        inv_k = 1.0 / (jnp.sqrt(jnp.sum(k * k, axis=-1, keepdims=True)) + 1e-8)
        sim = jax.lax.dot_general(                 # (B, N)
            k, mem_ref[...], (((1,), (1,)), ((), ())),
            preferred_element_type=f32)
        w_c = _softmax(beta * (sim * (inv_k * inv_mnorm_ref[...])))

        # interpolation with previous weights
        w_g = g_gate * w_c + (1.0 - g_gate) * w

        # circular 3-tap shift via one fused (N, 2N) permutation matmul
        w_both = jnp.dot(w_g, p_comb_ref[...], preferred_element_type=f32)
        w_s = (s[:, 0:1] * w_both[:, 0:N]          # roll(w_g, -1)
               + s[:, 1:2] * w_g
               + s[:, 2:3] * w_both[:, N:2 * N])   # roll(w_g, +1)

        # sharpening
        w_pow = jnp.exp(gamma * jnp.log(w_s + 1e-8))
        w = w_pow / jnp.sum(w_pow, axis=-1, keepdims=True)

        # ---- fused read matmul: w @ [mem@wih_r | mem | mem@wp_r] ------------
        rwg = jnp.dot(w, memcat_ref[...], preferred_element_type=f32)
        gr = rwg[:, 0:G]                           # next step's read gate term
        read = rwg[:, G:G + M]                     # read vector
        out_r = rwg[:, G + M:G + M + OUT]          # read @ wp_r

        out_ref[t] = out_h + out_r                 # proc output for step t

    # ---- final packed state written back once --------------------------------
    state_ref[:, 0:M] = read
    state_ref[:, M:M + H] = h
    state_ref[:, M + H:M + 2 * H] = c
    state_ref[:, M + 2 * H:M + 2 * H + N] = w


def ntm_processor_forward(x_seq, read0, h0, c0, w0, mem,
                          wih_x, wih_r, whh, b_gate,
                          w_head, b_head, wp_h, wp_r, b_p,
                          p_minus, p_plus):
    T, B, X_DIM = x_seq.shape
    N, M = mem.shape
    H = h0.shape[1]
    P = w_head.shape[1]
    OUT = wp_h.shape[1]
    G = 4 * H
    STATE = M + 2 * H + N

    # ---- host-side slab packing / layout plumbing (once per call) -----------
    w_hb = jnp.concatenate([whh, w_head, wp_h], axis=1)              # (H, 4H+P+OUT)
    b_hb = jnp.concatenate(
        [jnp.zeros((1, G), jnp.float32), b_head, b_p], axis=1)       # (1, 4H+P+OUT)
    mem_cat = jnp.concatenate([mem @ wih_r, mem, mem @ wp_r], axis=1)  # (N, 4H+M+OUT)
    inv_mnorm = (1.0 / (jnp.sqrt(jnp.sum(mem * mem, axis=1)) + 1e-8))[None, :]
    p_comb = jnp.concatenate([p_minus, p_plus], axis=1)              # (N, 2N)
    state0 = jnp.concatenate([read0, h0, c0, w0], axis=1)            # (B, STATE)
    x2 = x_seq.reshape(T * B, X_DIM)                                 # one DMA slab

    kernel = functools.partial(
        ntm_processor_kernel, T=T, B=B, H=H, M=M, N=N, P=P, OUT=OUT)

    fn = pl.pallas_call(
        kernel,
        out_shape=(
            jax.ShapeDtypeStruct((T, B, OUT), jnp.float32),
            jax.ShapeDtypeStruct((B, STATE), jnp.float32),
        ),
    )
    return fn(x2, state0, mem, mem_cat, inv_mnorm,
              wih_x, wih_r, b_gate, w_hb, b_hb, p_comb)


def reference_step(x, read, h, c, w, mem, params, *, H, M):
    (wih_x, wih_r, whh, b_gate, w_head, b_head, wp_h, wp_r, b_p,
     p_minus, p_plus) = params
    gates = x @ wih_x + read @ wih_r + h @ whh + b_gate
    i_g = jax.nn.sigmoid(gates[:, :H])
    f_g = jax.nn.sigmoid(gates[:, H:2 * H])
    g_g = jnp.tanh(gates[:, 2 * H:3 * H])
    o_g = jax.nn.sigmoid(gates[:, 3 * H:4 * H])
    c_new = f_g * c + i_g * g_g
    h_new = o_g * jnp.tanh(c_new)
    hp = h_new @ w_head + b_head
    k = jnp.tanh(hp[:, :M])
    beta = _softplus(hp[:, M:M + 1])
    g_gate = jax.nn.sigmoid(hp[:, M + 1:M + 2])
    s = _softmax(hp[:, M + 2:M + 5])
    gamma = 1.0 + _softplus(hp[:, M + 5:M + 6])
    k_norm = jnp.sqrt(jnp.sum(k * k, axis=-1, keepdims=True)) + 1e-8
    m_norm = jnp.sqrt(jnp.sum(mem * mem, axis=-1)) + 1e-8
    cos = (k @ mem.T) / (k_norm * m_norm[None, :])
    w_c = _softmax(beta * cos)
    w_g = g_gate * w_c + (1.0 - g_gate) * w
    w_s = s[:, 0:1] * (w_g @ p_minus) + s[:, 1:2] * w_g + s[:, 2:3] * (w_g @ p_plus)
    w_pow = jnp.exp(gamma * jnp.log(w_s + 1e-8))
    w_new = w_pow / jnp.sum(w_pow, axis=-1, keepdims=True)
    read_new = w_new @ mem
    out = h_new @ wp_h + read_new @ wp_r + b_p
    return out, read_new, h_new, c_new, w_new


if __name__ == "__main__":
    # ---- small deterministic shapes -----------------------------------------
    T = 8          # sequence length (fully fused into one kernel invocation)
    B = 2          # batch
    X_DIM = 8      # external input size
    M = 16         # memory word size (memory_M)
    N = 16         # number of memory rows
    H = 32         # controller_size
    OUT = 8        # output_size
    P = M + 6      # head params: k(M), beta(1), g(1), s(3), gamma(1)
    STATE = M + 2 * H + N

    key = jax.random.PRNGKey(0)
    ks = jax.random.split(key, 16)

    def uniform(k, shape, bound):
        return jax.random.uniform(k, shape, jnp.float32, -bound, bound)

    # controller (LSTMCell) parameters, split to absorb the input concat
    bnd = 1.0 / jnp.sqrt(H)
    w_ih = uniform(ks[0], (4 * H, X_DIM + M), bnd)
    w_hh = uniform(ks[1], (4 * H, H), bnd)
    b_ih = uniform(ks[2], (4 * H,), bnd)
    b_hh = uniform(ks[3], (4 * H,), bnd)
    wih_x = w_ih[:, :X_DIM].T                      # (X_DIM, 4H)
    wih_r = w_ih[:, X_DIM:].T                      # (M, 4H)
    whh = w_hh.T                                   # (H, 4H)
    b_gate = (b_ih + b_hh)[None, :]                # (1, 4H)

    # read-head parameter projection
    bnd_h = 1.0 / jnp.sqrt(H)
    w_head = uniform(ks[4], (P, H), bnd_h).T       # (H, P)
    b_head = uniform(ks[5], (P,), bnd_h)[None, :]  # (1, P)

    # proc = Linear(H + M, OUT): xavier_uniform weight, normal(0.01) bias
    xav = jnp.sqrt(6.0 / (H + M + OUT))
    w_proc = uniform(ks[6], (OUT, H + M), xav)
    wp_h = w_proc[:, :H].T                         # (H, OUT)
    wp_r = w_proc[:, H:].T                         # (M, OUT)
    b_p = (0.01 * jax.random.normal(ks[7], (OUT,)))[None, :]

    # read bias (init_r): Linear(1, M) applied to ones(1), tanh, repeated on batch
    r_w = uniform(ks[8], (M, 1), 1.0)
    r_b = uniform(ks[9], (M,), 1.0)
    read0 = jnp.tile(jnp.tanh(r_w[:, 0] + r_b)[None, :], (B, 1))   # (B, M)

    # initial controller / head state and memory
    h0 = jnp.zeros((B, H), jnp.float32)
    c0 = jnp.zeros((B, H), jnp.float32)
    w0 = jnp.full((B, N), 1.0 / N, jnp.float32)
    memory = jax.random.normal(ks[10], (N, M), jnp.float32) * 0.1

    # circular shift permutation matrices for the 3-tap NTM shift
    eye = jnp.eye(N, dtype=jnp.float32)
    p_plus = jnp.roll(eye, 1, axis=1)    # w @ p_plus  == roll(w, +1)
    p_minus = jnp.roll(eye, -1, axis=1)  # w @ p_minus == roll(w, -1)

    # external input sequence
    x_seq = jax.random.normal(ks[11], (T, B, X_DIM), jnp.float32)

    out_seq, state_final = jax.block_until_ready(
        ntm_processor_forward(x_seq, read0, h0, c0, w0, memory,
                              wih_x, wih_r, whh, b_gate,
                              w_head, b_head, wp_h, wp_r, b_p,
                              p_minus, p_plus))

    # ---- pure-JAX reference (per-step, matches the PyTorch module) ----------
    params = (wih_x, wih_r, whh, b_gate, w_head, b_head, wp_h, wp_r, b_p,
              p_minus, p_plus)
    read, h, c, w = read0, h0, c0, w0
    ref_outs = []
    for t in range(T):
        o, read, h, c, w = reference_step(x_seq[t], read, h, c, w, memory,
                                          params, H=H, M=M)
        ref_outs.append(o)
    ref_out_seq = jnp.stack(ref_outs, axis=0)
    ref_state_final = jnp.concatenate([read, h, c, w], axis=1)

    assert out_seq.shape == ref_out_seq.shape
    assert state_final.shape == ref_state_final.shape
    assert jnp.allclose(out_seq, ref_out_seq, rtol=2e-3, atol=2e-3), \
        "output mismatch vs reference"
    assert jnp.allclose(state_final, ref_state_final, rtol=2e-3, atol=2e-3), \
        "state mismatch vs reference"

    # TODO(synk): multiple / write heads and memory write-back live in the
    # external `heads` modules; this kernel instantiates the single-read-head
    # configuration required by the module's assertion (memory constant).
    print("KERNEL_OK")
</pallas_src>

<mosaic_0001>
module attributes {stable_mosaic.version = 11 : i64} {
  func.func @ntm_processor_kernel(%arg0: memref<16x8xf32, #tpu.memory_space<vmem>>, %arg1: memref<2x96xf32, #tpu.memory_space<vmem>>, %arg2: memref<16x16xf32, #tpu.memory_space<vmem>>, %arg3: memref<16x152xf32, #tpu.memory_space<vmem>>, %arg4: memref<1x16xf32, #tpu.memory_space<vmem>>, %arg5: memref<8x128xf32, #tpu.memory_space<vmem>>, %arg6: memref<16x128xf32, #tpu.memory_space<vmem>>, %arg7: memref<1x128xf32, #tpu.memory_space<vmem>>, %arg8: memref<32x158xf32, #tpu.memory_space<vmem>>, %arg9: memref<1x158xf32, #tpu.memory_space<vmem>>, %arg10: memref<16x32xf32, #tpu.memory_space<vmem>>, %arg11: memref<8x2x8xf32, #tpu.memory_space<vmem>>, %arg12: memref<2x96xf32, #tpu.memory_space<vmem>>) attributes {dimension_semantics = [], scalar_prefetch = 0 : i64, scratch_operands = 0 : i64, tpu.core_type = #tpu.core_type<tc>} {
    %c0 = arith.constant 0 : index
    %c0_0 = arith.constant 0 : index
    %0 = vector.load %arg1[%c0, %c0_0] : memref<2x96xf32, #tpu.memory_space<vmem>>, vector<2x96xf32>
    %1 = vector.extract_strided_slice %0 {offsets = [0, 0], sizes = [2, 16], strides = [1, 1]} : vector<2x96xf32> to vector<2x16xf32>
    %2 = vector.extract_strided_slice %0 {offsets = [0, 16], sizes = [2, 32], strides = [1, 1]} : vector<2x96xf32> to vector<2x32xf32>
    %3 = vector.extract_strided_slice %0 {offsets = [0, 48], sizes = [2, 32], strides = [1, 1]} : vector<2x96xf32> to vector<2x32xf32>
    %4 = vector.extract_strided_slice %0 {offsets = [0, 80], sizes = [2, 16], strides = [1, 1]} : vector<2x96xf32> to vector<2x16xf32>
    %c0_1 = arith.constant 0 : index
    %c0_2 = arith.constant 0 : index
    %5 = vector.load %arg0[%c0_1, %c0_2] : memref<16x8xf32, #tpu.memory_space<vmem>>, vector<16x8xf32>
    %c0_3 = arith.constant 0 : index
    %c0_4 = arith.constant 0 : index
    %6 = vector.load %arg5[%c0_3, %c0_4] : memref<8x128xf32, #tpu.memory_space<vmem>>, vector<8x128xf32>
    %cst = arith.constant dense<0.000000e+00> : vector<16x128xf32>
    %7 = tpu.matmul %5, %6, %cst {dimension_numbers = #tpu.dot_dimension_numbers<[1], [0], [0], [1], [0, 0, 1, 1], [], []>} : vector<16x8xf32>, vector<8x128xf32>, vector<16x128xf32> -> vector<16x128xf32>
    %c0_5 = arith.constant 0 : index
    %c0_6 = arith.constant 0 : index
    %8 = vector.load %arg6[%c0_5, %c0_6] : memref<16x128xf32, #tpu.memory_space<vmem>>, vector<16x128xf32>
    %cst_7 = arith.constant dense<0.000000e+00> : vector<2x128xf32>
    %9 = tpu.matmul %1, %8, %cst_7 {dimension_numbers = #tpu.dot_dimension_numbers<[1], [0], [0], [1], [0, 0, 1, 1], [], []>} : vector<2x16xf32>, vector<16x128xf32>, vector<2x128xf32> -> vector<2x128xf32>
    %c0_8 = arith.constant 0 : index
    %c0_9 = arith.constant 0 : index
    %10 = vector.load %arg8[%c0_8, %c0_9] : memref<32x158xf32, #tpu.memory_space<vmem>>, vector<32x128xf32>
    %cst_10 = arith.constant dense<0.000000e+00> : vector<2x128xf32>
    %11 = tpu.matmul %2, %10, %cst_10 {dimension_numbers = #tpu.dot_dimension_numbers<[1], [0], [0], [1], [0, 0, 1, 1], [], []>} : vector<2x32xf32>, vector<32x128xf32>, vector<2x128xf32> -> vector<2x128xf32>
    %12 = vector.extract_strided_slice %7 {offsets = [0, 0], sizes = [2, 128], strides = [1, 1]} : vector<16x128xf32> to vector<2x128xf32>
    %13 = arith.addf %12, %9 : vector<2x128xf32>
    %14 = arith.addf %13, %11 : vector<2x128xf32>
    %c0_11 = arith.constant 0 : index
    %c0_12 = arith.constant 0 : index
    %15 = vector.load %arg7[%c0_11, %c0_12] : memref<1x128xf32, #tpu.memory_space<vmem>>, vector<1x128xf32>
    %16 = vector.broadcast %15 : vector<1x128xf32> to vector<2x128xf32>
    %17 = arith.addf %14, %16 : vector<2x128xf32>
    %18 = arith.negf %17 : vector<2x128xf32>
    %19 = math.exp %18 : vector<2x128xf32>
    %cst_13 = arith.constant 1.000000e+00 : f32
    %20 = vector.broadcast %cst_13 : f32 to vector<2x128xf32>
    %21 = arith.addf %20, %19 : vector<2x128xf32>
    %22 = arith.divf %20, %21 : vector<2x128xf32>
    %23 = math.tanh %17 : vector<2x128xf32>
    %24 = vector.extract_strided_slice %22 {offsets = [0, 0], sizes = [2, 32], strides = [1, 1]} : vector<2x128xf32> to vector<2x32xf32>
    %25 = vector.extract_strided_slice %22 {offsets = [0, 32], sizes = [2, 32], strides = [1, 1]} : vector<2x128xf32> to vector<2x32xf32>
    %26 = vector.extract_strided_slice %23 {offsets = [0, 64], sizes = [2, 32], strides = [1, 1]} : vector<2x128xf32> to vector<2x32xf32>
    %27 = vector.extract_strided_slice %22 {offsets = [0, 96], sizes = [2, 32], strides = [1, 1]} : vector<2x128xf32> to vector<2x32xf32>
    %28 = arith.mulf %25, %3 : vector<2x32xf32>
    %29 = arith.mulf %24, %26 : vector<2x32xf32>
    %30 = arith.addf %28, %29 : vector<2x32xf32>
    %31 = math.tanh %30 : vector<2x32xf32>
    %32 = arith.mulf %27, %31 : vector<2x32xf32>
    %c0_14 = arith.constant 0 : index
    %c0_15 = arith.constant 0 : index
    %33 = vector.load %arg8[%c0_14, %c0_15] : memref<32x158xf32, #tpu.memory_space<vmem>>, vector<32x158xf32>
    %cst_16 = arith.constant dense<0.000000e+00> : vector<2x158xf32>
    %34 = tpu.matmul %32, %33, %cst_16 {dimension_numbers = #tpu.dot_dimension_numbers<[1], [0], [0], [1], [0, 0, 1, 1], [], []>} : vector<2x32xf32>, vector<32x158xf32>, vector<2x158xf32> -> vector<2x158xf32>
    %c0_17 = arith.constant 0 : index
    %c0_18 = arith.constant 0 : index
    %35 = vector.load %arg9[%c0_17, %c0_18] : memref<1x158xf32, #tpu.memory_space<vmem>>, vector<1x158xf32>
    %36 = vector.broadcast %35 : vector<1x158xf32> to vector<2x158xf32>
    %37 = arith.addf %34, %36 : vector<2x158xf32>
    %38 = vector.extract_strided_slice %37 {offsets = [0, 0], sizes = [2, 128], strides = [1, 1]} : vector<2x158xf32> to vector<2x128xf32>
    %39 = vector.extract_strided_slice %37 {offsets = [0, 128], sizes = [2, 16], strides = [1, 1]} : vector<2x158xf32> to vector<2x16xf32>
    %40 = math.tanh %39 : vector<2x16xf32>
    %41 = vector.extract_strided_slice %37 {offsets = [0, 144], sizes = [2, 1], strides = [1, 1]} : vector<2x158xf32> to vector<2x1xf32>
    %42 = math.absf %41 : vector<2x1xf32>
    %cst_19 = arith.constant 0.000000e+00 : f32
    %43 = vector.broadcast %cst_19 : f32 to vector<2x1xf32>
    %44 = arith.subf %43, %42 : vector<2x1xf32>
    %45 = math.exp %44 : vector<2x1xf32>
    %cst_20 = arith.constant 1.000000e+00 : f32
    %46 = vector.broadcast %cst_20 : f32 to vector<2x1xf32>
    %47 = arith.addf %46, %45 : vector<2x1xf32>
    %48 = math.log %47 : vector<2x1xf32>
    %cst_21 = arith.constant 0.000000e+00 : f32
    %49 = vector.broadcast %cst_21 : f32 to vector<2x1xf32>
    %50 = arith.maximumf %41, %49 : vector<2x1xf32>
    %51 = arith.addf %48, %50 : vector<2x1xf32>
    %52 = vector.extract_strided_slice %37 {offsets = [0, 145], sizes = [2, 1], strides = [1, 1]} : vector<2x158xf32> to vector<2x1xf32>
    %53 = arith.negf %52 : vector<2x1xf32>
    %54 = math.exp %53 : vector<2x1xf32>
    %cst_22 = arith.constant 1.000000e+00 : f32
    %55 = vector.broadcast %cst_22 : f32 to vector<2x1xf32>
    %56 = arith.addf %55, %54 : vector<2x1xf32>
    %57 = arith.divf %55, %56 : vector<2x1xf32>
    %58 = vector.extract_strided_slice %37 {offsets = [0, 146], sizes = [2, 3], strides = [1, 1]} : vector<2x158xf32> to vector<2x3xf32>
    %cst_23 = arith.constant dense<0xFF800000> : vector<2xf32>
    %59 = vector.multi_reduction <maximumf>, %58, %cst_23 [1] : vector<2x3xf32> to vector<2xf32>
    %60 = vector.shape_cast %59 : vector<2xf32> to vector<2x1xf32>
    %61 = vector.broadcast %60 : vector<2x1xf32> to vector<2x3xf32>
    %62 = arith.subf %58, %61 : vector<2x3xf32>
    %63 = math.exp %62 : vector<2x3xf32>
    %cst_24 = arith.constant dense<0.000000e+00> : vector<2xf32>
    %64 = vector.multi_reduction <add>, %63, %cst_24 [1] : vector<2x3xf32> to vector<2xf32>
    %65 = vector.shape_cast %64 : vector<2xf32> to vector<2x1xf32>
    %66 = vector.broadcast %65 : vector<2x1xf32> to vector<2x3xf32>
    %67 = arith.divf %63, %66 : vector<2x3xf32>
    %68 = vector.extract_strided_slice %37 {offsets = [0, 149], sizes = [2, 1], strides = [1, 1]} : vector<2x158xf32> to vector<2x1xf32>
    %69 = math.absf %68 : vector<2x1xf32>
    %cst_25 = arith.constant 0.000000e+00 : f32
    %70 = vector.broadcast %cst_25 : f32 to vector<2x1xf32>
    %71 = arith.subf %70, %69 : vector<2x1xf32>
    %72 = math.exp %71 : vector<2x1xf32>
    %cst_26 = arith.constant 1.000000e+00 : f32
    %73 = vector.broadcast %cst_26 : f32 to vector<2x1xf32>
    %74 = arith.addf %73, %72 : vector<2x1xf32>
    %75 = math.log %74 : vector<2x1xf32>
    %cst_27 = arith.constant 0.000000e+00 : f32
    %76 = vector.broadcast %cst_27 : f32 to vector<2x1xf32>
    %77 = arith.maximumf %68, %76 : vector<2x1xf32>
    %78 = arith.addf %75, %77 : vector<2x1xf32>
    %cst_28 = arith.constant 1.000000e+00 : f32
    %79 = vector.broadcast %cst_28 : f32 to vector<2x1xf32>
    %80 = arith.addf %79, %78 : vector<2x1xf32>
    %81 = vector.extract_strided_slice %37 {offsets = [0, 150], sizes = [2, 8], strides = [1, 1]} : vector<2x158xf32> to vector<2x8xf32>
    %82 = arith.mulf %40, %40 : vector<2x16xf32>
    %cst_29 = arith.constant dense<0.000000e+00> : vector<2xf32>
    %83 = vector.multi_reduction <add>, %82, %cst_29 [1] : vector<2x16xf32> to vector<2xf32>
    %84 = vector.shape_cast %83 : vector<2xf32> to vector<2x1xf32>
    %85 = math.sqrt %84 : vector<2x1xf32>
    %cst_30 = arith.constant 9.99999993E-9 : f32
    %86 = vector.broadcast %cst_30 : f32 to vector<2x1xf32>
    %87 = arith.addf %85, %86 : vector<2x1xf32>
    %cst_31 = arith.constant 1.000000e+00 : f32
    %88 = vector.broadcast %cst_31 : f32 to vector<2x1xf32>
    %89 = arith.divf %88, %87 : vector<2x1xf32>
    %c0_32 = arith.constant 0 : index
    %c0_33 = arith.constant 0 : index
    %90 = vector.load %arg2[%c0_32, %c0_33] : memref<16x16xf32, #tpu.memory_space<vmem>>, vector<16x16xf32>
    %cst_34 = arith.constant dense<0.000000e+00> : vector<2x16xf32>
    %91 = tpu.matmul %40, %90, %cst_34 {dimension_numbers = #tpu.dot_dimension_numbers<[1], [1], [0], [0], [0, 0, 1, 0], [], []>} : vector<2x16xf32>, vector<16x16xf32>, vector<2x16xf32> -> vector<2x16xf32>
    %c0_35 = arith.constant 0 : index
    %c0_36 = arith.constant 0 : index
    %92 = vector.load %arg4[%c0_35, %c0_36] : memref<1x16xf32, #tpu.memory_space<vmem>>, vector<1x16xf32>
    %93 = vector.broadcast %89 : vector<2x1xf32> to vector<2x16xf32>
    %94 = vector.broadcast %92 : vector<1x16xf32> to vector<2x16xf32>
    %95 = arith.mulf %93, %94 : vector<2x16xf32>
    %96 = arith.mulf %91, %95 : vector<2x16xf32>
    %97 = vector.broadcast %51 : vector<2x1xf32> to vector<2x16xf32>
    %98 = arith.mulf %97, %96 : vector<2x16xf32>
    %cst_37 = arith.constant dense<0xFF800000> : vector<2xf32>
    %99 = vector.multi_reduction <maximumf>, %98, %cst_37 [1] : vector<2x16xf32> to vector<2xf32>
    %100 = vector.shape_cast %99 : vector<2xf32> to vector<2x1xf32>
    %101 = vector.broadcast %100 : vector<2x1xf32> to vector<2x16xf32>
    %102 = arith.subf %98, %101 : vector<2x16xf32>
    %103 = math.exp %102 : vector<2x16xf32>
    %cst_38 = arith.constant dense<0.000000e+00> : vector<2xf32>
    %104 = vector.multi_reduction <add>, %103, %cst_38 [1] : vector<2x16xf32> to vector<2xf32>
    %105 = vector.shape_cast %104 : vector<2xf32> to vector<2x1xf32>
    %106 = vector.broadcast %105 : vector<2x1xf32> to vector<2x16xf32>
    %107 = arith.divf %103, %106 : vector<2x16xf32>
    %108 = vector.broadcast %57 : vector<2x1xf32> to vector<2x16xf32>
    %109 = arith.mulf %108, %107 : vector<2x16xf32>
    %cst_39 = arith.constant 1.000000e+00 : f32
    %110 = vector.broadcast %cst_39 : f32 to vector<2x1xf32>
    %111 = arith.subf %110, %57 : vector<2x1xf32>
    %112 = vector.broadcast %111 : vector<2x1xf32> to vector<2x16xf32>
    %113 = arith.mulf %112, %4 : vector<2x16xf32>
    %114 = arith.addf %109, %113 : vector<2x16xf32>
    %c0_40 = arith.constant 0 : index
    %c0_41 = arith.constant 0 : index
    %115 = vector.load %arg10[%c0_40, %c0_41] : memref<16x32xf32, #tpu.memory_space<vmem>>, vector<16x32xf32>
    %cst_42 = arith.constant dense<0.000000e+00> : vector<2x32xf32>
    %116 = tpu.matmul %114, %115, %cst_42 {dimension_numbers = #tpu.dot_dimension_numbers<[1], [0], [0], [1], [0, 0, 1, 1], [], []>} : vector<2x16xf32>, vector<16x32xf32>, vector<2x32xf32> -> vector<2x32xf32>
    %117 = vector.extract_strided_slice %67 {offsets = [0, 0], sizes = [2, 1], strides = [1, 1]} : vector<2x3xf32> to vector<2x1xf32>
    %118 = vector.extract_strided_slice %116 {offsets = [0, 0], sizes = [2, 16], strides = [1, 1]} : vector<2x32xf32> to vector<2x16xf32>
    %119 = vector.broadcast %117 : vector<2x1xf32> to vector<2x16xf32>
    %120 = arith.mulf %119, %118 : vector<2x16xf32>
    %121 = vector.extract_strided_slice %67 {offsets = [0, 1], sizes = [2, 1], strides = [1, 1]} : vector<2x3xf32> to vector<2x1xf32>
    %122 = vector.broadcast %121 : vector<2x1xf32> to vector<2x16xf32>
    %123 = arith.mulf %122, %114 : vector<2x16xf32>
    %124 = arith.addf %120, %123 : vector<2x16xf32>
    %125 = vector.extract_strided_slice %67 {offsets = [0, 2], sizes = [2, 1], strides = [1, 1]} : vector<2x3xf32> to vector<2x1xf32>
    %126 = vector.extract_strided_slice %116 {offsets = [0, 16], sizes = [2, 16], strides = [1, 1]} : vector<2x32xf32> to vector<2x16xf32>
    %127 = vector.broadcast %125 : vector<2x1xf32> to vector<2x16xf32>
    %128 = arith.mulf %127, %126 : vector<2x16xf32>
    %129 = arith.addf %124, %128 : vector<2x16xf32>
    %cst_43 = arith.constant 9.99999993E-9 : f32
    %130 = vector.broadcast %cst_43 : f32 to vector<2x16xf32>
    %131 = arith.addf %129, %130 : vector<2x16xf32>
    %132 = math.log %131 : vector<2x16xf32>
    %133 = vector.broadcast %80 : vector<2x1xf32> to vector<2x16xf32>
    %134 = arith.mulf %133, %132 : vector<2x16xf32>
    %135 = math.exp %134 : vector<2x16xf32>
    %cst_44 = arith.constant dense<0.000000e+00> : vector<2xf32>
    %136 = vector.multi_reduction <add>, %135, %cst_44 [1] : vector<2x16xf32> to vector<2xf32>
    %137 = vector.shape_cast %136 : vector<2xf32> to vector<2x1xf32>
    %138 = vector.broadcast %137 : vector<2x1xf32> to vector<2x16xf32>
    %139 = arith.divf %135, %138 : vector<2x16xf32>
    %c0_45 = arith.constant 0 : index
    %c0_46 = arith.constant 0 : index
    %140 = vector.load %arg3[%c0_45, %c0_46] : memref<16x152xf32, #tpu.memory_space<vmem>>, vector<16x152xf32>
    %cst_47 = arith.constant dense<0.000000e+00> : vector<2x152xf32>
    %141 = tpu.matmul %139, %140, %cst_47 {dimension_numbers = #tpu.dot_dimension_numbers<[1], [0], [0], [1], [0, 0, 1, 1], [], []>} : vector<2x16xf32>, vector<16x152xf32>, vector<2x152xf32> -> vector<2x152xf32>
    %142 = vector.extract_strided_slice %141 {offsets = [0, 0], sizes = [2, 128], strides = [1, 1]} : vector<2x152xf32> to vector<2x128xf32>
    %143 = vector.extract_strided_slice %141 {offsets = [0, 144], sizes = [2, 8], strides = [1, 1]} : vector<2x152xf32> to vector<2x8xf32>
    %144 = arith.addf %81, %143 : vector<2x8xf32>
    %c0_48 = arith.constant 0 : index
    %c0_49 = arith.constant 0 : index
    %c0_50 = arith.constant 0 : index
    %145 = vector.load %arg11[%c0_48, %c0_49, %c0_50] : memref<8x2x8xf32, #tpu.memory_space<vmem>>, vector<1x2x8xf32>
    %146 = vector.shape_cast %145 : vector<1x2x8xf32> to vector<2x8xf32>
    %147 = vector.shape_cast %144 : vector<2x8xf32> to vector<1x2x8xf32>
    tpu.vector_store %arg11[%c0_48, %c0_49, %c0_50], %147 {strides = array<i32>} : memref<8x2x8xf32, #tpu.memory_space<vmem>>, vector<1x2x8xf32>,
    %148 = vector.extract_strided_slice %7 {offsets = [2, 0], sizes = [2, 128], strides = [1, 1]} : vector<16x128xf32> to vector<2x128xf32>
    %149 = arith.addf %148, %142 : vector<2x128xf32>
    %150 = arith.addf %149, %38 : vector<2x128xf32>
    %c0_51 = arith.constant 0 : index
    %c0_52 = arith.constant 0 : index
    %151 = vector.load %arg7[%c0_51, %c0_52] : memref<1x128xf32, #tpu.memory_space<vmem>>, vector<1x128xf32>
    %152 = vector.broadcast %151 : vector<1x128xf32> to vector<2x128xf32>
    %153 = arith.addf %150, %152 : vector<2x128xf32>
    %154 = arith.negf %153 : vector<2x128xf32>
    %155 = math.exp %154 : vector<2x128xf32>
    %cst_53 = arith.constant 1.000000e+00 : f32
    %156 = vector.broadcast %cst_53 : f32 to vector<2x128xf32>
    %157 = arith.addf %156, %155 : vector<2x128xf32>
    %158 = arith.divf %156, %157 : vector<2x128xf32>
    %159 = math.tanh %153 : vector<2x128xf32>
    %160 = vector.extract_strided_slice %158 {offsets = [0, 0], sizes = [2, 32], strides = [1, 1]} : vector<2x128xf32> to vector<2x32xf32>
    %161 = vector.extract_strided_slice %158 {offsets = [0, 32], sizes = [2, 32], strides = [1, 1]} : vector<2x128xf32> to vector<2x32xf32>
    %162 = vector.extract_strided_slice %159 {offsets = [0, 64], sizes = [2, 32], strides = [1, 1]} : vector<2x128xf32> to vector<2x32xf32>
    %163 = vector.extract_strided_slice %158 {offsets = [0, 96], sizes = [2, 32], strides = [1, 1]} : vector<2x128xf32> to vector<2x32xf32>
    %164 = arith.mulf %161, %30 : vector<2x32xf32>
    %165 = arith.mulf %160, %162 : vector<2x32xf32>
    %166 = arith.addf %164, %165 : vector<2x32xf32>
    %167 = math.tanh %166 : vector<2x32xf32>
    %168 = arith.mulf %163, %167 : vector<2x32xf32>
    %c0_54 = arith.constant 0 : index
    %c0_55 = arith.constant 0 : index
    %169 = vector.load %arg8[%c0_54, %c0_55] : memref<32x158xf32, #tpu.memory_space<vmem>>, vector<32x158xf32>
    %cst_56 = arith.constant dense<0.000000e+00> : vector<2x158xf32>
    %170 = tpu.matmul %168, %169, %cst_56 {dimension_numbers = #tpu.dot_dimension_numbers<[1], [0], [0], [1], [0, 0, 1, 1], [], []>} : vector<2x32xf32>, vector<32x158xf32>, vector<2x158xf32> -> vector<2x158xf32>
    %c0_57 = arith.constant 0 : index
    %c0_58 = arith.constant 0 : index
    %171 = vector.load %arg9[%c0_57, %c0_58] : memref<1x158xf32, #tpu.memory_space<vmem>>, vector<1x158xf32>
    %172 = vector.broadcast %171 : vector<1x158xf32> to vector<2x158xf32>
    %173 = arith.addf %170, %172 : vector<2x158xf32>
    %174 = vector.extract_strided_slice %173 {offsets = [0, 0], sizes = [2, 128], strides = [1, 1]} : vector<2x158xf32> to vector<2x128xf32>
    %175 = vector.extract_strided_slice %173 {offsets = [0, 128], sizes = [2, 16], strides = [1, 1]} : vector<2x158xf32> to vector<2x16xf32>
    %176 = math.tanh %175 : vector<2x16xf32>
    %177 = vector.extract_strided_slice %173 {offsets = [0, 144], sizes = [2, 1], strides = [1, 1]} : vector<2x158xf32> to vector<2x1xf32>
    %178 = math.absf %177 : vector<2x1xf32>
    %cst_59 = arith.constant 0.000000e+00 : f32
    %179 = vector.broadcast %cst_59 : f32 to vector<2x1xf32>
    %180 = arith.subf %179, %178 : vector<2x1xf32>
    %181 = math.exp %180 : vector<2x1xf32>
    %cst_60 = arith.constant 1.000000e+00 : f32
    %182 = vector.broadcast %cst_60 : f32 to vector<2x1xf32>
    %183 = arith.addf %182, %181 : vector<2x1xf32>
    %184 = math.log %183 : vector<2x1xf32>
    %cst_61 = arith.constant 0.000000e+00 : f32
    %185 = vector.broadcast %cst_61 : f32 to vector<2x1xf32>
    %186 = arith.maximumf %177, %185 : vector<2x1xf32>
    %187 = arith.addf %184, %186 : vector<2x1xf32>
    %188 = vector.extract_strided_slice %173 {offsets = [0, 145], sizes = [2, 1], strides = [1, 1]} : vector<2x158xf32> to vector<2x1xf32>
    %189 = arith.negf %188 : vector<2x1xf32>
    %190 = math.exp %189 : vector<2x1xf32>
    %cst_62 = arith.constant 1.000000e+00 : f32
    %191 = vector.broadcast %cst_62 : f32 to vector<2x1xf32>
    %192 = arith.addf %191, %190 : vector<2x1xf32>
    %193 = arith.divf %191, %192 : vector<2x1xf32>
    %194 = vector.extract_strided_slice %173 {offsets = [0, 146], sizes = [2, 3], strides = [1, 1]} : vector<2x158xf32> to vector<2x3xf32>
    %cst_63 = arith.constant dense<0xFF800000> : vector<2xf32>
    %195 = vector.multi_reduction <maximumf>, %194, %cst_63 [1] : vector<2x3xf32> to vector<2xf32>
    %196 = vector.shape_cast %195 : vector<2xf32> to vector<2x1xf32>
    %197 = vector.broadcast %196 : vector<2x1xf32> to vector<2x3xf32>
    %198 = arith.subf %194, %197 : vector<2x3xf32>
    %199 = math.exp %198 : vector<2x3xf32>
    %cst_64 = arith.constant dense<0.000000e+00> : vector<2xf32>
    %200 = vector.multi_reduction <add>, %199, %cst_64 [1] : vector<2x3xf32> to vector<2xf32>
    %201 = vector.shape_cast %200 : vector<2xf32> to vector<2x1xf32>
    %202 = vector.broadcast %201 : vector<2x1xf32> to vector<2x3xf32>
    %203 = arith.divf %199, %202 : vector<2x3xf32>
    %204 = vector.extract_strided_slice %173 {offsets = [0, 149], sizes = [2, 1], strides = [1, 1]} : vector<2x158xf32> to vector<2x1xf32>
    %205 = math.absf %204 : vector<2x1xf32>
    %cst_65 = arith.constant 0.000000e+00 : f32
    %206 = vector.broadcast %cst_65 : f32 to vector<2x1xf32>
    %207 = arith.subf %206, %205 : vector<2x1xf32>
    %208 = math.exp %207 : vector<2x1xf32>
    %cst_66 = arith.constant 1.000000e+00 : f32
    %209 = vector.broadcast %cst_66 : f32 to vector<2x1xf32>
    %210 = arith.addf %209, %208 : vector<2x1xf32>
    %211 = math.log %210 : vector<2x1xf32>
    %cst_67 = arith.constant 0.000000e+00 : f32
    %212 = vector.broadcast %cst_67 : f32 to vector<2x1xf32>
    %213 = arith.maximumf %204, %212 : vector<2x1xf32>
    %214 = arith.addf %211, %213 : vector<2x1xf32>
    %cst_68 = arith.constant 1.000000e+00 : f32
    %215 = vector.broadcast %cst_68 : f32 to vector<2x1xf32>
    %216 = arith.addf %215, %214 : vector<2x1xf32>
    %217 = vector.extract_strided_slice %173 {offsets = [0, 150], sizes = [2, 8], strides = [1, 1]} : vector<2x158xf32> to vector<2x8xf32>
    %218 = arith.mulf %176, %176 : vector<2x16xf32>
    %cst_69 = arith.constant dense<0.000000e+00> : vector<2xf32>
    %219 = vector.multi_reduction <add>, %218, %cst_69 [1] : vector<2x16xf32> to vector<2xf32>
    %220 = vector.shape_cast %219 : vector<2xf32> to vector<2x1xf32>
    %221 = math.sqrt %220 : vector<2x1xf32>
    %cst_70 = arith.constant 9.99999993E-9 : f32
    %222 = vector.broadcast %cst_70 : f32 to vector<2x1xf32>
    %223 = arith.addf %221, %222 : vector<2x1xf32>
    %cst_71 = arith.constant 1.000000e+00 : f32
    %224 = vector.broadcast %cst_71 : f32 to vector<2x1xf32>
    %225 = arith.divf %224, %223 : vector<2x1xf32>
    %c0_72 = arith.constant 0 : index
    %c0_73 = arith.constant 0 : index
    %226 = vector.load %arg2[%c0_72, %c0_73] : memref<16x16xf32, #tpu.memory_space<vmem>>, vector<16x16xf32>
    %cst_74 = arith.constant dense<0.000000e+00> : vector<2x16xf32>
    %227 = tpu.matmul %176, %226, %cst_74 {dimension_numbers = #tpu.dot_dimension_numbers<[1], [1], [0], [0], [0, 0, 1, 0], [], []>} : vector<2x16xf32>, vector<16x16xf32>, vector<2x16xf32> -> vector<2x16xf32>
    %c0_75 = arith.constant 0 : index
    %c0_76 = arith.constant 0 : index
    %228 = vector.load %arg4[%c0_75, %c0_76] : memref<1x16xf32, #tpu.memory_space<vmem>>, vector<1x16xf32>
    %229 = vector.broadcast %225 : vector<2x1xf32> to vector<2x16xf32>
    %230 = vector.broadcast %228 : vector<1x16xf32> to vector<2x16xf32>
    %231 = arith.mulf %229, %230 : vector<2x16xf32>
    %232 = arith.mulf %227, %231 : vector<2x16xf32>
    %233 = vector.broadcast %187 : vector<2x1xf32> to vector<2x16xf32>
    %234 = arith.mulf %233, %232 : vector<2x16xf32>
    %cst_77 = arith.constant dense<0xFF800000> : vector<2xf32>
    %235 = vector.multi_reduction <maximumf>, %234, %cst_77 [1] : vector<2x16xf32> to vector<2xf32>
    %236 = vector.shape_cast %235 : vector<2xf32> to vector<2x1xf32>
    %237 = vector.broadcast %236 : vector<2x1xf32> to vector<2x16xf32>
    %238 = arith.subf %234, %237 : vector<2x16xf32>
    %239 = math.exp %238 : vector<2x16xf32>
    %cst_78 = arith.constant dense<0.000000e+00> : vector<2xf32>
    %240 = vector.multi_reduction <add>, %239, %cst_78 [1] : vector<2x16xf32> to vector<2xf32>
    %241 = vector.shape_cast %240 : vector<2xf32> to vector<2x1xf32>
    %242 = vector.broadcast %241 : vector<2x1xf32> to vector<2x16xf32>
    %243 = arith.divf %239, %242 : vector<2x16xf32>
    %244 = vector.broadcast %193 : vector<2x1xf32> to vector<2x16xf32>
    %245 = arith.mulf %244, %243 : vector<2x16xf32>
    %cst_79 = arith.constant 1.000000e+00 : f32
    %246 = vector.broadcast %cst_79 : f32 to vector<2x1xf32>
    %247 = arith.subf %246, %193 : vector<2x1xf32>
    %248 = vector.broadcast %247 : vector<2x1xf32> to vector<2x16xf32>
    %249 = arith.mulf %248, %139 : vector<2x16xf32>
    %250 = arith.addf %245, %249 : vector<2x16xf32>
    %c0_80 = arith.constant 0 : index
    %c0_81 = arith.constant 0 : index
    %251 = vector.load %arg10[%c0_80, %c0_81] : memref<16x32xf32, #tpu.memory_space<vmem>>, vector<16x32xf32>
    %cst_82 = arith.constant dense<0.000000e+00> : vector<2x32xf32>
    %252 = tpu.matmul %250, %251, %cst_82 {dimension_numbers = #tpu.dot_dimension_numbers<[1], [0], [0], [1], [0, 0, 1, 1], [], []>} : vector<2x16xf32>, vector<16x32xf32>, vector<2x32xf32> -> vector<2x32xf32>
    %253 = vector.extract_strided_slice %203 {offsets = [0, 0], sizes = [2, 1], strides = [1, 1]} : vector<2x3xf32> to vector<2x1xf32>
    %254 = vector.extract_strided_slice %252 {offsets = [0, 0], sizes = [2, 16], strides = [1, 1]} : vector<2x32xf32> to vector<2x16xf32>
    %255 = vector.broadcast %253 : vector<2x1xf32> to vector<2x16xf32>
    %256 = arith.mulf %255, %254 : vector<2x16xf32>
    %257 = vector.extract_strided_slice %203 {offsets = [0, 1], sizes = [2, 1], strides = [1, 1]} : vector<2x3xf32> to vector<2x1xf32>
    %258 = vector.broadcast %257 : vector<2x1xf32> to vector<2x16xf32>
    %259 = arith.mulf %258, %250 : vector<2x16xf32>
    %260 = arith.addf %256, %259 : vector<2x16xf32>
    %261 = vector.extract_strided_slice %203 {offsets = [0, 2], sizes = [2, 1], strides = [1, 1]} : vector<2x3xf32> to vector<2x1xf32>
    %262 = vector.extract_strided_slice %252 {offsets = [0, 16], sizes = [2, 16], strides = [1, 1]} : vector<2x32xf32> to vector<2x16xf32>
    %263 = vector.broadcast %261 : vector<2x1xf32> to vector<2x16xf32>
    %264 = arith.mulf %263, %262 : vector<2x16xf32>
    %265 = arith.addf %260, %264 : vector<2x16xf32>
    %cst_83 = arith.constant 9.99999993E-9 : f32
    %266 = vector.broadcast %cst_83 : f32 to vector<2x16xf32>
    %267 = arith.addf %265, %266 : vector<2x16xf32>
    %268 = math.log %267 : vector<2x16xf32>
    %269 = vector.broadcast %216 : vector<2x1xf32> to vector<2x16xf32>
    %270 = arith.mulf %269, %268 : vector<2x16xf32>
    %271 = math.exp %270 : vector<2x16xf32>
    %cst_84 = arith.constant dense<0.000000e+00> : vector<2xf32>
    %272 = vector.multi_reduction <add>, %271, %cst_84 [1] : vector<2x16xf32> to vector<2xf32>
    %273 = vector.shape_cast %272 : vector<2xf32> to vector<2x1xf32>
    %274 = vector.broadcast %273 : vector<2x1xf32> to vector<2x16xf32>
    %275 = arith.divf %271, %274 : vector<2x16xf32>
    %c0_85 = arith.constant 0 : index
    %c0_86 = arith.constant 0 : index
    %276 = vector.load %arg3[%c0_85, %c0_86] : memref<16x152xf32, #tpu.memory_space<vmem>>, vector<16x152xf32>
    %cst_87 = arith.constant dense<0.000000e+00> : vector<2x152xf32>
    %277 = tpu.matmul %275, %276, %cst_87 {dimension_numbers = #tpu.dot_dimension_numbers<[1], [0], [0], [1], [0, 0, 1, 1], [], []>} : vector<2x16xf32>, vector<16x152xf32>, vector<2x152xf32> -> vector<2x152xf32>
    %278 = vector.extract_strided_slice %277 {offsets = [0, 0], sizes = [2, 128], strides = [1, 1]} : vector<2x152xf32> to vector<2x128xf32>
    %279 = vector.extract_strided_slice %277 {offsets = [0, 144], sizes = [2, 8], strides = [1, 1]} : vector<2x152xf32> to vector<2x8xf32>
    %280 = arith.addf %217, %279 : vector<2x8xf32>
    %c1 = arith.constant 1 : index
    %c0_88 = arith.constant 0 : index
    %c0_89 = arith.constant 0 : index
    %281 = vector.load %arg11[%c1, %c0_88, %c0_89] : memref<8x2x8xf32, #tpu.memory_space<vmem>>, vector<1x2x8xf32>
    %282 = vector.shape_cast %281 : vector<1x2x8xf32> to vector<2x8xf32>
    %283 = vector.shape_cast %280 : vector<2x8xf32> to vector<1x2x8xf32>
    tpu.vector_store %arg11[%c1, %c0_88, %c0_89], %283 {strides = array<i32>} : memref<8x2x8xf32, #tpu.memory_space<vmem>>, vector<1x2x8xf32>,
    %284 = vector.extract_strided_slice %7 {offsets = [4, 0], sizes = [2, 128], strides = [1, 1]} : vector<16x128xf32> to vector<2x128xf32>
    %285 = arith.addf %284, %278 : vector<2x128xf32>
    %286 = arith.addf %285, %174 : vector<2x128xf32>
    %c0_90 = arith.constant 0 : index
    %c0_91 = arith.constant 0 : index
    %287 = vector.load %arg7[%c0_90, %c0_91] : memref<1x128xf32, #tpu.memory_space<vmem>>, vector<1x128xf32>
    %288 = vector.broadcast %287 : vector<1x128xf32> to vector<2x128xf32>
    %289 = arith.addf %286, %288 : vector<2x128xf32>
    %290 = arith.negf %289 : vector<2x128xf32>
    %291 = math.exp %290 : vector<2x128xf32>
    %cst_92 = arith.constant 1.000000e+00 : f32
    %292 = vector.broadcast %cst_92 : f32 to vector<2x128xf32>
    %293 = arith.addf %292, %291 : vector<2x128xf32>
    %294 = arith.divf %292, %293 : vector<2x128xf32>
    %295 = math.tanh %289 : vector<2x128xf32>
    %296 = vector.extract_strided_slice %294 {offsets = [0, 0], sizes = [2, 32], strides = [1, 1]} : vector<2x128xf32> to vector<2x32xf32>
    %297 = vector.extract_strided_slice %294 {offsets = [0, 32], sizes = [2, 32], strides = [1, 1]} : vector<2x128xf32> to vector<2x32xf32>
    %298 = vector.extract_strided_slice %295 {offsets = [0, 64], sizes = [2, 32], strides = [1, 1]} : vector<2x128xf32> to vector<2x32xf32>
    %299 = vector.extract_strided_slice %294 {offsets = [0, 96], sizes = [2, 32], strides = [1, 1]} : vector<2x128xf32> to vector<2x32xf32>
    %300 = arith.mulf %297, %166 : vector<2x32xf32>
    %301 = arith.mulf %296, %298 : vector<2x32xf32>
    %302 = arith.addf %300, %301 : vector<2x32xf32>
    %303 = math.tanh %302 : vector<2x32xf32>
    %304 = arith.mulf %299, %303 : vector<2x32xf32>
    %c0_93 = arith.constant 0 : index
    %c0_94 = arith.constant 0 : index
    %305 = vector.load %arg8[%c0_93, %c0_94] : memref<32x158xf32, #tpu.memory_space<vmem>>, vector<32x158xf32>
    %cst_95 = arith.constant dense<0.000000e+00> : vector<2x158xf32>
    %306 = tpu.matmul %304, %305, %cst_95 {dimension_numbers = #tpu.dot_dimension_numbers<[1], [0], [0], [1], [0, 0, 1, 1], [], []>} : vector<2x32xf32>, vector<32x158xf32>, vector<2x158xf32> -> vector<2x158xf32>
    %c0_96 = arith.constant 0 : index
    %c0_97 = arith.constant 0 : index
    %307 = vector.load %arg9[%c0_96, %c0_97] : memref<1x158xf32, #tpu.memory_space<vmem>>, vector<1x158xf32>
    %308 = vector.broadcast %307 : vector<1x158xf32> to vector<2x158xf32>
    %309 = arith.addf %306, %308 : vector<2x158xf32>
    %310 = vector.extract_strided_slice %309 {offsets = [0, 0], sizes = [2, 128], strides = [1, 1]} : vector<2x158xf32> to vector<2x128xf32>
    %311 = vector.extract_strided_slice %309 {offsets = [0, 128], sizes = [2, 16], strides = [1, 1]} : vector<2x158xf32> to vector<2x16xf32>
    %312 = math.tanh %311 : vector<2x16xf32>
    %313 = vector.extract_strided_slice %309 {offsets = [0, 144], sizes = [2, 1], strides = [1, 1]} : vector<2x158xf32> to vector<2x1xf32>
    %314 = math.absf %313 : vector<2x1xf32>
    %cst_98 = arith.constant 0.000000e+00 : f32
    %315 = vector.broadcast %cst_98 : f32 to vector<2x1xf32>
    %316 = arith.subf %315, %314 : vector<2x1xf32>
    %317 = math.exp %316 : vector<2x1xf32>
    %cst_99 = arith.constant 1.000000e+00 : f32
    %318 = vector.broadcast %cst_99 : f32 to vector<2x1xf32>
    %319 = arith.addf %318, %317 : vector<2x1xf32>
    %320 = math.log %319 : vector<2x1xf32>
    %cst_100 = arith.constant 0.000000e+00 : f32
    %321 = vector.broadcast %cst_100 : f32 to vector<2x1xf32>
    %322 = arith.maximumf %313, %321 : vector<2x1xf32>
    %323 = arith.addf %320, %322 : vector<2x1xf32>
    %324 = vector.extract_strided_slice %309 {offsets = [0, 145], sizes = [2, 1], strides = [1, 1]} : vector<2x158xf32> to vector<2x1xf32>
    %325 = arith.negf %324 : vector<2x1xf32>
    %326 = math.exp %325 : vector<2x1xf32>
    %cst_101 = arith.constant 1.000000e+00 : f32
    %327 = vector.broadcast %cst_101 : f32 to vector<2x1xf32>
    %328 = arith.addf %327, %326 : vector<2x1xf32>
    %329 = arith.divf %327, %328 : vector<2x1xf32>
    %330 = vector.extract_strided_slice %309 {offsets = [0, 146], sizes = [2, 3], strides = [1, 1]} : vector<2x158xf32> to vector<2x3xf32>
    %cst_102 = arith.constant dense<0xFF800000> : vector<2xf32>
    %331 = vector.multi_reduction <maximumf>, %330, %cst_102 [1] : vector<2x3xf32> to vector<2xf32>
    %332 = vector.shape_cast %331 : vector<2xf32> to vector<2x1xf32>
    %333 = vector.broadcast %332 : vector<2x1xf32> to vector<2x3xf32>
    %334 = arith.subf %330, %333 : vector<2x3xf32>
    %335 = math.exp %334 : vector<2x3xf32>
    %cst_103 = arith.constant dense<0.000000e+00> : vector<2xf32>
    %336 = vector.multi_reduction <add>, %335, %cst_103 [1] : vector<2x3xf32> to vector<2xf32>
    %337 = vector.shape_cast %336 : vector<2xf32> to vector<2x1xf32>
    %338 = vector.broadcast %337 : vector<2x1xf32> to vector<2x3xf32>
    %339 = arith.divf %335, %338 : vector<2x3xf32>
    %340 = vector.extract_strided_slice %309 {offsets = [0, 149], sizes = [2, 1], strides = [1, 1]} : vector<2x158xf32> to vector<2x1xf32>
    %341 = math.absf %340 : vector<2x1xf32>
    %cst_104 = arith.constant 0.000000e+00 : f32
    %342 = vector.broadcast %cst_104 : f32 to vector<2x1xf32>
    %343 = arith.subf %342, %341 : vector<2x1xf32>
    %344 = math.exp %343 : vector<2x1xf32>
    %cst_105 = arith.constant 1.000000e+00 : f32
    %345 = vector.broadcast %cst_105 : f32 to vector<2x1xf32>
    %346 = arith.addf %345, %344 : vector<2x1xf32>
    %347 = math.log %346 : vector<2x1xf32>
    %cst_106 = arith.constant 0.000000e+00 : f32
    %348 = vector.broadcast %cst_106 : f32 to vector<2x1xf32>
    %349 = arith.maximumf %340, %348 : vector<2x1xf32>
    %350 = arith.addf %347, %349 : vector<2x1xf32>
    %cst_107 = arith.constant 1.000000e+00 : f32
    %351 = vector.broadcast %cst_107 : f32 to vector<2x1xf32>
    %352 = arith.addf %351, %350 : vector<2x1xf32>
    %353 = vector.extract_strided_slice %309 {offsets = [0, 150], sizes = [2, 8], strides = [1, 1]} : vector<2x158xf32> to vector<2x8xf32>
    %354 = arith.mulf %312, %312 : vector<2x16xf32>
    %cst_108 = arith.constant dense<0.000000e+00> : vector<2xf32>
    %355 = vector.multi_reduction <add>, %354, %cst_108 [1] : vector<2x16xf32> to vector<2xf32>
    %356 = vector.shape_cast %355 : vector<2xf32> to vector<2x1xf32>
    %357 = math.sqrt %356 : vector<2x1xf32>
    %cst_109 = arith.constant 9.99999993E-9 : f32
    %358 = vector.broadcast %cst_109 : f32 to vector<2x1xf32>
    %359 = arith.addf %357, %358 : vector<2x1xf32>
    %cst_110 = arith.constant 1.000000e+00 : f32
    %360 = vector.broadcast %cst_110 : f32 to vector<2x1xf32>
    %361 = arith.divf %360, %359 : vector<2x1xf32>
    %c0_111 = arith.constant 0 : index
    %c0_112 = arith.constant 0 : index
    %362 = vector.load %arg2[%c0_111, %c0_112] : memref<16x16xf32, #tpu.memory_space<vmem>>, vector<16x16xf32>
    %cst_113 = arith.constant dense<0.000000e+00> : vector<2x16xf32>
    %363 = tpu.matmul %312, %362, %cst_113 {dimension_numbers = #tpu.dot_dimension_numbers<[1], [1], [0], [0], [0, 0, 1, 0], [], []>} : vector<2x16xf32>, vector<16x16xf32>, vector<2x16xf32> -> vector<2x16xf32>
    %c0_114 = arith.constant 0 : index
    %c0_115 = arith.constant 0 : index
    %364 = vector.load %arg4[%c0_114, %c0_115] : memref<1x16xf32, #tpu.memory_space<vmem>>, vector<1x16xf32>
    %365 = vector.broadcast %361 : vector<2x1xf32> to vector<2x16xf32>
    %366 = vector.broadcast %364 : vector<1x16xf32> to vector<2x16xf32>
    %367 = arith.mulf %365, %366 : vector<2x16xf32>
    %368 = arith.mulf %363, %367 : vector<2x16xf32>
    %369 = vector.broadcast %323 : vector<2x1xf32> to vector<2x16xf32>
    %370 = arith.mulf %369, %368 : vector<2x16xf32>
    %cst_116 = arith.constant dense<0xFF800000> : vector<2xf32>
    %371 = vector.multi_reduction <maximumf>, %370, %cst_116 [1] : vector<2x16xf32> to vector<2xf32>
    %372 = vector.shape_cast %371 : vector<2xf32> to vector<2x1xf32>
    %373 = vector.broadcast %372 : vector<2x1xf32> to vector<2x16xf32>
    %374 = arith.subf %370, %373 : vector<2x16xf32>
    %375 = math.exp %374 : vector<2x16xf32>
    %cst_117 = arith.constant dense<0.000000e+00> : vector<2xf32>
    %376 = vector.multi_reduction <add>, %375, %cst_117 [1] : vector<2x16xf32> to vector<2xf32>
    %377 = vector.shape_cast %376 : vector<2xf32> to vector<2x1xf32>
    %378 = vector.broadcast %377 : vector<2x1xf32> to vector<2x16xf32>
    %379 = arith.divf %375, %378 : vector<2x16xf32>
    %380 = vector.broadcast %329 : vector<2x1xf32> to vector<2x16xf32>
    %381 = arith.mulf %380, %379 : vector<2x16xf32>
    %cst_118 = arith.constant 1.000000e+00 : f32
    %382 = vector.broadcast %cst_118 : f32 to vector<2x1xf32>
    %383 = arith.subf %382, %329 : vector<2x1xf32>
    %384 = vector.broadcast %383 : vector<2x1xf32> to vector<2x16xf32>
    %385 = arith.mulf %384, %275 : vector<2x16xf32>
    %386 = arith.addf %381, %385 : vector<2x16xf32>
    %c0_119 = arith.constant 0 : index
    %c0_120 = arith.constant 0 : index
    %387 = vector.load %arg10[%c0_119, %c0_120] : memref<16x32xf32, #tpu.memory_space<vmem>>, vector<16x32xf32>
    %cst_121 = arith.constant dense<0.000000e+00> : vector<2x32xf32>
    %388 = tpu.matmul %386, %387, %cst_121 {dimension_numbers = #tpu.dot_dimension_numbers<[1], [0], [0], [1], [0, 0, 1, 1], [], []>} : vector<2x16xf32>, vector<16x32xf32>, vector<2x32xf32> -> vector<2x32xf32>
    %389 = vector.extract_strided_slice %339 {offsets = [0, 0], sizes = [2, 1], strides = [1, 1]} : vector<2x3xf32> to vector<2x1xf32>
    %390 = vector.extract_strided_slice %388 {offsets = [0, 0], sizes = [2, 16], strides = [1, 1]} : vector<2x32xf32> to vector<2x16xf32>
    %391 = vector.broadcast %389 : vector<2x1xf32> to vector<2x16xf32>
    %392 = arith.mulf %391, %390 : vector<2x16xf32>
    %393 = vector.extract_strided_slice %339 {offsets = [0, 1], sizes = [2, 1], strides = [1, 1]} : vector<2x3xf32> to vector<2x1xf32>
    %394 = vector.broadcast %393 : vector<2x1xf32> to vector<2x16xf32>
    %395 = arith.mulf %394, %386 : vector<2x16xf32>
    %396 = arith.addf %392, %395 : vector<2x16xf32>
    %397 = vector.extract_strided_slice %339 {offsets = [0, 2], sizes = [2, 1], strides = [1, 1]} : vector<2x3xf32> to vector<2x1xf32>
    %398 = vector.extract_strided_slice %388 {offsets = [0, 16], sizes = [2, 16], strides = [1, 1]} : vector<2x32xf32> to vector<2x16xf32>
    %399 = vector.broadcast %397 : vector<2x1xf32> to vector<2x16xf32>
    %400 = arith.mulf %399, %398 : vector<2x16xf32>
    %401 = arith.addf %396, %400 : vector<2x16xf32>
    %cst_122 = arith.constant 9.99999993E-9 : f32
    %402 = vector.broadcast %cst_122 : f32 to vector<2x16xf32>
    %403 = arith.addf %401, %402 : vector<2x16xf32>
    %404 = math.log %403 : vector<2x16xf32>
    %405 = vector.broadcast %352 : vector<2x1xf32> to vector<2x16xf32>
    %406 = arith.mulf %405, %404 : vector<2x16xf32>
    %407 = math.exp %406 : vector<2x16xf32>
    %cst_123 = arith.constant dense<0.000000e+00> : vector<2xf32>
    %408 = vector.multi_reduction <add>, %407, %cst_123 [1] : vector<2x16xf32> to vector<2xf32>
    %409 = vector.shape_cast %408 : vector<2xf32> to vector<2x1xf32>
    %410 = vector.broadcast %409 : vector<2x1xf32> to vector<2x16xf32>
    %411 = arith.divf %407, %410 : vector<2x16xf32>
    %c0_124 = arith.constant 0 : index
    %c0_125 = arith.constant 0 : index
    %412 = vector.load %arg3[%c0_124, %c0_125] : memref<16x152xf32, #tpu.memory_space<vmem>>, vector<16x152xf32>
    %cst_126 = arith.constant dense<0.000000e+00> : vector<2x152xf32>
    %413 = tpu.matmul %411, %412, %cst_126 {dimension_numbers = #tpu.dot_dimension_numbers<[1], [0], [0], [1], [0, 0, 1, 1], [], []>} : vector<2x16xf32>, vector<16x152xf32>, vector<2x152xf32> -> vector<2x152xf32>
    %414 = vector.extract_strided_slice %413 {offsets = [0, 0], sizes = [2, 128], strides = [1, 1]} : vector<2x152xf32> to vector<2x128xf32>
    %415 = vector.extract_strided_slice %413 {offsets = [0, 144], sizes = [2, 8], strides = [1, 1]} : vector<2x152xf32> to vector<2x8xf32>
    %416 = arith.addf %353, %415 : vector<2x8xf32>
    %c2 = arith.constant 2 : index
    %c0_127 = arith.constant 0 : index
    %c0_128 = arith.constant 0 : index
    %417 = vector.load %arg11[%c2, %c0_127, %c0_128] : memref<8x2x8xf32, #tpu.memory_space<vmem>>, vector<1x2x8xf32>
    %418 = vector.shape_cast %417 : vector<1x2x8xf32> to vector<2x8xf32>
    %419 = vector.shape_cast %416 : vector<2x8xf32> to vector<1x2x8xf32>
    tpu.vector_store %arg11[%c2, %c0_127, %c0_128], %419 {strides = array<i32>} : memref<8x2x8xf32, #tpu.memory_space<vmem>>, vector<1x2x8xf32>,
    %420 = vector.extract_strided_slice %7 {offsets = [6, 0], sizes = [2, 128], strides = [1, 1]} : vector<16x128xf32> to vector<2x128xf32>
    %421 = arith.addf %420, %414 : vector<2x128xf32>
    %422 = arith.addf %421, %310 : vector<2x128xf32>
    %c0_129 = arith.constant 0 : index
    %c0_130 = arith.constant 0 : index
    %423 = vector.load %arg7[%c0_129, %c0_130] : memref<1x128xf32, #tpu.memory_space<vmem>>, vector<1x128xf32>
    %424 = vector.broadcast %423 : vector<1x128xf32> to vector<2x128xf32>
    %425 = arith.addf %422, %424 : vector<2x128xf32>
    %426 = arith.negf %425 : vector<2x128xf32>
    %427 = math.exp %426 : vector<2x128xf32>
    %cst_131 = arith.constant 1.000000e+00 : f32
    %428 = vector.broadcast %cst_131 : f32 to vector<2x128xf32>
    %429 = arith.addf %428, %427 : vector<2x128xf32>
    %430 = arith.divf %428, %429 : vector<2x128xf32>
    %431 = math.tanh %425 : vector<2x128xf32>
    %432 = vector.extract_strided_slice %430 {offsets = [0, 0], sizes = [2, 32], strides = [1, 1]} : vector<2x128xf32> to vector<2x32xf32>
    %433 = vector.extract_strided_slice %430 {offsets = [0, 32], sizes = [2, 32], strides = [1, 1]} : vector<2x128xf32> to vector<2x32xf32>
    %434 = vector.extract_strided_slice %431 {offsets = [0, 64], sizes = [2, 32], strides = [1, 1]} : vector<2x128xf32> to vector<2x32xf32>
    %435 = vector.extract_strided_slice %430 {offsets = [0, 96], sizes = [2, 32], strides = [1, 1]} : vector<2x128xf32> to vector<2x32xf32>
    %436 = arith.mulf %433, %302 : vector<2x32xf32>
    %437 = arith.mulf %432, %434 : vector<2x32xf32>
    %438 = arith.addf %436, %437 : vector<2x32xf32>
    %439 = math.tanh %438 : vector<2x32xf32>
    %440 = arith.mulf %435, %439 : vector<2x32xf32>
    %c0_132 = arith.constant 0 : index
    %c0_133 = arith.constant 0 : index
    %441 = vector.load %arg8[%c0_132, %c0_133] : memref<32x158xf32, #tpu.memory_space<vmem>>, vector<32x158xf32>
    %cst_134 = arith.constant dense<0.000000e+00> : vector<2x158xf32>
    %442 = tpu.matmul %440, %441, %cst_134 {dimension_numbers = #tpu.dot_dimension_numbers<[1], [0], [0], [1], [0, 0, 1, 1], [], []>} : vector<2x32xf32>, vector<32x158xf32>, vector<2x158xf32> -> vector<2x158xf32>
    %c0_135 = arith.constant 0 : index
    %c0_136 = arith.constant 0 : index
    %443 = vector.load %arg9[%c0_135, %c0_136] : memref<1x158xf32, #tpu.memory_space<vmem>>, vector<1x158xf32>
    %444 = vector.broadcast %443 : vector<1x158xf32> to vector<2x158xf32>
    %445 = arith.addf %442, %444 : vector<2x158xf32>
    %446 = vector.extract_strided_slice %445 {offsets = [0, 0], sizes = [2, 128], strides = [1, 1]} : vector<2x158xf32> to vector<2x128xf32>
    %447 = vector.extract_strided_slice %445 {offsets = [0, 128], sizes = [2, 16], strides = [1, 1]} : vector<2x158xf32> to vector<2x16xf32>
    %448 = math.tanh %447 : vector<2x16xf32>
    %449 = vector.extract_strided_slice %445 {offsets = [0, 144], sizes = [2, 1], strides = [1, 1]} : vector<2x158xf32> to vector<2x1xf32>
    %450 = math.absf %449 : vector<2x1xf32>
    %cst_137 = arith.constant 0.000000e+00 : f32
    %451 = vector.broadcast %cst_137 : f32 to vector<2x1xf32>
    %452 = arith.subf %451, %450 : vector<2x1xf32>
    %453 = math.exp %452 : vector<2x1xf32>
    %cst_138 = arith.constant 1.000000e+00 : f32
    %454 = vector.broadcast %cst_138 : f32 to vector<2x1xf32>
    %455 = arith.addf %454, %453 : vector<2x1xf32>
    %456 = math.log %455 : vector<2x1xf32>
    %cst_139 = arith.constant 0.000000e+00 : f32
    %457 = vector.broadcast %cst_139 : f32 to vector<2x1xf32>
    %458 = arith.maximumf %449, %457 : vector<2x1xf32>
    %459 = arith.addf %456, %458 : vector<2x1xf32>
    %460 = vector.extract_strided_slice %445 {offsets = [0, 145], sizes = [2, 1], strides = [1, 1]} : vector<2x158xf32> to vector<2x1xf32>
    %461 = arith.negf %460 : vector<2x1xf32>
    %462 = math.exp %461 : vector<2x1xf32>
    %cst_140 = arith.constant 1.000000e+00 : f32
    %463 = vector.broadcast %cst_140 : f32 to vector<2x1xf32>
    %464 = arith.addf %463, %462 : vector<2x1xf32>
    %465 = arith.divf %463, %464 : vector<2x1xf32>
    %466 = vector.extract_strided_slice %445 {offsets = [0, 146], sizes = [2, 3], strides = [1, 1]} : vector<2x158xf32> to vector<2x3xf32>
    %cst_141 = arith.constant dense<0xFF800000> : vector<2xf32>
    %467 = vector.multi_reduction <maximumf>, %466, %cst_141 [1] : vector<2x3xf32> to vector<2xf32>
    %468 = vector.shape_cast %467 : vector<2xf32> to vector<2x1xf32>
    %469 = vector.broadcast %468 : vector<2x1xf32> to vector<2x3xf32>
    %470 = arith.subf %466, %469 : vector<2x3xf32>
    %471 = math.exp %470 : vector<2x3xf32>
    %cst_142 = arith.constant dense<0.000000e+00> : vector<2xf32>
    %472 = vector.multi_reduction <add>, %471, %cst_142 [1] : vector<2x3xf32> to vector<2xf32>
    %473 = vector.shape_cast %472 : vector<2xf32> to vector<2x1xf32>
    %474 = vector.broadcast %473 : vector<2x1xf32> to vector<2x3xf32>
    %475 = arith.divf %471, %474 : vector<2x3xf32>
    %476 = vector.extract_strided_slice %445 {offsets = [0, 149], sizes = [2, 1], strides = [1, 1]} : vector<2x158xf32> to vector<2x1xf32>
    %477 = math.absf %476 : vector<2x1xf32>
    %cst_143 = arith.constant 0.000000e+00 : f32
    %478 = vector.broadcast %cst_143 : f32 to vector<2x1xf32>
    %479 = arith.subf %478, %477 : vector<2x1xf32>
    %480 = math.exp %479 : vector<2x1xf32>
    %cst_144 = arith.constant 1.000000e+00 : f32
    %481 = vector.broadcast %cst_144 : f32 to vector<2x1xf32>
    %482 = arith.addf %481, %480 : vector<2x1xf32>
    %483 = math.log %482 : vector<2x1xf32>
    %cst_145 = arith.constant 0.000000e+00 : f32
    %484 = vector.broadcast %cst_145 : f32 to vector<2x1xf32>
    %485 = arith.maximumf %476, %484 : vector<2x1xf32>
    %486 = arith.addf %483, %485 : vector<2x1xf32>
    %cst_146 = arith.constant 1.000000e+00 : f32
    %487 = vector.broadcast %cst_146 : f32 to vector<2x1xf32>
    %488 = arith.addf %487, %486 : vector<2x1xf32>
    %489 = vector.extract_strided_slice %445 {offsets = [0, 150], sizes = [2, 8], strides = [1, 1]} : vector<2x158xf32> to vector<2x8xf32>
    %490 = arith.mulf %448, %448 : vector<2x16xf32>
    %cst_147 = arith.constant dense<0.000000e+00> : vector<2xf32>
    %491 = vector.multi_reduction <add>, %490, %cst_147 [1] : vector<2x16xf32> to vector<2xf32>
    %492 = vector.shape_cast %491 : vector<2xf32> to vector<2x1xf32>
    %493 = math.sqrt %492 : vector<2x1xf32>
    %cst_148 = arith.constant 9.99999993E-9 : f32
    %494 = vector.broadcast %cst_148 : f32 to vector<2x1xf32>
    %495 = arith.addf %493, %494 : vector<2x1xf32>
    %cst_149 = arith.constant 1.000000e+00 : f32
    %496 = vector.broadcast %cst_149 : f32 to vector<2x1xf32>
    %497 = arith.divf %496, %495 : vector<2x1xf32>
    %c0_150 = arith.constant 0 : index
    %c0_151 = arith.constant 0 : index
    %498 = vector.load %arg2[%c0_150, %c0_151] : memref<16x16xf32, #tpu.memory_space<vmem>>, vector<16x16xf32>
    %cst_152 = arith.constant dense<0.000000e+00> : vector<2x16xf32>
    %499 = tpu.matmul %448, %498, %cst_152 {dimension_numbers = #tpu.dot_dimension_numbers<[1], [1], [0], [0], [0, 0, 1, 0], [], []>} : vector<2x16xf32>, vector<16x16xf32>, vector<2x16xf32> -> vector<2x16xf32>
    %c0_153 = arith.constant 0 : index
    %c0_154 = arith.constant 0 : index
    %500 = vector.load %arg4[%c0_153, %c0_154] : memref<1x16xf32, #tpu.memory_space<vmem>>, vector<1x16xf32>
    %501 = vector.broadcast %497 : vector<2x1xf32> to vector<2x16xf32>
    %502 = vector.broadcast %500 : vector<1x16xf32> to vector<2x16xf32>
    %503 = arith.mulf %501, %502 : vector<2x16xf32>
    %504 = arith.mulf %499, %503 : vector<2x16xf32>
    %505 = vector.broadcast %459 : vector<2x1xf32> to vector<2x16xf32>
    %506 = arith.mulf %505, %504 : vector<2x16xf32>
    %cst_155 = arith.constant dense<0xFF800000> : vector<2xf32>
    %507 = vector.multi_reduction <maximumf>, %506, %cst_155 [1] : vector<2x16xf32> to vector<2xf32>
    %508 = vector.shape_cast %507 : vector<2xf32> to vector<2x1xf32>
    %509 = vector.broadcast %508 : vector<2x1xf32> to vector<2x16xf32>
    %510 = arith.subf %506, %509 : vector<2x16xf32>
    %511 = math.exp %510 : vector<2x16xf32>
    %cst_156 = arith.constant dense<0.000000e+00> : vector<2xf32>
    %512 = vector.multi_reduction <add>, %511, %cst_156 [1] : vector<2x16xf32> to vector<2xf32>
    %513 = vector.shape_cast %512 : vector<2xf32> to vector<2x1xf32>
    %514 = vector.broadcast %513 : vector<2x1xf32> to vector<2x16xf32>
    %515 = arith.divf %511, %514 : vector<2x16xf32>
    %516 = vector.broadcast %465 : vector<2x1xf32> to vector<2x16xf32>
    %517 = arith.mulf %516, %515 : vector<2x16xf32>
    %cst_157 = arith.constant 1.000000e+00 : f32
    %518 = vector.broadcast %cst_157 : f32 to vector<2x1xf32>
    %519 = arith.subf %518, %465 : vector<2x1xf32>
    %520 = vector.broadcast %519 : vector<2x1xf32> to vector<2x16xf32>
    %521 = arith.mulf %520, %411 : vector<2x16xf32>
    %522 = arith.addf %517, %521 : vector<2x16xf32>
    %c0_158 = arith.constant 0 : index
    %c0_159 = arith.constant 0 : index
    %523 = vector.load %arg10[%c0_158, %c0_159] : memref<16x32xf32, #tpu.memory_space<vmem>>, vector<16x32xf32>
    %cst_160 = arith.constant dense<0.000000e+00> : vector<2x32xf32>
    %524 = tpu.matmul %522, %523, %cst_160 {dimension_numbers = #tpu.dot_dimension_numbers<[1], [0], [0], [1], [0, 0, 1, 1], [], []>} : vector<2x16xf32>, vector<16x32xf32>, vector<2x32xf32> -> vector<2x32xf32>
    %525 = vector.extract_strided_slice %475 {offsets = [0, 0], sizes = [2, 1], strides = [1, 1]} : vector<2x3xf32> to vector<2x1xf32>
    %526 = vector.extract_strided_slice %524 {offsets = [0, 0], sizes = [2, 16], strides = [1, 1]} : vector<2x32xf32> to vector<2x16xf32>
    %527 = vector.broadcast %525 : vector<2x1xf32> to vector<2x16xf32>
    %528 = arith.mulf %527, %526 : vector<2x16xf32>
    %529 = vector.extract_strided_slice %475 {offsets = [0, 1], sizes = [2, 1], strides = [1, 1]} : vector<2x3xf32> to vector<2x1xf32>
    %530 = vector.broadcast %529 : vector<2x1xf32> to vector<2x16xf32>
    %531 = arith.mulf %530, %522 : vector<2x16xf32>
    %532 = arith.addf %528, %531 : vector<2x16xf32>
    %533 = vector.extract_strided_slice %475 {offsets = [0, 2], sizes = [2, 1], strides = [1, 1]} : vector<2x3xf32> to vector<2x1xf32>
    %534 = vector.extract_strided_slice %524 {offsets = [0, 16], sizes = [2, 16], strides = [1, 1]} : vector<2x32xf32> to vector<2x16xf32>
    %535 = vector.broadcast %533 : vector<2x1xf32> to vector<2x16xf32>
    %536 = arith.mulf %535, %534 : vector<2x16xf32>
    %537 = arith.addf %532, %536 : vector<2x16xf32>
    %cst_161 = arith.constant 9.99999993E-9 : f32
    %538 = vector.broadcast %cst_161 : f32 to vector<2x16xf32>
    %539 = arith.addf %537, %538 : vector<2x16xf32>
    %540 = math.log %539 : vector<2x16xf32>
    %541 = vector.broadcast %488 : vector<2x1xf32> to vector<2x16xf32>
    %542 = arith.mulf %541, %540 : vector<2x16xf32>
    %543 = math.exp %542 : vector<2x16xf32>
    %cst_162 = arith.constant dense<0.000000e+00> : vector<2xf32>
    %544 = vector.multi_reduction <add>, %543, %cst_162 [1] : vector<2x16xf32> to vector<2xf32>
    %545 = vector.shape_cast %544 : vector<2xf32> to vector<2x1xf32>
    %546 = vector.broadcast %545 : vector<2x1xf32> to vector<2x16xf32>
    %547 = arith.divf %543, %546 : vector<2x16xf32>
    %c0_163 = arith.constant 0 : index
    %c0_164 = arith.constant 0 : index
    %548 = vector.load %arg3[%c0_163, %c0_164] : memref<16x152xf32, #tpu.memory_space<vmem>>, vector<16x152xf32>
    %cst_165 = arith.constant dense<0.000000e+00> : vector<2x152xf32>
    %549 = tpu.matmul %547, %548, %cst_165 {dimension_numbers = #tpu.dot_dimension_numbers<[1], [0], [0], [1], [0, 0, 1, 1], [], []>} : vector<2x16xf32>, vector<16x152xf32>, vector<2x152xf32> -> vector<2x152xf32>
    %550 = vector.extract_strided_slice %549 {offsets = [0, 0], sizes = [2, 128], strides = [1, 1]} : vector<2x152xf32> to vector<2x128xf32>
    %551 = vector.extract_strided_slice %549 {offsets = [0, 144], sizes = [2, 8], strides = [1, 1]} : vector<2x152xf32> to vector<2x8xf32>
    %552 = arith.addf %489, %551 : vector<2x8xf32>
    %c3 = arith.constant 3 : index
    %c0_166 = arith.constant 0 : index
    %c0_167 = arith.constant 0 : index
    %553 = vector.load %arg11[%c3, %c0_166, %c0_167] : memref<8x2x8xf32, #tpu.memory_space<vmem>>, vector<1x2x8xf32>
    %554 = vector.shape_cast %553 : vector<1x2x8xf32> to vector<2x8xf32>
    %555 = vector.shape_cast %552 : vector<2x8xf32> to vector<1x2x8xf32>
    tpu.vector_store %arg11[%c3, %c0_166, %c0_167], %555 {strides = array<i32>} : memref<8x2x8xf32, #tpu.memory_space<vmem>>, vector<1x2x8xf32>,
    %556 = vector.extract_strided_slice %7 {offsets = [8, 0], sizes = [2, 128], strides = [1, 1]} : vector<16x128xf32> to vector<2x128xf32>
    %557 = arith.addf %556, %550 : vector<2x128xf32>
    %558 = arith.addf %557, %446 : vector<2x128xf32>
    %c0_168 = arith.constant 0 : index
    %c0_169 = arith.constant 0 : index
    %559 = vector.load %arg7[%c0_168, %c0_169] : memref<1x128xf32, #tpu.memory_space<vmem>>, vector<1x128xf32>
    %560 = vector.broadcast %559 : vector<1x128xf32> to vector<2x128xf32>
    %561 = arith.addf %558, %560 : vector<2x128xf32>
    %562 = arith.negf %561 : vector<2x128xf32>
    %563 = math.exp %562 : vector<2x128xf32>
    %cst_170 = arith.constant 1.000000e+00 : f32
    %564 = vector.broadcast %cst_170 : f32 to vector<2x128xf32>
    %565 = arith.addf %564, %563 : vector<2x128xf32>
    %566 = arith.divf %564, %565 : vector<2x128xf32>
    %567 = math.tanh %561 : vector<2x128xf32>
    %568 = vector.extract_strided_slice %566 {offsets = [0, 0], sizes = [2, 32], strides = [1, 1]} : vector<2x128xf32> to vector<2x32xf32>
    %569 = vector.extract_strided_slice %566 {offsets = [0, 32], sizes = [2, 32], strides = [1, 1]} : vector<2x128xf32> to vector<2x32xf32>
    %570 = vector.extract_strided_slice %567 {offsets = [0, 64], sizes = [2, 32], strides = [1, 1]} : vector<2x128xf32> to vector<2x32xf32>
    %571 = vector.extract_strided_slice %566 {offsets = [0, 96], sizes = [2, 32], strides = [1, 1]} : vector<2x128xf32> to vector<2x32xf32>
    %572 = arith.mulf %569, %438 : vector<2x32xf32>
    %573 = arith.mulf %568, %570 : vector<2x32xf32>
    %574 = arith.addf %572, %573 : vector<2x32xf32>
    %575 = math.tanh %574 : vector<2x32xf32>
    %576 = arith.mulf %571, %575 : vector<2x32xf32>
    %c0_171 = arith.constant 0 : index
    %c0_172 = arith.constant 0 : index
    %577 = vector.load %arg8[%c0_171, %c0_172] : memref<32x158xf32, #tpu.memory_space<vmem>>, vector<32x158xf32>
    %cst_173 = arith.constant dense<0.000000e+00> : vector<2x158xf32>
    %578 = tpu.matmul %576, %577, %cst_173 {dimension_numbers = #tpu.dot_dimension_numbers<[1], [0], [0], [1], [0, 0, 1, 1], [], []>} : vector<2x32xf32>, vector<32x158xf32>, vector<2x158xf32> -> vector<2x158xf32>
    %c0_174 = arith.constant 0 : index
    %c0_175 = arith.constant 0 : index
    %579 = vector.load %arg9[%c0_174, %c0_175] : memref<1x158xf32, #tpu.memory_space<vmem>>, vector<1x158xf32>
    %580 = vector.broadcast %579 : vector<1x158xf32> to vector<2x158xf32>
    %581 = arith.addf %578, %580 : vector<2x158xf32>
    %582 = vector.extract_strided_slice %581 {offsets = [0, 0], sizes = [2, 128], strides = [1, 1]} : vector<2x158xf32> to vector<2x128xf32>
    %583 = vector.extract_strided_slice %581 {offsets = [0, 128], sizes = [2, 16], strides = [1, 1]} : vector<2x158xf32> to vector<2x16xf32>
    %584 = math.tanh %583 : vector<2x16xf32>
    %585 = vector.extract_strided_slice %581 {offsets = [0, 144], sizes = [2, 1], strides = [1, 1]} : vector<2x158xf32> to vector<2x1xf32>
    %586 = math.absf %585 : vector<2x1xf32>
    %cst_176 = arith.constant 0.000000e+00 : f32
    %587 = vector.broadcast %cst_176 : f32 to vector<2x1xf32>
    %588 = arith.subf %587, %586 : vector<2x1xf32>
    %589 = math.exp %588 : vector<2x1xf32>
    %cst_177 = arith.constant 1.000000e+00 : f32
    %590 = vector.broadcast %cst_177 : f32 to vector<2x1xf32>
    %591 = arith.addf %590, %589 : vector<2x1xf32>
    %592 = math.log %591 : vector<2x1xf32>
    %cst_178 = arith.constant 0.000000e+00 : f32
    %593 = vector.broadcast %cst_178 : f32 to vector<2x1xf32>
    %594 = arith.maximumf %585, %593 : vector<2x1xf32>
    %595 = arith.addf %592, %594 : vector<2x1xf32>
    %596 = vector.extract_strided_slice %581 {offsets = [0, 145], sizes = [2, 1], strides = [1, 1]} : vector<2x158xf32> to vector<2x1xf32>
    %597 = arith.negf %596 : vector<2x1xf32>
    %598 = math.exp %597 : vector<2x1xf32>
    %cst_179 = arith.constant 1.000000e+00 : f32
    %599 = vector.broadcast %cst_179 : f32 to vector<2x1xf32>
    %600 = arith.addf %599, %598 : vector<2x1xf32>
    %601 = arith.divf %599, %600 : vector<2x1xf32>
    %602 = vector.extract_strided_slice %581 {offsets = [0, 146], sizes = [2, 3], strides = [1, 1]} : vector<2x158xf32> to vector<2x3xf32>
    %cst_180 = arith.constant dense<0xFF800000> : vector<2xf32>
    %603 = vector.multi_reduction <maximumf>, %602, %cst_180 [1] : vector<2x3xf32> to vector<2xf32>
    %604 = vector.shape_cast %603 : vector<2xf32> to vector<2x1xf32>
    %605 = vector.broadcast %604 : vector<2x1xf32> to vector<2x3xf32>
    %606 = arith.subf %602, %605 : vector<2x3xf32>
    %607 = math.exp %606 : vector<2x3xf32>
    %cst_181 = arith.constant dense<0.000000e+00> : vector<2xf32>
    %608 = vector.multi_reduction <add>, %607, %cst_181 [1] : vector<2x3xf32> to vector<2xf32>
    %609 = vector.shape_cast %608 : vector<2xf32> to vector<2x1xf32>
    %610 = vector.broadcast %609 : vector<2x1xf32> to vector<2x3xf32>
    %611 = arith.divf %607, %610 : vector<2x3xf32>
    %612 = vector.extract_strided_slice %581 {offsets = [0, 149], sizes = [2, 1], strides = [1, 1]} : vector<2x158xf32> to vector<2x1xf32>
    %613 = math.absf %612 : vector<2x1xf32>
    %cst_182 = arith.constant 0.000000e+00 : f32
    %614 = vector.broadcast %cst_182 : f32 to vector<2x1xf32>
    %615 = arith.subf %614, %613 : vector<2x1xf32>
    %616 = math.exp %615 : vector<2x1xf32>
    %cst_183 = arith.constant 1.000000e+00 : f32
    %617 = vector.broadcast %cst_183 : f32 to vector<2x1xf32>
    %618 = arith.addf %617, %616 : vector<2x1xf32>
    %619 = math.log %618 : vector<2x1xf32>
    %cst_184 = arith.constant 0.000000e+00 : f32
    %620 = vector.broadcast %cst_184 : f32 to vector<2x1xf32>
    %621 = arith.maximumf %612, %620 : vector<2x1xf32>
    %622 = arith.addf %619, %621 : vector<2x1xf32>
    %cst_185 = arith.constant 1.000000e+00 : f32
    %623 = vector.broadcast %cst_185 : f32 to vector<2x1xf32>
    %624 = arith.addf %623, %622 : vector<2x1xf32>
    %625 = vector.extract_strided_slice %581 {offsets = [0, 150], sizes = [2, 8], strides = [1, 1]} : vector<2x158xf32> to vector<2x8xf32>
    %626 = arith.mulf %584, %584 : vector<2x16xf32>
    %cst_186 = arith.constant dense<0.000000e+00> : vector<2xf32>
    %627 = vector.multi_reduction <add>, %626, %cst_186 [1] : vector<2x16xf32> to vector<2xf32>
    %628 = vector.shape_cast %627 : vector<2xf32> to vector<2x1xf32>
    %629 = math.sqrt %628 : vector<2x1xf32>
    %cst_187 = arith.constant 9.99999993E-9 : f32
    %630 = vector.broadcast %cst_187 : f32 to vector<2x1xf32>
    %631 = arith.addf %629, %630 : vector<2x1xf32>
    %cst_188 = arith.constant 1.000000e+00 : f32
    %632 = vector.broadcast %cst_188 : f32 to vector<2x1xf32>
    %633 = arith.divf %632, %631 : vector<2x1xf32>
    %c0_189 = arith.constant 0 : index
    %c0_190 = arith.constant 0 : index
    %634 = vector.load %arg2[%c0_189, %c0_190] : memref<16x16xf32, #tpu.memory_space<vmem>>, vector<16x16xf32>
    %cst_191 = arith.constant dense<0.000000e+00> : vector<2x16xf32>
    %635 = tpu.matmul %584, %634, %cst_191 {dimension_numbers = #tpu.dot_dimension_numbers<[1], [1], [0], [0], [0, 0, 1, 0], [], []>} : vector<2x16xf32>, vector<16x16xf32>, vector<2x16xf32> -> vector<2x16xf32>
    %c0_192 = arith.constant 0 : index
    %c0_193 = arith.constant 0 : index
    %636 = vector.load %arg4[%c0_192, %c0_193] : memref<1x16xf32, #tpu.memory_space<vmem>>, vector<1x16xf32>
    %637 = vector.broadcast %633 : vector<2x1xf32> to vector<2x16xf32>
    %638 = vector.broadcast %636 : vector<1x16xf32> to vector<2x16xf32>
    %639 = arith.mulf %637, %638 : vector<2x16xf32>
    %640 = arith.mulf %635, %639 : vector<2x16xf32>
    %641 = vector.broadcast %595 : vector<2x1xf32> to vector<2x16xf32>
    %642 = arith.mulf %641, %640 : vector<2x16xf32>
    %cst_194 = arith.constant dense<0xFF800000> : vector<2xf32>
    %643 = vector.multi_reduction <maximumf>, %642, %cst_194 [1] : vector<2x16xf32> to vector<2xf32>
    %644 = vector.shape_cast %643 : vector<2xf32> to vector<2x1xf32>
    %645 = vector.broadcast %644 : vector<2x1xf32> to vector<2x16xf32>
    %646 = arith.subf %642, %645 : vector<2x16xf32>
    %647 = math.exp %646 : vector<2x16xf32>
    %cst_195 = arith.constant dense<0.000000e+00> : vector<2xf32>
    %648 = vector.multi_reduction <add>, %647, %cst_195 [1] : vector<2x16xf32> to vector<2xf32>
    %649 = vector.shape_cast %648 : vector<2xf32> to vector<2x1xf32>
    %650 = vector.broadcast %649 : vector<2x1xf32> to vector<2x16xf32>
    %651 = arith.divf %647, %650 : vector<2x16xf32>
    %652 = vector.broadcast %601 : vector<2x1xf32> to vector<2x16xf32>
    %653 = arith.mulf %652, %651 : vector<2x16xf32>
    %cst_196 = arith.constant 1.000000e+00 : f32
    %654 = vector.broadcast %cst_196 : f32 to vector<2x1xf32>
    %655 = arith.subf %654, %601 : vector<2x1xf32>
    %656 = vector.broadcast %655 : vector<2x1xf32> to vector<2x16xf32>
    %657 = arith.mulf %656, %547 : vector<2x16xf32>
    %658 = arith.addf %653, %657 : vector<2x16xf32>
    %c0_197 = arith.constant 0 : index
    %c0_198 = arith.constant 0 : index
    %659 = vector.load %arg10[%c0_197, %c0_198] : memref<16x32xf32, #tpu.memory_space<vmem>>, vector<16x32xf32>
    %cst_199 = arith.constant dense<0.000000e+00> : vector<2x32xf32>
    %660 = tpu.matmul %658, %659, %cst_199 {dimension_numbers = #tpu.dot_dimension_numbers<[1], [0], [0], [1], [0, 0, 1, 1], [], []>} : vector<2x16xf32>, vector<16x32xf32>, vector<2x32xf32> -> vector<2x32xf32>
    %661 = vector.extract_strided_slice %611 {offsets = [0, 0], sizes = [2, 1], strides = [1, 1]} : vector<2x3xf32> to vector<2x1xf32>
    %662 = vector.extract_strided_slice %660 {offsets = [0, 0], sizes = [2, 16], strides = [1, 1]} : vector<2x32xf32> to vector<2x16xf32>
    %663 = vector.broadcast %661 : vector<2x1xf32> to vector<2x16xf32>
    %664 = arith.mulf %663, %662 : vector<2x16xf32>
    %665 = vector.extract_strided_slice %611 {offsets = [0, 1], sizes = [2, 1], strides = [1, 1]} : vector<2x3xf32> to vector<2x1xf32>
    %666 = vector.broadcast %665 : vector<2x1xf32> to vector<2x16xf32>
    %667 = arith.mulf %666, %658 : vector<2x16xf32>
    %668 = arith.addf %664, %667 : vector<2x16xf32>
    %669 = vector.extract_strided_slice %611 {offsets = [0, 2], sizes = [2, 1], strides = [1, 1]} : vector<2x3xf32> to vector<2x1xf32>
    %670 = vector.extract_strided_slice %660 {offsets = [0, 16], sizes = [2, 16], strides = [1, 1]} : vector<2x32xf32> to vector<2x16xf32>
    %671 = vector.broadcast %669 : vector<2x1xf32> to vector<2x16xf32>
    %672 = arith.mulf %671, %670 : vector<2x16xf32>
    %673 = arith.addf %668, %672 : vector<2x16xf32>
    %cst_200 = arith.constant 9.99999993E-9 : f32
    %674 = vector.broadcast %cst_200 : f32 to vector<2x16xf32>
    %675 = arith.addf %673, %674 : vector<2x16xf32>
    %676 = math.log %675 : vector<2x16xf32>
    %677 = vector.broadcast %624 : vector<2x1xf32> to vector<2x16xf32>
    %678 = arith.mulf %677, %676 : vector<2x16xf32>
    %679 = math.exp %678 : vector<2x16xf32>
    %cst_201 = arith.constant dense<0.000000e+00> : vector<2xf32>
    %680 = vector.multi_reduction <add>, %679, %cst_201 [1] : vector<2x16xf32> to vector<2xf32>
    %681 = vector.shape_cast %680 : vector<2xf32> to vector<2x1xf32>
    %682 = vector.broadcast %681 : vector<2x1xf32> to vector<2x16xf32>
    %683 = arith.divf %679, %682 : vector<2x16xf32>
    %c0_202 = arith.constant 0 : index
    %c0_203 = arith.constant 0 : index
    %684 = vector.load %arg3[%c0_202, %c0_203] : memref<16x152xf32, #tpu.memory_space<vmem>>, vector<16x152xf32>
    %cst_204 = arith.constant dense<0.000000e+00> : vector<2x152xf32>
    %685 = tpu.matmul %683, %684, %cst_204 {dimension_numbers = #tpu.dot_dimension_numbers<[1], [0], [0], [1], [0, 0, 1, 1], [], []>} : vector<2x16xf32>, vector<16x152xf32>, vector<2x152xf32> -> vector<2x152xf32>
    %686 = vector.extract_strided_slice %685 {offsets = [0, 0], sizes = [2, 128], strides = [1, 1]} : vector<2x152xf32> to vector<2x128xf32>
    %687 = vector.extract_strided_slice %685 {offsets = [0, 144], sizes = [2, 8], strides = [1, 1]} : vector<2x152xf32> to vector<2x8xf32>
    %688 = arith.addf %625, %687 : vector<2x8xf32>
    %c4 = arith.constant 4 : index
    %c0_205 = arith.constant 0 : index
    %c0_206 = arith.constant 0 : index
    %689 = vector.load %arg11[%c4, %c0_205, %c0_206] : memref<8x2x8xf32, #tpu.memory_space<vmem>>, vector<1x2x8xf32>
    %690 = vector.shape_cast %689 : vector<1x2x8xf32> to vector<2x8xf32>
    %691 = vector.shape_cast %688 : vector<2x8xf32> to vector<1x2x8xf32>
    tpu.vector_store %arg11[%c4, %c0_205, %c0_206], %691 {strides = array<i32>} : memref<8x2x8xf32, #tpu.memory_space<vmem>>, vector<1x2x8xf32>,
    %692 = vector.extract_strided_slice %7 {offsets = [10, 0], sizes = [2, 128], strides = [1, 1]} : vector<16x128xf32> to vector<2x128xf32>
    %693 = arith.addf %692, %686 : vector<2x128xf32>
    %694 = arith.addf %693, %582 : vector<2x128xf32>
    %c0_207 = arith.constant 0 : index
    %c0_208 = arith.constant 0 : index
    %695 = vector.load %arg7[%c0_207, %c0_208] : memref<1x128xf32, #tpu.memory_space<vmem>>, vector<1x128xf32>
    %696 = vector.broadcast %695 : vector<1x128xf32> to vector<2x128xf32>
    %697 = arith.addf %694, %696 : vector<2x128xf32>
    %698 = arith.negf %697 : vector<2x128xf32>
    %699 = math.exp %698 : vector<2x128xf32>
    %cst_209 = arith.constant 1.000000e+00 : f32
    %700 = vector.broadcast %cst_209 : f32 to vector<2x128xf32>
    %701 = arith.addf %700, %699 : vector<2x128xf32>
    %702 = arith.divf %700, %701 : vector<2x128xf32>
    %703 = math.tanh %697 : vector<2x128xf32>
    %704 = vector.extract_strided_slice %702 {offsets = [0, 0], sizes = [2, 32], strides = [1, 1]} : vector<2x128xf32> to vector<2x32xf32>
    %705 = vector.extract_strided_slice %702 {offsets = [0, 32], sizes = [2, 32], strides = [1, 1]} : vector<2x128xf32> to vector<2x32xf32>
    %706 = vector.extract_strided_slice %703 {offsets = [0, 64], sizes = [2, 32], strides = [1, 1]} : vector<2x128xf32> to vector<2x32xf32>
    %707 = vector.extract_strided_slice %702 {offsets = [0, 96], sizes = [2, 32], strides = [1, 1]} : vector<2x128xf32> to vector<2x32xf32>
    %708 = arith.mulf %705, %574 : vector<2x32xf32>
    %709 = arith.mulf %704, %706 : vector<2x32xf32>
    %710 = arith.addf %708, %709 : vector<2x32xf32>
    %711 = math.tanh %710 : vector<2x32xf32>
    %712 = arith.mulf %707, %711 : vector<2x32xf32>
    %c0_210 = arith.constant 0 : index
    %c0_211 = arith.constant 0 : index
    %713 = vector.load %arg8[%c0_210, %c0_211] : memref<32x158xf32, #tpu.memory_space<vmem>>, vector<32x158xf32>
    %cst_212 = arith.constant dense<0.000000e+00> : vector<2x158xf32>
    %714 = tpu.matmul %712, %713, %cst_212 {dimension_numbers = #tpu.dot_dimension_numbers<[1], [0], [0], [1], [0, 0, 1, 1], [], []>} : vector<2x32xf32>, vector<32x158xf32>, vector<2x158xf32> -> vector<2x158xf32>
    %c0_213 = arith.constant 0 : index
    %c0_214 = arith.constant 0 : index
    %715 = vector.load %arg9[%c0_213, %c0_214] : memref<1x158xf32, #tpu.memory_space<vmem>>, vector<1x158xf32>
    %716 = vector.broadcast %715 : vector<1x158xf32> to vector<2x158xf32>
    %717 = arith.addf %714, %716 : vector<2x158xf32>
    %718 = vector.extract_strided_slice %717 {offsets = [0, 0], sizes = [2, 128], strides = [1, 1]} : vector<2x158xf32> to vector<2x128xf32>
    %719 = vector.extract_strided_slice %717 {offsets = [0, 128], sizes = [2, 16], strides = [1, 1]} : vector<2x158xf32> to vector<2x16xf32>
    %720 = math.tanh %719 : vector<2x16xf32>
    %721 = vector.extract_strided_slice %717 {offsets = [0, 144], sizes = [2, 1], strides = [1, 1]} : vector<2x158xf32> to vector<2x1xf32>
    %722 = math.absf %721 : vector<2x1xf32>
    %cst_215 = arith.constant 0.000000e+00 : f32
    %723 = vector.broadcast %cst_215 : f32 to vector<2x1xf32>
    %724 = arith.subf %723, %722 : vector<2x1xf32>
    %725 = math.exp %724 : vector<2x1xf32>
    %cst_216 = arith.constant 1.000000e+00 : f32
    %726 = vector.broadcast %cst_216 : f32 to vector<2x1xf32>
    %727 = arith.addf %726, %725 : vector<2x1xf32>
    %728 = math.log %727 : vector<2x1xf32>
    %cst_217 = arith.constant 0.000000e+00 : f32
    %729 = vector.broadcast %cst_217 : f32 to vector<2x1xf32>
    %730 = arith.maximumf %721, %729 : vector<2x1xf32>
    %731 = arith.addf %728, %730 : vector<2x1xf32>
    %732 = vector.extract_strided_slice %717 {offsets = [0, 145], sizes = [2, 1], strides = [1, 1]} : vector<2x158xf32> to vector<2x1xf32>
    %733 = arith.negf %732 : vector<2x1xf32>
    %734 = math.exp %733 : vector<2x1xf32>
    %cst_218 = arith.constant 1.000000e+00 : f32
    %735 = vector.broadcast %cst_218 : f32 to vector<2x1xf32>
    %736 = arith.addf %735, %734 : vector<2x1xf32>
    %737 = arith.divf %735, %736 : vector<2x1xf32>
    %738 = vector.extract_strided_slice %717 {offsets = [0, 146], sizes = [2, 3], strides = [1, 1]} : vector<2x158xf32> to vector<2x3xf32>
    %cst_219 = arith.constant dense<0xFF800000> : vector<2xf32>
    %739 = vector.multi_reduction <maximumf>, %738, %cst_219 [1] : vector<2x3xf32> to vector<2xf32>
    %740 = vector.shape_cast %739 : vector<2xf32> to vector<2x1xf32>
    %741 = vector.broadcast %740 : vector<2x1xf32> to vector<2x3xf32>
    %742 = arith.subf %738, %741 : vector<2x3xf32>
    %743 = math.exp %742 : vector<2x3xf32>
    %cst_220 = arith.constant dense<0.000000e+00> : vector<2xf32>
    %744 = vector.multi_reduction <add>, %743, %cst_220 [1] : vector<2x3xf32> to vector<2xf32>
    %745 = vector.shape_cast %744 : vector<2xf32> to vector<2x1xf32>
    %746 = vector.broadcast %745 : vector<2x1xf32> to vector<2x3xf32>
    %747 = arith.divf %743, %746 : vector<2x3xf32>
    %748 = vector.extract_strided_slice %717 {offsets = [0, 149], sizes = [2, 1], strides = [1, 1]} : vector<2x158xf32> to vector<2x1xf32>
    %749 = math.absf %748 : vector<2x1xf32>
    %cst_221 = arith.constant 0.000000e+00 : f32
    %750 = vector.broadcast %cst_221 : f32 to vector<2x1xf32>
    %751 = arith.subf %750, %749 : vector<2x1xf32>
    %752 = math.exp %751 : vector<2x1xf32>
    %cst_222 = arith.constant 1.000000e+00 : f32
    %753 = vector.broadcast %cst_222 : f32 to vector<2x1xf32>
    %754 = arith.addf %753, %752 : vector<2x1xf32>
    %755 = math.log %754 : vector<2x1xf32>
    %cst_223 = arith.constant 0.000000e+00 : f32
    %756 = vector.broadcast %cst_223 : f32 to vector<2x1xf32>
    %757 = arith.maximumf %748, %756 : vector<2x1xf32>
    %758 = arith.addf %755, %757 : vector<2x1xf32>
    %cst_224 = arith.constant 1.000000e+00 : f32
    %759 = vector.broadcast %cst_224 : f32 to vector<2x1xf32>
    %760 = arith.addf %759, %758 : vector<2x1xf32>
    %761 = vector.extract_strided_slice %717 {offsets = [0, 150], sizes = [2, 8], strides = [1, 1]} : vector<2x158xf32> to vector<2x8xf32>
    %762 = arith.mulf %720, %720 : vector<2x16xf32>
    %cst_225 = arith.constant dense<0.000000e+00> : vector<2xf32>
    %763 = vector.multi_reduction <add>, %762, %cst_225 [1] : vector<2x16xf32> to vector<2xf32>
    %764 = vector.shape_cast %763 : vector<2xf32> to vector<2x1xf32>
    %765 = math.sqrt %764 : vector<2x1xf32>
    %cst_226 = arith.constant 9.99999993E-9 : f32
    %766 = vector.broadcast %cst_226 : f32 to vector<2x1xf32>
    %767 = arith.addf %765, %766 : vector<2x1xf32>
    %cst_227 = arith.constant 1.000000e+00 : f32
    %768 = vector.broadcast %cst_227 : f32 to vector<2x1xf32>
    %769 = arith.divf %768, %767 : vector<2x1xf32>
    %c0_228 = arith.constant 0 : index
    %c0_229 = arith.constant 0 : index
    %770 = vector.load %arg2[%c0_228, %c0_229] : memref<16x16xf32, #tpu.memory_space<vmem>>, vector<16x16xf32>
    %cst_230 = arith.constant dense<0.000000e+00> : vector<2x16xf32>
    %771 = tpu.matmul %720, %770, %cst_230 {dimension_numbers = #tpu.dot_dimension_numbers<[1], [1], [0], [0], [0, 0, 1, 0], [], []>} : vector<2x16xf32>, vector<16x16xf32>, vector<2x16xf32> -> vector<2x16xf32>
    %c0_231 = arith.constant 0 : index
    %c0_232 = arith.constant 0 : index
    %772 = vector.load %arg4[%c0_231, %c0_232] : memref<1x16xf32, #tpu.memory_space<vmem>>, vector<1x16xf32>
    %773 = vector.broadcast %769 : vector<2x1xf32> to vector<2x16xf32>
    %774 = vector.broadcast %772 : vector<1x16xf32> to vector<2x16xf32>
    %775 = arith.mulf %773, %774 : vector<2x16xf32>
    %776 = arith.mulf %771, %775 : vector<2x16xf32>
    %777 = vector.broadcast %731 : vector<2x1xf32> to vector<2x16xf32>
    %778 = arith.mulf %777, %776 : vector<2x16xf32>
    %cst_233 = arith.constant dense<0xFF800000> : vector<2xf32>
    %779 = vector.multi_reduction <maximumf>, %778, %cst_233 [1] : vector<2x16xf32> to vector<2xf32>
    %780 = vector.shape_cast %779 : vector<2xf32> to vector<2x1xf32>
    %781 = vector.broadcast %780 : vector<2x1xf32> to vector<2x16xf32>
    %782 = arith.subf %778, %781 : vector<2x16xf32>
    %783 = math.exp %782 : vector<2x16xf32>
    %cst_234 = arith.constant dense<0.000000e+00> : vector<2xf32>
    %784 = vector.multi_reduction <add>, %783, %cst_234 [1] : vector<2x16xf32> to vector<2xf32>
    %785 = vector.shape_cast %784 : vector<2xf32> to vector<2x1xf32>
    %786 = vector.broadcast %785 : vector<2x1xf32> to vector<2x16xf32>
    %787 = arith.divf %783, %786 : vector<2x16xf32>
    %788 = vector.broadcast %737 : vector<2x1xf32> to vector<2x16xf32>
    %789 = arith.mulf %788, %787 : vector<2x16xf32>
    %cst_235 = arith.constant 1.000000e+00 : f32
    %790 = vector.broadcast %cst_235 : f32 to vector<2x1xf32>
    %791 = arith.subf %790, %737 : vector<2x1xf32>
    %792 = vector.broadcast %791 : vector<2x1xf32> to vector<2x16xf32>
    %793 = arith.mulf %792, %683 : vector<2x16xf32>
    %794 = arith.addf %789, %793 : vector<2x16xf32>
    %c0_236 = arith.constant 0 : index
    %c0_237 = arith.constant 0 : index
    %795 = vector.load %arg10[%c0_236, %c0_237] : memref<16x32xf32, #tpu.memory_space<vmem>>, vector<16x32xf32>
    %cst_238 = arith.constant dense<0.000000e+00> : vector<2x32xf32>
    %796 = tpu.matmul %794, %795, %cst_238 {dimension_numbers = #tpu.dot_dimension_numbers<[1], [0], [0], [1], [0, 0, 1, 1], [], []>} : vector<2x16xf32>, vector<16x32xf32>, vector<2x32xf32> -> vector<2x32xf32>
    %797 = vector.extract_strided_slice %747 {offsets = [0, 0], sizes = [2, 1], strides = [1, 1]} : vector<2x3xf32> to vector<2x1xf32>
    %798 = vector.extract_strided_slice %796 {offsets = [0, 0], sizes = [2, 16], strides = [1, 1]} : vector<2x32xf32> to vector<2x16xf32>
    %799 = vector.broadcast %797 : vector<2x1xf32> to vector<2x16xf32>
    %800 = arith.mulf %799, %798 : vector<2x16xf32>
    %801 = vector.extract_strided_slice %747 {offsets = [0, 1], sizes = [2, 1], strides = [1, 1]} : vector<2x3xf32> to vector<2x1xf32>
    %802 = vector.broadcast %801 : vector<2x1xf32> to vector<2x16xf32>
    %803 = arith.mulf %802, %794 : vector<2x16xf32>
    %804 = arith.addf %800, %803 : vector<2x16xf32>
    %805 = vector.extract_strided_slice %747 {offsets = [0, 2], sizes = [2, 1], strides = [1, 1]} : vector<2x3xf32> to vector<2x1xf32>
    %806 = vector.extract_strided_slice %796 {offsets = [0, 16], sizes = [2, 16], strides = [1, 1]} : vector<2x32xf32> to vector<2x16xf32>
    %807 = vector.broadcast %805 : vector<2x1xf32> to vector<2x16xf32>
    %808 = arith.mulf %807, %806 : vector<2x16xf32>
    %809 = arith.addf %804, %808 : vector<2x16xf32>
    %cst_239 = arith.constant 9.99999993E-9 : f32
    %810 = vector.broadcast %cst_239 : f32 to vector<2x16xf32>
    %811 = arith.addf %809, %810 : vector<2x16xf32>
    %812 = math.log %811 : vector<2x16xf32>
    %813 = vector.broadcast %760 : vector<2x1xf32> to vector<2x16xf32>
    %814 = arith.mulf %813, %812 : vector<2x16xf32>
    %815 = math.exp %814 : vector<2x16xf32>
    %cst_240 = arith.constant dense<0.000000e+00> : vector<2xf32>
    %816 = vector.multi_reduction <add>, %815, %cst_240 [1] : vector<2x16xf32> to vector<2xf32>
    %817 = vector.shape_cast %816 : vector<2xf32> to vector<2x1xf32>
    %818 = vector.broadcast %817 : vector<2x1xf32> to vector<2x16xf32>
    %819 = arith.divf %815, %818 : vector<2x16xf32>
    %c0_241 = arith.constant 0 : index
    %c0_242 = arith.constant 0 : index
    %820 = vector.load %arg3[%c0_241, %c0_242] : memref<16x152xf32, #tpu.memory_space<vmem>>, vector<16x152xf32>
    %cst_243 = arith.constant dense<0.000000e+00> : vector<2x152xf32>
    %821 = tpu.matmul %819, %820, %cst_243 {dimension_numbers = #tpu.dot_dimension_numbers<[1], [0], [0], [1], [0, 0, 1, 1], [], []>} : vector<2x16xf32>, vector<16x152xf32>, vector<2x152xf32> -> vector<2x152xf32>
    %822 = vector.extract_strided_slice %821 {offsets = [0, 0], sizes = [2, 128], strides = [1, 1]} : vector<2x152xf32> to vector<2x128xf32>
    %823 = vector.extract_strided_slice %821 {offsets = [0, 144], sizes = [2, 8], strides = [1, 1]} : vector<2x152xf32> to vector<2x8xf32>
    %824 = arith.addf %761, %823 : vector<2x8xf32>
    %c5 = arith.constant 5 : index
    %c0_244 = arith.constant 0 : index
    %c0_245 = arith.constant 0 : index
    %825 = vector.load %arg11[%c5, %c0_244, %c0_245] : memref<8x2x8xf32, #tpu.memory_space<vmem>>, vector<1x2x8xf32>
    %826 = vector.shape_cast %825 : vector<1x2x8xf32> to vector<2x8xf32>
    %827 = vector.shape_cast %824 : vector<2x8xf32> to vector<1x2x8xf32>
    tpu.vector_store %arg11[%c5, %c0_244, %c0_245], %827 {strides = array<i32>} : memref<8x2x8xf32, #tpu.memory_space<vmem>>, vector<1x2x8xf32>,
    %828 = vector.extract_strided_slice %7 {offsets = [12, 0], sizes = [2, 128], strides = [1, 1]} : vector<16x128xf32> to vector<2x128xf32>
    %829 = arith.addf %828, %822 : vector<2x128xf32>
    %830 = arith.addf %829, %718 : vector<2x128xf32>
    %c0_246 = arith.constant 0 : index
    %c0_247 = arith.constant 0 : index
    %831 = vector.load %arg7[%c0_246, %c0_247] : memref<1x128xf32, #tpu.memory_space<vmem>>, vector<1x128xf32>
    %832 = vector.broadcast %831 : vector<1x128xf32> to vector<2x128xf32>
    %833 = arith.addf %830, %832 : vector<2x128xf32>
    %834 = arith.negf %833 : vector<2x128xf32>
    %835 = math.exp %834 : vector<2x128xf32>
    %cst_248 = arith.constant 1.000000e+00 : f32
    %836 = vector.broadcast %cst_248 : f32 to vector<2x128xf32>
    %837 = arith.addf %836, %835 : vector<2x128xf32>
    %838 = arith.divf %836, %837 : vector<2x128xf32>
    %839 = math.tanh %833 : vector<2x128xf32>
    %840 = vector.extract_strided_slice %838 {offsets = [0, 0], sizes = [2, 32], strides = [1, 1]} : vector<2x128xf32> to vector<2x32xf32>
    %841 = vector.extract_strided_slice %838 {offsets = [0, 32], sizes = [2, 32], strides = [1, 1]} : vector<2x128xf32> to vector<2x32xf32>
    %842 = vector.extract_strided_slice %839 {offsets = [0, 64], sizes = [2, 32], strides = [1, 1]} : vector<2x128xf32> to vector<2x32xf32>
    %843 = vector.extract_strided_slice %838 {offsets = [0, 96], sizes = [2, 32], strides = [1, 1]} : vector<2x128xf32> to vector<2x32xf32>
    %844 = arith.mulf %841, %710 : vector<2x32xf32>
    %845 = arith.mulf %840, %842 : vector<2x32xf32>
    %846 = arith.addf %844, %845 : vector<2x32xf32>
    %847 = math.tanh %846 : vector<2x32xf32>
    %848 = arith.mulf %843, %847 : vector<2x32xf32>
    %c0_249 = arith.constant 0 : index
    %c0_250 = arith.constant 0 : index
    %849 = vector.load %arg8[%c0_249, %c0_250] : memref<32x158xf32, #tpu.memory_space<vmem>>, vector<32x158xf32>
    %cst_251 = arith.constant dense<0.000000e+00> : vector<2x158xf32>
    %850 = tpu.matmul %848, %849, %cst_251 {dimension_numbers = #tpu.dot_dimension_numbers<[1], [0], [0], [1], [0, 0, 1, 1], [], []>} : vector<2x32xf32>, vector<32x158xf32>, vector<2x158xf32> -> vector<2x158xf32>
    %c0_252 = arith.constant 0 : index
    %c0_253 = arith.constant 0 : index
    %851 = vector.load %arg9[%c0_252, %c0_253] : memref<1x158xf32, #tpu.memory_space<vmem>>, vector<1x158xf32>
    %852 = vector.broadcast %851 : vector<1x158xf32> to vector<2x158xf32>
    %853 = arith.addf %850, %852 : vector<2x158xf32>
    %854 = vector.extract_strided_slice %853 {offsets = [0, 0], sizes = [2, 128], strides = [1, 1]} : vector<2x158xf32> to vector<2x128xf32>
    %855 = vector.extract_strided_slice %853 {offsets = [0, 128], sizes = [2, 16], strides = [1, 1]} : vector<2x158xf32> to vector<2x16xf32>
    %856 = math.tanh %855 : vector<2x16xf32>
    %857 = vector.extract_strided_slice %853 {offsets = [0, 144], sizes = [2, 1], strides = [1, 1]} : vector<2x158xf32> to vector<2x1xf32>
    %858 = math.absf %857 : vector<2x1xf32>
    %cst_254 = arith.constant 0.000000e+00 : f32
    %859 = vector.broadcast %cst_254 : f32 to vector<2x1xf32>
    %860 = arith.subf %859, %858 : vector<2x1xf32>
    %861 = math.exp %860 : vector<2x1xf32>
    %cst_255 = arith.constant 1.000000e+00 : f32
    %862 = vector.broadcast %cst_255 : f32 to vector<2x1xf32>
    %863 = arith.addf %862, %861 : vector<2x1xf32>
    %864 = math.log %863 : vector<2x1xf32>
    %cst_256 = arith.constant 0.000000e+00 : f32
    %865 = vector.broadcast %cst_256 : f32 to vector<2x1xf32>
    %866 = arith.maximumf %857, %865 : vector<2x1xf32>
    %867 = arith.addf %864, %866 : vector<2x1xf32>
    %868 = vector.extract_strided_slice %853 {offsets = [0, 145], sizes = [2, 1], strides = [1, 1]} : vector<2x158xf32> to vector<2x1xf32>
    %869 = arith.negf %868 : vector<2x1xf32>
    %870 = math.exp %869 : vector<2x1xf32>
    %cst_257 = arith.constant 1.000000e+00 : f32
    %871 = vector.broadcast %cst_257 : f32 to vector<2x1xf32>
    %872 = arith.addf %871, %870 : vector<2x1xf32>
    %873 = arith.divf %871, %872 : vector<2x1xf32>
    %874 = vector.extract_strided_slice %853 {offsets = [0, 146], sizes = [2, 3], strides = [1, 1]} : vector<2x158xf32> to vector<2x3xf32>
    %cst_258 = arith.constant dense<0xFF800000> : vector<2xf32>
    %875 = vector.multi_reduction <maximumf>, %874, %cst_258 [1] : vector<2x3xf32> to vector<2xf32>
    %876 = vector.shape_cast %875 : vector<2xf32> to vector<2x1xf32>
    %877 = vector.broadcast %876 : vector<2x1xf32> to vector<2x3xf32>
    %878 = arith.subf %874, %877 : vector<2x3xf32>
    %879 = math.exp %878 : vector<2x3xf32>
    %cst_259 = arith.constant dense<0.000000e+00> : vector<2xf32>
    %880 = vector.multi_reduction <add>, %879, %cst_259 [1] : vector<2x3xf32> to vector<2xf32>
    %881 = vector.shape_cast %880 : vector<2xf32> to vector<2x1xf32>
    %882 = vector.broadcast %881 : vector<2x1xf32> to vector<2x3xf32>
    %883 = arith.divf %879, %882 : vector<2x3xf32>
    %884 = vector.extract_strided_slice %853 {offsets = [0, 149], sizes = [2, 1], strides = [1, 1]} : vector<2x158xf32> to vector<2x1xf32>
    %885 = math.absf %884 : vector<2x1xf32>
    %cst_260 = arith.constant 0.000000e+00 : f32
    %886 = vector.broadcast %cst_260 : f32 to vector<2x1xf32>
    %887 = arith.subf %886, %885 : vector<2x1xf32>
    %888 = math.exp %887 : vector<2x1xf32>
    %cst_261 = arith.constant 1.000000e+00 : f32
    %889 = vector.broadcast %cst_261 : f32 to vector<2x1xf32>
    %890 = arith.addf %889, %888 : vector<2x1xf32>
    %891 = math.log %890 : vector<2x1xf32>
    %cst_262 = arith.constant 0.000000e+00 : f32
    %892 = vector.broadcast %cst_262 : f32 to vector<2x1xf32>
    %893 = arith.maximumf %884, %892 : vector<2x1xf32>
    %894 = arith.addf %891, %893 : vector<2x1xf32>
    %cst_263 = arith.constant 1.000000e+00 : f32
    %895 = vector.broadcast %cst_263 : f32 to vector<2x1xf32>
    %896 = arith.addf %895, %894 : vector<2x1xf32>
    %897 = vector.extract_strided_slice %853 {offsets = [0, 150], sizes = [2, 8], strides = [1, 1]} : vector<2x158xf32> to vector<2x8xf32>
    %898 = arith.mulf %856, %856 : vector<2x16xf32>
    %cst_264 = arith.constant dense<0.000000e+00> : vector<2xf32>
    %899 = vector.multi_reduction <add>, %898, %cst_264 [1] : vector<2x16xf32> to vector<2xf32>
    %900 = vector.shape_cast %899 : vector<2xf32> to vector<2x1xf32>
    %901 = math.sqrt %900 : vector<2x1xf32>
    %cst_265 = arith.constant 9.99999993E-9 : f32
    %902 = vector.broadcast %cst_265 : f32 to vector<2x1xf32>
    %903 = arith.addf %901, %902 : vector<2x1xf32>
    %cst_266 = arith.constant 1.000000e+00 : f32
    %904 = vector.broadcast %cst_266 : f32 to vector<2x1xf32>
    %905 = arith.divf %904, %903 : vector<2x1xf32>
    %c0_267 = arith.constant 0 : index
    %c0_268 = arith.constant 0 : index
    %906 = vector.load %arg2[%c0_267, %c0_268] : memref<16x16xf32, #tpu.memory_space<vmem>>, vector<16x16xf32>
    %cst_269 = arith.constant dense<0.000000e+00> : vector<2x16xf32>
    %907 = tpu.matmul %856, %906, %cst_269 {dimension_numbers = #tpu.dot_dimension_numbers<[1], [1], [0], [0], [0, 0, 1, 0], [], []>} : vector<2x16xf32>, vector<16x16xf32>, vector<2x16xf32> -> vector<2x16xf32>
    %c0_270 = arith.constant 0 : index
    %c0_271 = arith.constant 0 : index
    %908 = vector.load %arg4[%c0_270, %c0_271] : memref<1x16xf32, #tpu.memory_space<vmem>>, vector<1x16xf32>
    %909 = vector.broadcast %905 : vector<2x1xf32> to vector<2x16xf32>
    %910 = vector.broadcast %908 : vector<1x16xf32> to vector<2x16xf32>
    %911 = arith.mulf %909, %910 : vector<2x16xf32>
    %912 = arith.mulf %907, %911 : vector<2x16xf32>
    %913 = vector.broadcast %867 : vector<2x1xf32> to vector<2x16xf32>
    %914 = arith.mulf %913, %912 : vector<2x16xf32>
    %cst_272 = arith.constant dense<0xFF800000> : vector<2xf32>
    %915 = vector.multi_reduction <maximumf>, %914, %cst_272 [1] : vector<2x16xf32> to vector<2xf32>
    %916 = vector.shape_cast %915 : vector<2xf32> to vector<2x1xf32>
    %917 = vector.broadcast %916 : vector<2x1xf32> to vector<2x16xf32>
    %918 = arith.subf %914, %917 : vector<2x16xf32>
    %919 = math.exp %918 : vector<2x16xf32>
    %cst_273 = arith.constant dense<0.000000e+00> : vector<2xf32>
    %920 = vector.multi_reduction <add>, %919, %cst_273 [1] : vector<2x16xf32> to vector<2xf32>
    %921 = vector.shape_cast %920 : vector<2xf32> to vector<2x1xf32>
    %922 = vector.broadcast %921 : vector<2x1xf32> to vector<2x16xf32>
    %923 = arith.divf %919, %922 : vector<2x16xf32>
    %924 = vector.broadcast %873 : vector<2x1xf32> to vector<2x16xf32>
    %925 = arith.mulf %924, %923 : vector<2x16xf32>
    %cst_274 = arith.constant 1.000000e+00 : f32
    %926 = vector.broadcast %cst_274 : f32 to vector<2x1xf32>
    %927 = arith.subf %926, %873 : vector<2x1xf32>
    %928 = vector.broadcast %927 : vector<2x1xf32> to vector<2x16xf32>
    %929 = arith.mulf %928, %819 : vector<2x16xf32>
    %930 = arith.addf %925, %929 : vector<2x16xf32>
    %c0_275 = arith.constant 0 : index
    %c0_276 = arith.constant 0 : index
    %931 = vector.load %arg10[%c0_275, %c0_276] : memref<16x32xf32, #tpu.memory_space<vmem>>, vector<16x32xf32>
    %cst_277 = arith.constant dense<0.000000e+00> : vector<2x32xf32>
    %932 = tpu.matmul %930, %931, %cst_277 {dimension_numbers = #tpu.dot_dimension_numbers<[1], [0], [0], [1], [0, 0, 1, 1], [], []>} : vector<2x16xf32>, vector<16x32xf32>, vector<2x32xf32> -> vector<2x32xf32>
    %933 = vector.extract_strided_slice %883 {offsets = [0, 0], sizes = [2, 1], strides = [1, 1]} : vector<2x3xf32> to vector<2x1xf32>
    %934 = vector.extract_strided_slice %932 {offsets = [0, 0], sizes = [2, 16], strides = [1, 1]} : vector<2x32xf32> to vector<2x16xf32>
    %935 = vector.broadcast %933 : vector<2x1xf32> to vector<2x16xf32>
    %936 = arith.mulf %935, %934 : vector<2x16xf32>
    %937 = vector.extract_strided_slice %883 {offsets = [0, 1], sizes = [2, 1], strides = [1, 1]} : vector<2x3xf32> to vector<2x1xf32>
    %938 = vector.broadcast %937 : vector<2x1xf32> to vector<2x16xf32>
    %939 = arith.mulf %938, %930 : vector<2x16xf32>
    %940 = arith.addf %936, %939 : vector<2x16xf32>
    %941 = vector.extract_strided_slice %883 {offsets = [0, 2], sizes = [2, 1], strides = [1, 1]} : vector<2x3xf32> to vector<2x1xf32>
    %942 = vector.extract_strided_slice %932 {offsets = [0, 16], sizes = [2, 16], strides = [1, 1]} : vector<2x32xf32> to vector<2x16xf32>
    %943 = vector.broadcast %941 : vector<2x1xf32> to vector<2x16xf32>
    %944 = arith.mulf %943, %942 : vector<2x16xf32>
    %945 = arith.addf %940, %944 : vector<2x16xf32>
    %cst_278 = arith.constant 9.99999993E-9 : f32
    %946 = vector.broadcast %cst_278 : f32 to vector<2x16xf32>
    %947 = arith.addf %945, %946 : vector<2x16xf32>
    %948 = math.log %947 : vector<2x16xf32>
    %949 = vector.broadcast %896 : vector<2x1xf32> to vector<2x16xf32>
    %950 = arith.mulf %949, %948 : vector<2x16xf32>
    %951 = math.exp %950 : vector<2x16xf32>
    %cst_279 = arith.constant dense<0.000000e+00> : vector<2xf32>
    %952 = vector.multi_reduction <add>, %951, %cst_279 [1] : vector<2x16xf32> to vector<2xf32>
    %953 = vector.shape_cast %952 : vector<2xf32> to vector<2x1xf32>
    %954 = vector.broadcast %953 : vector<2x1xf32> to vector<2x16xf32>
    %955 = arith.divf %951, %954 : vector<2x16xf32>
    %c0_280 = arith.constant 0 : index
    %c0_281 = arith.constant 0 : index
    %956 = vector.load %arg3[%c0_280, %c0_281] : memref<16x152xf32, #tpu.memory_space<vmem>>, vector<16x152xf32>
    %cst_282 = arith.constant dense<0.000000e+00> : vector<2x152xf32>
    %957 = tpu.matmul %955, %956, %cst_282 {dimension_numbers = #tpu.dot_dimension_numbers<[1], [0], [0], [1], [0, 0, 1, 1], [], []>} : vector<2x16xf32>, vector<16x152xf32>, vector<2x152xf32> -> vector<2x152xf32>
    %958 = vector.extract_strided_slice %957 {offsets = [0, 0], sizes = [2, 128], strides = [1, 1]} : vector<2x152xf32> to vector<2x128xf32>
    %959 = vector.extract_strided_slice %957 {offsets = [0, 144], sizes = [2, 8], strides = [1, 1]} : vector<2x152xf32> to vector<2x8xf32>
    %960 = arith.addf %897, %959 : vector<2x8xf32>
    %c6 = arith.constant 6 : index
    %c0_283 = arith.constant 0 : index
    %c0_284 = arith.constant 0 : index
    %961 = vector.load %arg11[%c6, %c0_283, %c0_284] : memref<8x2x8xf32, #tpu.memory_space<vmem>>, vector<1x2x8xf32>
    %962 = vector.shape_cast %961 : vector<1x2x8xf32> to vector<2x8xf32>
    %963 = vector.shape_cast %960 : vector<2x8xf32> to vector<1x2x8xf32>
    tpu.vector_store %arg11[%c6, %c0_283, %c0_284], %963 {strides = array<i32>} : memref<8x2x8xf32, #tpu.memory_space<vmem>>, vector<1x2x8xf32>,
    %964 = vector.extract_strided_slice %7 {offsets = [14, 0], sizes = [2, 128], strides = [1, 1]} : vector<16x128xf32> to vector<2x128xf32>
    %965 = arith.addf %964, %958 : vector<2x128xf32>
    %966 = arith.addf %965, %854 : vector<2x128xf32>
    %c0_285 = arith.constant 0 : index
    %c0_286 = arith.constant 0 : index
    %967 = vector.load %arg7[%c0_285, %c0_286] : memref<1x128xf32, #tpu.memory_space<vmem>>, vector<1x128xf32>
    %968 = vector.broadcast %967 : vector<1x128xf32> to vector<2x128xf32>
    %969 = arith.addf %966, %968 : vector<2x128xf32>
    %970 = arith.negf %969 : vector<2x128xf32>
    %971 = math.exp %970 : vector<2x128xf32>
    %cst_287 = arith.constant 1.000000e+00 : f32
    %972 = vector.broadcast %cst_287 : f32 to vector<2x128xf32>
    %973 = arith.addf %972, %971 : vector<2x128xf32>
    %974 = arith.divf %972, %973 : vector<2x128xf32>
    %975 = math.tanh %969 : vector<2x128xf32>
    %976 = vector.extract_strided_slice %974 {offsets = [0, 0], sizes = [2, 32], strides = [1, 1]} : vector<2x128xf32> to vector<2x32xf32>
    %977 = vector.extract_strided_slice %974 {offsets = [0, 32], sizes = [2, 32], strides = [1, 1]} : vector<2x128xf32> to vector<2x32xf32>
    %978 = vector.extract_strided_slice %975 {offsets = [0, 64], sizes = [2, 32], strides = [1, 1]} : vector<2x128xf32> to vector<2x32xf32>
    %979 = vector.extract_strided_slice %974 {offsets = [0, 96], sizes = [2, 32], strides = [1, 1]} : vector<2x128xf32> to vector<2x32xf32>
    %980 = arith.mulf %977, %846 : vector<2x32xf32>
    %981 = arith.mulf %976, %978 : vector<2x32xf32>
    %982 = arith.addf %980, %981 : vector<2x32xf32>
    %983 = math.tanh %982 : vector<2x32xf32>
    %984 = arith.mulf %979, %983 : vector<2x32xf32>
    %c0_288 = arith.constant 0 : index
    %c0_289 = arith.constant 0 : index
    %985 = vector.load %arg8[%c0_288, %c0_289] : memref<32x158xf32, #tpu.memory_space<vmem>>, vector<32x158xf32>
    %cst_290 = arith.constant dense<0.000000e+00> : vector<2x158xf32>
    %986 = tpu.matmul %984, %985, %cst_290 {dimension_numbers = #tpu.dot_dimension_numbers<[1], [0], [0], [1], [0, 0, 1, 1], [], []>} : vector<2x32xf32>, vector<32x158xf32>, vector<2x158xf32> -> vector<2x158xf32>
    %c0_291 = arith.constant 0 : index
    %c0_292 = arith.constant 0 : index
    %987 = vector.load %arg9[%c0_291, %c0_292] : memref<1x158xf32, #tpu.memory_space<vmem>>, vector<1x158xf32>
    %988 = vector.broadcast %987 : vector<1x158xf32> to vector<2x158xf32>
    %989 = arith.addf %986, %988 : vector<2x158xf32>
    %990 = vector.extract_strided_slice %989 {offsets = [0, 128], sizes = [2, 16], strides = [1, 1]} : vector<2x158xf32> to vector<2x16xf32>
    %991 = math.tanh %990 : vector<2x16xf32>
    %992 = vector.extract_strided_slice %989 {offsets = [0, 144], sizes = [2, 1], strides = [1, 1]} : vector<2x158xf32> to vector<2x1xf32>
    %993 = math.absf %992 : vector<2x1xf32>
    %cst_293 = arith.constant 0.000000e+00 : f32
    %994 = vector.broadcast %cst_293 : f32 to vector<2x1xf32>
    %995 = arith.subf %994, %993 : vector<2x1xf32>
    %996 = math.exp %995 : vector<2x1xf32>
    %cst_294 = arith.constant 1.000000e+00 : f32
    %997 = vector.broadcast %cst_294 : f32 to vector<2x1xf32>
    %998 = arith.addf %997, %996 : vector<2x1xf32>
    %999 = math.log %998 : vector<2x1xf32>
    %cst_295 = arith.constant 0.000000e+00 : f32
    %1000 = vector.broadcast %cst_295 : f32 to vector<2x1xf32>
    %1001 = arith.maximumf %992, %1000 : vector<2x1xf32>
    %1002 = arith.addf %999, %1001 : vector<2x1xf32>
    %1003 = vector.extract_strided_slice %989 {offsets = [0, 145], sizes = [2, 1], strides = [1, 1]} : vector<2x158xf32> to vector<2x1xf32>
    %1004 = arith.negf %1003 : vector<2x1xf32>
    %1005 = math.exp %1004 : vector<2x1xf32>
    %cst_296 = arith.constant 1.000000e+00 : f32
    %1006 = vector.broadcast %cst_296 : f32 to vector<2x1xf32>
    %1007 = arith.addf %1006, %1005 : vector<2x1xf32>
    %1008 = arith.divf %1006, %1007 : vector<2x1xf32>
    %1009 = vector.extract_strided_slice %989 {offsets = [0, 146], sizes = [2, 3], strides = [1, 1]} : vector<2x158xf32> to vector<2x3xf32>
    %cst_297 = arith.constant dense<0xFF800000> : vector<2xf32>
    %1010 = vector.multi_reduction <maximumf>, %1009, %cst_297 [1] : vector<2x3xf32> to vector<2xf32>
    %1011 = vector.shape_cast %1010 : vector<2xf32> to vector<2x1xf32>
    %1012 = vector.broadcast %1011 : vector<2x1xf32> to vector<2x3xf32>
    %1013 = arith.subf %1009, %1012 : vector<2x3xf32>
    %1014 = math.exp %1013 : vector<2x3xf32>
    %cst_298 = arith.constant dense<0.000000e+00> : vector<2xf32>
    %1015 = vector.multi_reduction <add>, %1014, %cst_298 [1] : vector<2x3xf32> to vector<2xf32>
    %1016 = vector.shape_cast %1015 : vector<2xf32> to vector<2x1xf32>
    %1017 = vector.broadcast %1016 : vector<2x1xf32> to vector<2x3xf32>
    %1018 = arith.divf %1014, %1017 : vector<2x3xf32>
    %1019 = vector.extract_strided_slice %989 {offsets = [0, 149], sizes = [2, 1], strides = [1, 1]} : vector<2x158xf32> to vector<2x1xf32>
    %1020 = math.absf %1019 : vector<2x1xf32>
    %cst_299 = arith.constant 0.000000e+00 : f32
    %1021 = vector.broadcast %cst_299 : f32 to vector<2x1xf32>
    %1022 = arith.subf %1021, %1020 : vector<2x1xf32>
    %1023 = math.exp %1022 : vector<2x1xf32>
    %cst_300 = arith.constant 1.000000e+00 : f32
    %1024 = vector.broadcast %cst_300 : f32 to vector<2x1xf32>
    %1025 = arith.addf %1024, %1023 : vector<2x1xf32>
    %1026 = math.log %1025 : vector<2x1xf32>
    %cst_301 = arith.constant 0.000000e+00 : f32
    %1027 = vector.broadcast %cst_301 : f32 to vector<2x1xf32>
    %1028 = arith.maximumf %1019, %1027 : vector<2x1xf32>
    %1029 = arith.addf %1026, %1028 : vector<2x1xf32>
    %cst_302 = arith.constant 1.000000e+00 : f32
    %1030 = vector.broadcast %cst_302 : f32 to vector<2x1xf32>
    %1031 = arith.addf %1030, %1029 : vector<2x1xf32>
    %1032 = vector.extract_strided_slice %989 {offsets = [0, 150], sizes = [2, 8], strides = [1, 1]} : vector<2x158xf32> to vector<2x8xf32>
    %1033 = arith.mulf %991, %991 : vector<2x16xf32>
    %cst_303 = arith.constant dense<0.000000e+00> : vector<2xf32>
    %1034 = vector.multi_reduction <add>, %1033, %cst_303 [1] : vector<2x16xf32> to vector<2xf32>
    %1035 = vector.shape_cast %1034 : vector<2xf32> to vector<2x1xf32>
    %1036 = math.sqrt %1035 : vector<2x1xf32>
    %cst_304 = arith.constant 9.99999993E-9 : f32
    %1037 = vector.broadcast %cst_304 : f32 to vector<2x1xf32>
    %1038 = arith.addf %1036, %1037 : vector<2x1xf32>
    %cst_305 = arith.constant 1.000000e+00 : f32
    %1039 = vector.broadcast %cst_305 : f32 to vector<2x1xf32>
    %1040 = arith.divf %1039, %1038 : vector<2x1xf32>
    %c0_306 = arith.constant 0 : index
    %c0_307 = arith.constant 0 : index
    %1041 = vector.load %arg2[%c0_306, %c0_307] : memref<16x16xf32, #tpu.memory_space<vmem>>, vector<16x16xf32>
    %cst_308 = arith.constant dense<0.000000e+00> : vector<2x16xf32>
    %1042 = tpu.matmul %991, %1041, %cst_308 {dimension_numbers = #tpu.dot_dimension_numbers<[1], [1], [0], [0], [0, 0, 1, 0], [], []>} : vector<2x16xf32>, vector<16x16xf32>, vector<2x16xf32> -> vector<2x16xf32>
    %c0_309 = arith.constant 0 : index
    %c0_310 = arith.constant 0 : index
    %1043 = vector.load %arg4[%c0_309, %c0_310] : memref<1x16xf32, #tpu.memory_space<vmem>>, vector<1x16xf32>
    %1044 = vector.broadcast %1040 : vector<2x1xf32> to vector<2x16xf32>
    %1045 = vector.broadcast %1043 : vector<1x16xf32> to vector<2x16xf32>
    %1046 = arith.mulf %1044, %1045 : vector<2x16xf32>
    %1047 = arith.mulf %1042, %1046 : vector<2x16xf32>
    %1048 = vector.broadcast %1002 : vector<2x1xf32> to vector<2x16xf32>
    %1049 = arith.mulf %1048, %1047 : vector<2x16xf32>
    %cst_311 = arith.constant dense<0xFF800000> : vector<2xf32>
    %1050 = vector.multi_reduction <maximumf>, %1049, %cst_311 [1] : vector<2x16xf32> to vector<2xf32>
    %1051 = vector.shape_cast %1050 : vector<2xf32> to vector<2x1xf32>
    %1052 = vector.broadcast %1051 : vector<2x1xf32> to vector<2x16xf32>
    %1053 = arith.subf %1049, %1052 : vector<2x16xf32>
    %1054 = math.exp %1053 : vector<2x16xf32>
    %cst_312 = arith.constant dense<0.000000e+00> : vector<2xf32>
    %1055 = vector.multi_reduction <add>, %1054, %cst_312 [1] : vector<2x16xf32> to vector<2xf32>
    %1056 = vector.shape_cast %1055 : vector<2xf32> to vector<2x1xf32>
    %1057 = vector.broadcast %1056 : vector<2x1xf32> to vector<2x16xf32>
    %1058 = arith.divf %1054, %1057 : vector<2x16xf32>
    %1059 = vector.broadcast %1008 : vector<2x1xf32> to vector<2x16xf32>
    %1060 = arith.mulf %1059, %1058 : vector<2x16xf32>
    %cst_313 = arith.constant 1.000000e+00 : f32
    %1061 = vector.broadcast %cst_313 : f32 to vector<2x1xf32>
    %1062 = arith.subf %1061, %1008 : vector<2x1xf32>
    %1063 = vector.broadcast %1062 : vector<2x1xf32> to vector<2x16xf32>
    %1064 = arith.mulf %1063, %955 : vector<2x16xf32>
    %1065 = arith.addf %1060, %1064 : vector<2x16xf32>
    %c0_314 = arith.constant 0 : index
    %c0_315 = arith.constant 0 : index
    %1066 = vector.load %arg10[%c0_314, %c0_315] : memref<16x32xf32, #tpu.memory_space<vmem>>, vector<16x32xf32>
    %cst_316 = arith.constant dense<0.000000e+00> : vector<2x32xf32>
    %1067 = tpu.matmul %1065, %1066, %cst_316 {dimension_numbers = #tpu.dot_dimension_numbers<[1], [0], [0], [1], [0, 0, 1, 1], [], []>} : vector<2x16xf32>, vector<16x32xf32>, vector<2x32xf32> -> vector<2x32xf32>
    %1068 = vector.extract_strided_slice %1018 {offsets = [0, 0], sizes = [2, 1], strides = [1, 1]} : vector<2x3xf32> to vector<2x1xf32>
    %1069 = vector.extract_strided_slice %1067 {offsets = [0, 0], sizes = [2, 16], strides = [1, 1]} : vector<2x32xf32> to vector<2x16xf32>
    %1070 = vector.broadcast %1068 : vector<2x1xf32> to vector<2x16xf32>
    %1071 = arith.mulf %1070, %1069 : vector<2x16xf32>
    %1072 = vector.extract_strided_slice %1018 {offsets = [0, 1], sizes = [2, 1], strides = [1, 1]} : vector<2x3xf32> to vector<2x1xf32>
    %1073 = vector.broadcast %1072 : vector<2x1xf32> to vector<2x16xf32>
    %1074 = arith.mulf %1073, %1065 : vector<2x16xf32>
    %1075 = arith.addf %1071, %1074 : vector<2x16xf32>
    %1076 = vector.extract_strided_slice %1018 {offsets = [0, 2], sizes = [2, 1], strides = [1, 1]} : vector<2x3xf32> to vector<2x1xf32>
    %1077 = vector.extract_strided_slice %1067 {offsets = [0, 16], sizes = [2, 16], strides = [1, 1]} : vector<2x32xf32> to vector<2x16xf32>
    %1078 = vector.broadcast %1076 : vector<2x1xf32> to vector<2x16xf32>
    %1079 = arith.mulf %1078, %1077 : vector<2x16xf32>
    %1080 = arith.addf %1075, %1079 : vector<2x16xf32>
    %cst_317 = arith.constant 9.99999993E-9 : f32
    %1081 = vector.broadcast %cst_317 : f32 to vector<2x16xf32>
    %1082 = arith.addf %1080, %1081 : vector<2x16xf32>
    %1083 = math.log %1082 : vector<2x16xf32>
    %1084 = vector.broadcast %1031 : vector<2x1xf32> to vector<2x16xf32>
    %1085 = arith.mulf %1084, %1083 : vector<2x16xf32>
    %1086 = math.exp %1085 : vector<2x16xf32>
    %cst_318 = arith.constant dense<0.000000e+00> : vector<2xf32>
    %1087 = vector.multi_reduction <add>, %1086, %cst_318 [1] : vector<2x16xf32> to vector<2xf32>
    %1088 = vector.shape_cast %1087 : vector<2xf32> to vector<2x1xf32>
    %1089 = vector.broadcast %1088 : vector<2x1xf32> to vector<2x16xf32>
    %1090 = arith.divf %1086, %1089 : vector<2x16xf32>
    %c0_319 = arith.constant 0 : index
    %c0_320 = arith.constant 0 : index
    %1091 = vector.load %arg3[%c0_319, %c0_320] : memref<16x152xf32, #tpu.memory_space<vmem>>, vector<16x152xf32>
    %cst_321 = arith.constant dense<0.000000e+00> : vector<2x152xf32>
    %1092 = tpu.matmul %1090, %1091, %cst_321 {dimension_numbers = #tpu.dot_dimension_numbers<[1], [0], [0], [1], [0, 0, 1, 1], [], []>} : vector<2x16xf32>, vector<16x152xf32>, vector<2x152xf32> -> vector<2x152xf32>
    %1093 = vector.extract_strided_slice %1092 {offsets = [0, 128], sizes = [2, 16], strides = [1, 1]} : vector<2x152xf32> to vector<2x16xf32>
    %1094 = vector.extract_strided_slice %1092 {offsets = [0, 144], sizes = [2, 8], strides = [1, 1]} : vector<2x152xf32> to vector<2x8xf32>
    %1095 = arith.addf %1032, %1094 : vector<2x8xf32>
    %c7 = arith.constant 7 : index
    %c0_322 = arith.constant 0 : index
    %c0_323 = arith.constant 0 : index
    %1096 = vector.load %arg11[%c7, %c0_322, %c0_323] : memref<8x2x8xf32, #tpu.memory_space<vmem>>, vector<1x2x8xf32>
    %1097 = vector.shape_cast %1096 : vector<1x2x8xf32> to vector<2x8xf32>
    %1098 = vector.shape_cast %1095 : vector<2x8xf32> to vector<1x2x8xf32>
    tpu.vector_store %arg11[%c7, %c0_322, %c0_323], %1098 {strides = array<i32>} : memref<8x2x8xf32, #tpu.memory_space<vmem>>, vector<1x2x8xf32>,
    %c0_324 = arith.constant 0 : index
    %c0_325 = arith.constant 0 : index
    %1099 = vector.load %arg12[%c0_324, %c0_325] : memref<2x96xf32, #tpu.memory_space<vmem>>, vector<2x16xf32>
    tpu.vector_store %arg12[%c0_324, %c0_325], %1093 {strides = array<i32>} : memref<2x96xf32, #tpu.memory_space<vmem>>, vector<2x16xf32>,
    %c0_326 = arith.constant 0 : index
    %c16 = arith.constant 16 : index
    %1100 = vector.load %arg12[%c0_326, %c16] : memref<2x96xf32, #tpu.memory_space<vmem>>, vector<2x32xf32>
    tpu.vector_store %arg12[%c0_326, %c16], %984 {strides = array<i32>} : memref<2x96xf32, #tpu.memory_space<vmem>>, vector<2x32xf32>,
    %c0_327 = arith.constant 0 : index
    %c48 = arith.constant 48 : index
    %1101 = vector.load %arg12[%c0_327, %c48] : memref<2x96xf32, #tpu.memory_space<vmem>>, vector<2x32xf32>
    tpu.vector_store %arg12[%c0_327, %c48], %982 {strides = array<i32>} : memref<2x96xf32, #tpu.memory_space<vmem>>, vector<2x32xf32>,
    %c0_328 = arith.constant 0 : index
    %c80 = arith.constant 80 : index
    %1102 = vector.load %arg12[%c0_328, %c80] : memref<2x96xf32, #tpu.memory_space<vmem>>, vector<2x16xf32>
    tpu.vector_store %arg12[%c0_328, %c80], %1090 {strides = array<i32>} : memref<2x96xf32, #tpu.memory_space<vmem>>, vector<2x16xf32>,
    return
  }
}

</mosaic_0001>

<bundles_post_ra>
// kernel: tpu_custom_call.1
= control target key start
LH: loop header
LB: loop body
LE: loop exit
PB: predicated region body
PF: predicated region fallthrough
CT: control target
= control target key end

     0   :  { %18 = vsyncpa [#allocation3], 0  ;;  %s5062_s0 = inlined_call_operand.vmem [shape: f32[16,8], index: 0, kind: input, shape index: {}]   ;;  %s5063_s1 = inlined_call_operand.hbm [shape: f32[2,96], index: 1, kind: input, shape index: {}]   ;;  %s5064_s2 = inlined_call_operand.vmem [shape: f32[16,16], index: 2, kind: input, shape index: {}]   ;;  %s5065_s3 = inlined_call_operand.hbm [shape: f32[16,152], index: 3, kind: input, shape index: {}]   ;;  %s5066_s4 = inlined_call_operand.hbm [shape: f32[1,16], index: 4, kind: input, shape index: {}]   ;;  %s5067_s5 = inlined_call_operand.hbm [shape: f32[8,128], index: 5, kind: input, shape index: {}]   ;;  %s5068_s6 = inlined_call_operand.hbm [shape: f32[16,128], index: 6, kind: input, shape index: {}]   ;;  %s5069_s7 = inlined_call_operand.hbm [shape: f32[1,128], index: 7, kind: input, shape index: {}]   ;;  %s5070_s8 = inlined_call_operand.hbm [shape: f32[32,158], index: 8, kind: input, shape index: {}]   ;;  %s5071_s9 = inlined_call_operand.hbm [shape: f32[1,158], index: 9, kind: input, shape index: {}]   ;;  %s5072_s10 = inlined_call_operand.vmem [shape: f32[16,32], index: 10, kind: input, shape index: {}]   ;;  %s5073_s11 = inlined_call_operand.hbm [shape: f32[8,2,8], index: 11, kind: output, shape index: {0}]   ;;  %s5074_s12 = inlined_call_operand.hbm [shape: f32[2,96], index: 12, kind: output, shape index: {1}]  }
   0x1   :  { %19 = vsyncpa [#allocation6], 0 }
   0x2   :  { %20 = vsyncpa [#allocation9], 0 }
   0x3   :  { %21 = vsyncpa [#allocation12], 0 }
   0x4   :  { %22 = vsyncpa [#allocation15], 0 }
   0x5   :  { %23 = vsyncpa [#allocation4], 0  ;;  %s44_s23 = sshll.u32 %s5065_s3, 4  ;;  %s45_s23 = int_to_ptr.hbm [resolvable:$true] %s44_s23 }
   0x6   :  { %24 = vsyncpa [#allocation18], 0  ;;  %s4312_s24 = smov [#allocation5]   ;;  %s69_s28 = sshll.u32 %s5067_s5, 4  ;;  %s70_s28 = int_to_ptr.hbm [resolvable:$true] %s69_s28 }
   0x7   :  { %s46_s25 = sshll.u32 %s4312_s24, 4  ;;  %s4313_s29 = smov 256   ;;  %s47_s25 = int_to_ptr.vmem [resolvable:$true] %s46_s25 }
   0x8   :  { %s4314_s30 = smov 16   ;;  %s4315_s13 = smov [#allocation8]  }
   0x9   :  { %52 = dma.hbm_to_vmem [thread:$0]  %s45_s23, 512, %s47_s25, [#allocation6], %s4313_s29, %s4313_s29, %s4314_s30  }
   0xa   :  { %s71_s14 = sshll.u32 %s4315_s13, 4  ;;  %s93_s16 = sshll.u32 %s5069_s7, 4  ;;  %s72_s14 = int_to_ptr.vmem [resolvable:$true] %s71_s14  ;;  %s94_s16 = int_to_ptr.hbm [resolvable:$true] %s93_s16 }
   0xb   :  { %74 = dma.hbm_to_vmem [thread:$0]  %s70_s28, 128, %s72_s14, [#allocation9]  }
   0xc   :  { %s32_s5 = sshll.u32 %s5063_s1, 4  ;;  %s4316_s19 = smov [#allocation11]   ;;  %s33_s5 = int_to_ptr.hbm [resolvable:$true] %s32_s5 }
   0xd   :  { %s95_s20 = sshll.u32 %s4316_s19, 4  ;;  %s4317_s21 = smov [#allocation2]   ;;  %s96_s20 = int_to_ptr.vmem [resolvable:$true] %s95_s20 }
   0xe   :  { %98 = dma.hbm_to_vmem [thread:$0]  %s94_s16, 16, %s96_s20, [#allocation12]  }
   0xf   :  { %s34_s22 = sshll.u32 %s4317_s21, 4  ;;  %s58_s25 = sshll.u32 %s5066_s4, 4  ;;  %s35_s22 = int_to_ptr.vmem [resolvable:$true] %s34_s22  ;;  %s59_s25 = int_to_ptr.hbm [resolvable:$true] %s58_s25 }
  0x10   :  { %37 = dma.hbm_to_vmem [thread:$0]  %s33_s5, 32, %s35_s22, [#allocation3]  }
  0x11   :  { %s79_s27 = sshll.u32 %s5068_s6, 4  ;;  %s4318_s28 = smov [#allocation7]   ;;  %s80_s27 = int_to_ptr.hbm [resolvable:$true] %s79_s27 }
  0x12   :  { %s60_s1 = sshll.u32 %s4318_s28, 4  ;;  %s4319_s13 = smov [#allocation10]   ;;  %s61_s1 = int_to_ptr.vmem [resolvable:$true] %s60_s1 }
  0x13   :  { %63 = dma.hbm_to_vmem [thread:$0]  %s59_s25, 16, %s61_s1, [#allocation6]  }
  0x14   :  { %s81_s14 = sshll.u32 %s4319_s13, 4  ;;  %s4320_s15 = smov 128   ;;  %s82_s14 = int_to_ptr.vmem [resolvable:$true] %s81_s14 }
  0x15   :  { %s4321_s3 = smov 8   ;;  %s103_s17 = sshll.u32 %s5070_s8, 4  ;;  %s104_s17 = int_to_ptr.hbm [resolvable:$true] %s103_s17 }
  0x16   :  { %87 = dma.hbm_to_vmem [thread:$0]  %s80_s27, 256, %s82_s14, [#allocation9], %s4320_s15, %s4320_s15, %s4321_s3  }
  0x17   :  { %s4322_s18 = smov [#allocation13]   ;;  %s117_s20 = sshll.u32 %s5071_s9, 4  ;;  %s118_s20 = int_to_ptr.hbm [resolvable:$true] %s117_s20 }
  0x18   :  { %s105_s5 = sshll.u32 %s4322_s18, 4  ;;  %s4323_s21 = smov [#allocation14]   ;;  %s106_s5 = int_to_ptr.vmem [resolvable:$true] %s105_s5 }
  0x19   :  { %111 = dma.hbm_to_vmem [thread:$0]  %s104_s17, 1024, %s106_s5, [#allocation12], %s4313_s29, %s4313_s29, %s4314_s30  }
  0x1a   :  { %s119_s22 = sshll.u32 %s4323_s21, 4  ;;  %s120_s22 = int_to_ptr.vmem [resolvable:$true] %s119_s22 }
  0x1b   :  { %122 = dma.hbm_to_vmem [thread:$0]  %s118_s20, 32, %s120_s22, [#allocation15]  }
  0x1c   :  { %4298 = dma.done.wait [#allocation3], 32  }
  0x1d   :  { %4299 = vsyncadd [#allocation3], 4294967264 }
  0x1e   :  { %4300 = dma.done.wait [#allocation6], 528  }
  0x1f   :  { %4301 = vsyncadd [#allocation6], 4294966768 }
  0x20   :  { %4302 = dma.done.wait [#allocation9], 384  }
  0x21   :  { %4303 = vsyncadd [#allocation9], 4294966912 }
  0x22   :  { %4304 = dma.done.wait [#allocation12], 1040  }
  0x23   :  { %4305 = vsyncadd [#allocation12], 4294966256 }
  0x24   :  { %4306 = dma.done.wait [#allocation15], 32  }
  0x25   :  { %4307 = vsyncadd [#allocation15], 4294967264  ;;  %v4436_v0 = vld [vmem:[#allocation2] sm:$0x3]  ;;  %v4438_v1 = vld [vmem:[#allocation13 + $0x30] sm:$0xff]  ;;  %s4324_s8 = smov 112  }
  0x26   :  { %v4440_v2 = vld [vmem:[#allocation13 + $0x20] sm:$0xff]  ;;  %221 = vrot.lane.b32.xlu0 %v4436_v0, %s4324_s8  ;;  %238 = vmatpush.msra.mxu2 %v4438_v1  ;;  %v4445_v3 = vld [vmem:[#allocation13 + $0x10] sm:$0xff]  ;;  %vm161_vm0 = vcmask 64512   ;;  %vm193_vm1 = vcmask 130048   ;;  %vm223_vm2 = vcmask 261120   ;;  %s4325_s23 = smov 64  }
  0x27   :  { %v4447_v4 = vld [vmem:[#allocation13] sm:$0xff]  ;;  %322 = vmatpush.msra.mxu3 %v4438_v1  ;;  %v192_v5 = vld [vmem:[#allocation10 + $0x8] sm:$0xff]  ;;  %v191_v7 = vld [vmem:[#allocation10] sm:$0xff]  ;;  %s4326_s24 = smov 32   ;;  %v4327_v46 = vmov 16   ;;  %v4328_v49 = vmov 17  }
  0x28   :  { %239 = vmatpush.msra.mxu2 %v4440_v2  ;;  %v160_v6 = vld [vmem:[#allocation8] sm:$0xff]  ;;  %211 = vmatpush.msra.mxu1 %v192_v5  ;;  %v3754_v13 = vld [vmem:[#allocation11] ss:$0 sm:$0xff]  ;;  %v4506_v47 = vld [vmem:[#allocation14] sm:$0x3]  ;;  %vm411_vm7 = vcmask 123904  }
  0x29   :  { %323 = vmatpush.msra.mxu3 %v4440_v2  ;;  %183 = vmatpush.msra.mxu0 %v160_v6  ;;  %v158_v8 = vld [vmem:[%s5062_s0] sm:$0xff]  ;;  %v4472_v37 = vld [vmem:[#allocation13 + $0x38] sm:$0xff]  ;;  %v4490_v44 = vld [vmem:[%s5064_s2 + $0x8] sm:$0xff]  ;;  %v302_v48 = vperm.slane %v4506_v47, 1  ;;  %vm379_vm8 = vcmask 165008   ;;  %s4329_s28 = smov 110  }
  0x2a   :  { %240 = vmatpush.msra.mxu2 %v4445_v3  ;;  %3589 = vmatmul.msk.f32.vlgmr.msra.gmra.mxu0 %vm161_vm0, %v158_v8  ;;  %v4474_v38 = vld [vmem:[#allocation13 + $0x28] sm:$0xff]  ;;  %v4477_v39 = vld [vmem:[#allocation13 + $0x18] sm:$0xff]  ;;  %s4330_s1 = smov 48   ;;  %s3570_s17 = sshll.u32 %s5074_s12, 4  ;;  %s3571_s17 = int_to_ptr.hbm [resolvable:$true] %s3570_s17 }
  0x2b   :  { %324 = vmatpush.msra.mxu3 %v4445_v3  ;;  %212 = vmatpush.msra.mxu1 %v191_v7  ;;  %v4480_v40 = vld [vmem:[#allocation13 + $0x8] sm:$0xff]  ;;  %s4339_s18 = smov [#allocation16]   ;;  %s3556_s20 = sshll.u32 %s5073_s11, 4  ;;  %s3557_s20 = int_to_ptr.hbm [resolvable:$true] %s3556_s20 }
  0x2c   :  { %241 = vmatpush.msra.mxu2 %v4447_v4  ;;  %3591 = vmatmul.msk.f32.vlgmr.msra.gmra.mxu1 %vm193_vm1, %v4436_v0  ;;  %v4497_v45 = vld [vmem:[%s5064_s2] sm:$0xff]  ;;  %s3554_s5 = sshll.u32 %s4339_s18, 4  ;;  %s4340_s21 = smov 2   ;;  %s3555_s5 = int_to_ptr.vmem [resolvable:$true] %s3554_s5 }
  0x2d   :  { %325 = vmatpush.msra.mxu3 %v4447_v4  ;;  %342 = vmatpush.msrb.mxu1 %v4472_v37 }
  0x2e   :  { %3597 = vmatpush.xpose.msk.msrb.mxu2 %vm193_vm1, %v4490_v44  ;;  %3700 = vset.pattern.permute.xlu0 %v4327_v46 }
  0x2f   :  { %343 = vmatpush.msrb.mxu1 %v4474_v38  ;;  %3702 = vset.pattern.permute.xlu2 %v4328_v49 }
  0x30   :  { %3709 = vset.pattern.permute.xlu1 %v4328_v49 }
  0x31   :  { %344 = vmatpush.msrb.mxu1 %v4477_v39 }
  0x32   :  { %3598 = vmatpush.xpose.msk.msrb.mxu2 %vm193_vm1, %v4497_v45 }
  0x33   :  { %345 = vmatpush.msrb.mxu1 %v4480_v40 }
  0x98   :  { %v222_v9 = vpop.permute.xlu0 %221 }
  0x99   :  { %3592 = vmatmul.msk.f32.vlgmr.msra.gmra.mxu2 %vm223_vm2, %v222_v9 }
  0x9a   :  { %747 = vmatpush.msra.mxu2 %v4438_v1 }
  0x9c   :  { %748 = vmatpush.msra.mxu2 %v4440_v2 }
  0x9e   :  { %749 = vmatpush.msra.mxu2 %v4445_v3 }
  0xa0   :  { %750 = vmatpush.msra.mxu2 %v4447_v4 }
  0xa7   :  { %v4463_v10 = vpop.f32.mrf.mxu0 }
  0xa9   :  { %v214_v11 = vpop.f32.mrf.mxu1 }
  0xaa   :  { %v246_v12 = vadd.f32 %v214_v11, %v4463_v10 }
 0x11c   :  { %v243_v14 = vpop.f32.mrf.mxu2 }
 0x11d   :  { %v247_v15 = vadd.f32 %v246_v12, %v243_v14 }
 0x11f   :  { %v252_v16 = vadd.f32 %v3754_v13, %v247_v15 }
 0x121   :  { %3770 = vtanh.f32 %v252_v16  ;;  %v3593_v18 = vmul.f32 -1.442695, %v252_v16 }
 0x123   :  { %3772 = vpow2.f32 %v3593_v18 }
 0x127   :  { %v3771_v17 = vpop.eup %3770 }
 0x128   :  { %276 = vrot.lane.b32.xlu0 %v3771_v17, %s4325_s23 }
 0x129   :  { %v3773_v19 = vpop.eup %3772 }
 0x12a   :  { %v256_v20 = vadd.f32 1.0, %v3773_v19 }
 0x12c   :  { %3774 = vrcp.f32 %v256_v20  ;;  %v268_v26 = vand.u32 2147483648, %v256_v20  ;;  %vm262_vm4 = vweird.f32 %v256_v20  ;;  %v266_v27 = vand.u32 2147483647, %v256_v20 }
 0x12e   :  { %v269_v29 = vor.u32 1.1754944e-38, %v268_v26  ;;  %vm267_vm6 = vcmp.eq.f32.partialorder %v266_v27, 8.507059e+37 }
 0x132   :  { %v3775_v21 = vpop.eup %3774 }
 0x133   :  { %v258_v22 = vmul.f32 %v3775_v21, %v256_v20  ;;  %vm263_vm3 = vweird.f32 %v3775_v21 }
 0x134   :  { %vm264_vm5 = vmor %vm262_vm4, %vm263_vm3 }
 0x135   :  { %v259_v23 = vsub.f32 1.0, %v258_v22 }
 0x137   :  { %v260_v24 = vmul.f32 %v3775_v21, %v259_v23 }
 0x139   :  { %v261_v25 = vadd.f32 %v3775_v21, %v260_v24 }
 0x13b   :  { %v265_v28 = vsel %vm264_vm5, %v3775_v21, %v261_v25 }
 0x13c   :  { %v270_v31 = vsel %vm267_vm6, %v269_v29, %v265_v28  ;;  %vm390_vm6 = vcmask 17408  }
 0x13d   :  { %v274_v33 = vmul.f32 %v270_v31, %v222_v9 }
 0x19a   :  { %v277_v30 = vpop.permute.xlu0 %276 }
 0x19b   :  { %v279_v32 = vmul.f32 %v277_v30, %v270_v31 }
 0x19d   :  { %281 = vrot.lane.b32.xlu1 %v279_v32, %s4326_s24 }
 0x20f   :  { %v282_v34 = vpop.permute.xlu1 %281 }
 0x210   :  { %v4468_v35 = vadd.f32 %v282_v34, %v274_v33 }
 0x212   :  { %3776 = vtanh.f32 %v4468_v35 }
 0x218   :  { %v3777_v36 = vpop.eup %3776 }
 0x219   :  { %287 = vrot.lane.b32.xlu1 %v3777_v36, %s4325_s23 }
 0x28b   :  { %v288_v41 = vpop.permute.xlu1 %287 }
 0x28c   :  { %v290_v42 = vmul.f32 %v288_v41, %v270_v31 }
 0x28e   :  { %306 = vrot.lane.b32.xlu2 %v290_v42, %s4326_s24 }
 0x2e8   :  { %v307_v43 = vpop.permute.xlu2 %306 }
 0x2e9   :  { %3594 = vmatmul.msk.f32.vlgmr.msra.gmra.mxu3 %vm223_vm2, %v307_v43  ;;  %3595 = vmatmul.msk.f32.vlgmr.msrb.gmra.mxu1 %vm223_vm2, %v307_v43 }
 0x366   :  { %v347_v50 = vpop.f32.mrf.mxu1 }
 0x367   :  { %v4511_v51 = vadd.f32 %v347_v50, %v302_v48  ;;  %v3755_v50 = vld [vmem:[#allocation7] ss:$0 sm:$0xff] }
 0x369   :  { %3778 = vtanh.f32 %v4511_v51  ;;  %v351_v52 = vand.u32 2147483647, %v4511_v51  ;;  %v3596_v53 = vmul.f32 -1.442695, %v4511_v51  ;;  %v380_v63 = vsel %vm379_vm8, %v4511_v51, -inf }
 0x36a   :  { %v358_v6 = vmax.f32 %v4511_v51, 0.0 }
 0x36b   :  { %v352_v54 = vsub.f32 0.0, %v351_v52  ;;  %3780 = vpow2.f32 %v3596_v53 }
 0x36d   :  { %v353_v55 = vmul.f32 1.442695, %v352_v54 }
 0x36f   :  { %v3779_v56 = vpop.eup %3778  ;;  %3782 = vpow2.f32 %v353_v55 }
 0x370   :  { %3599 = vmatmul.msk.f32.vlgmr.msrb.gmra.mxu2 %vm193_vm1, %v3779_v56  ;;  %v410_v57 = vmul.f32 %v3779_v56, %v3779_v56 }
 0x371   :  { %v3781_v58 = vpop.eup %3780 }
 0x372   :  { %v412_v59 = vsel %vm411_vm7, %v410_v57, 0.0  ;;  %v363_v60 = vadd.f32 1.0, %v3781_v58 }
 0x373   :  { %413 = vadd.xlane.f32.xlu2 %v412_v59 }
 0x374   :  { %3784 = vrcp.f32 %v363_v60  ;;  %v375_v9 = vand.u32 2147483648, %v363_v60  ;;  %vm369_vm10 = vweird.f32 %v363_v60  ;;  %v373_v12 = vand.u32 2147483647, %v363_v60 }
 0x375   :  { %v3783_v61 = vpop.eup %3782 }
 0x376   :  { %v355_v62 = vadd.f32 1.0, %v3783_v61  ;;  %v376_v14 = vor.u32 1.1754944e-38, %v375_v9  ;;  %vm374_vm12 = vcmp.eq.f32.partialorder %v373_v12, 8.507059e+37  ;;  %v4331_v9 = vmov 18  }
 0x378   :  { %3786 = vlog2.f32 %v355_v62 }
 0x37a   :  { %v3785_v1 = vpop.eup %3784 }
 0x37b   :  { %381 = vmax.xlane.f32.xlu2 %v380_v63  ;;  %v365_v2 = vmul.f32 %v3785_v1, %v363_v60  ;;  %vm370_vm9 = vweird.f32 %v3785_v1 }
 0x37c   :  { %vm371_vm11 = vmor %vm369_vm10, %vm370_vm9 }
 0x37d   :  { %v366_v4 = vsub.f32 1.0, %v365_v2 }
 0x37e   :  { %v3787_v3 = vpop.eup %3786 }
 0x37f   :  { %v357_v5 = vmul.f32 0.6931472, %v3787_v3  ;;  %v367_v7 = vmul.f32 %v3785_v1, %v366_v4 }
 0x381   :  { %v4521_v8 = vadd.f32 %v358_v6, %v357_v5  ;;  %v368_v11 = vadd.f32 %v3785_v1, %v367_v7 }
 0x383   :  { %482 = vperm.xlu0 %3700, %v4521_v8   ;;  %v372_v13 = vsel %vm371_vm11, %v3785_v1, %v368_v11 }
 0x384   :  { %v377_v15 = vsel %vm374_vm12, %v376_v14, %v372_v13 }
 0x385   :  { %v516_v16 = vsub.f32 1.0, %v377_v15 }
 0x38b   :  { %3701 = vset.pattern.permute.xlu0 %v4328_v49 }
 0x38c   :  { %519 = vperm.xlu0 %3701, %v516_v16  }
 0x393   :  { %512 = vperm.xlu2 %3702, %v377_v15  }
 0x394   :  { %3704 = vset.pattern.permute.xlu0 %v4331_v9 }
 0x3e6   :  { %v414_v17 = vpop.xlane.xlu2 %413 }
 0x3e7   :  { %3788 = vrsqrt.f32 %v414_v17  ;;  %vm422_vm13 = vcmp.eq.f32.partialorder %v414_v17, inf  ;;  %v425_v29 = vand.u32 2147483648, %v414_v17  ;;  %vm424_vm14 = vcmp.eq.f32.partialorder %v414_v17, 0.0 }
 0x3ed   :  { %v3789_v18 = vpop.eup %3788 }
 0x3ee   :  { %v416_v19 = vmul.f32 %v3789_v18, %v414_v17  ;;  %v382_v20 = vpop.xlane.xlu2 %381 }
 0x3ef   :  { %v383_v21 = vsub.f32 %v4511_v51, %v382_v20 }
 0x3f0   :  { %v417_v22 = vmul.f32 %v3789_v18, %v416_v19 }
 0x3f1   :  { %v384_v23 = vmul.f32 1.442695, %v383_v21 }
 0x3f2   :  { %v418_v24 = vmul.f32 0.5, %v417_v22 }
 0x3f3   :  { %3790 = vpow2.f32 %v384_v23  ;;  %v471_v56 = vpop.f32.mrf.mxu2 }
 0x3f4   :  { %v419_v25 = vsub.f32 1.5, %v418_v24  ;;  %v4333_v24 = vmov 19  }
 0x3f5   :  { %v483_v58 = vpop.permute.xlu0 %482 }
 0x3f6   :  { %v420_v26 = vmul.f32 %v3789_v18, %v419_v25  ;;  %v4533_v63 = vpop.permute.xlu2 %512  ;;  %v4545_v25 = vld [vmem:[%s5072_s10 + $0x8] sm:$0xff] }
 0x3f7   :  { %547 = vmatpush.msrb.mxu3 %v4545_v25 }
 0x3f8   :  { %v421_v27 = vmul.f32 %v420_v26, %v414_v17  ;;  %v4550_v26 = vld [vmem:[%s5072_s10] sm:$0xff] }
 0x3f9   :  { %v4526_v28 = vpop.eup %3790  ;;  %548 = vmatpush.msrb.mxu3 %v4550_v26 }
 0x3fa   :  { %v423_v30 = vsel %vm422_vm13, %v414_v17, %v421_v27  ;;  %387 = vrot.lane.b32.xlu2 %v4526_v28, %s4329_s28 }
 0x3fb   :  { %v426_v31 = vsel %vm424_vm14, %v425_v29, %v423_v30  ;;  %767 = vmatpush.msra.mxu3 %v4472_v37 }
 0x3fc   :  { %v427_v32 = vadd.f32 1e-08, %v426_v31 }
 0x3fd   :  { %768 = vmatpush.msra.mxu3 %v4474_v38 }
 0x3fe   :  { %3792 = vrcp.f32 %v427_v32  ;;  %v439_v41 = vand.u32 2147483648, %v427_v32  ;;  %v437_v43 = vand.u32 2147483647, %v427_v32  ;;  %vm433_vm3 = vweird.f32 %v427_v32  ;;  %v520_v61 = vpop.permute.xlu0 %519 }
 0x3ff   :  { %v522_v62 = vmul.f32 %v520_v61, %v4436_v0  ;;  %v4332_v0 = vmov 20   ;;  %769 = vmatpush.msra.mxu3 %v4477_v39 }
 0x400   :  { %v440_v52 = vor.u32 1.1754944e-38, %v439_v41  ;;  %vm438_vm5 = vcmp.eq.f32.partialorder %v437_v43, 8.507059e+37  ;;  %3703 = vset.pattern.permute.xlu2 %v4332_v0  ;;  %v4561_v43 = vpop.f32.mrf.mxu3 }
 0x401   :  { %770 = vmatpush.msra.mxu3 %v4480_v40 }
 0x404   :  { %v3793_v33 = vpop.eup %3792 }
 0x405   :  { %v429_v34 = vmul.f32 %v3793_v33, %v427_v32  ;;  %vm434_vm15 = vweird.f32 %v3793_v33 }
 0x406   :  { %vm435_vm4 = vmor %vm433_vm3, %vm434_vm15 }
 0x407   :  { %v430_v36 = vsub.f32 1.0, %v429_v34 }
 0x409   :  { %v431_v42 = vmul.f32 %v3793_v33, %v430_v36 }
 0x40b   :  { %v432_v48 = vadd.f32 %v3793_v33, %v431_v42  ;;  %v4334_v42 = vmov 21  }
 0x40d   :  { %v436_v53 = vsel %vm435_vm4, %v3793_v33, %v432_v48 }
 0x40e   :  { %v441_v54 = vsel %vm438_vm5, %v440_v52, %v436_v53  ;;  %v409_v53 = vadd.f32 1.0, %v4521_v8 }
 0x40f   :  { %v478_v55 = vmul.f32 %v3755_v50, %v441_v54 }
 0x411   :  { %v479_v57 = vmul.f32 %v478_v55, %v471_v56 }
 0x413   :  { %v485_v59 = vmul.f32 %v483_v58, %v479_v57 }
 0x415   :  { %v486_v60 = vsel %vm411_vm7, %v485_v59, -inf }
 0x416   :  { %487 = vmax.xlane.f32.xlu1 %v486_v60 }
 0x42f   :  { %524 = vrot.lane.b32.xlu1 %v522_v62, %s4330_s1 }
 0x454   :  { %v388_v1 = vpop.permute.xlu2 %387 }
 0x455   :  { %v391_v2 = vsel %vm390_vm6, %v388_v1, 0.0 }
 0x459   :  { %392 = vadd.xlane.f32.xlu1 %v391_v2 }
 0x489   :  { %v488_v3 = vpop.xlane.xlu1 %487 }
 0x48a   :  { %v489_v4 = vsub.f32 %v485_v59, %v488_v3 }
 0x48c   :  { %v490_v5 = vmul.f32 1.442695, %v489_v4 }
 0x48e   :  { %3794 = vpow2.f32 %v490_v5  ;;  %v606_v5 = vld [vmem:[#allocation5 + $0x10] sm:$0xff] }
 0x48f   :  { %625 = vmatpush.msrb.mxu0 %v606_v5  ;;  %1043 = vmatpush.msrb.mxu2 %v606_v5 }
 0x494   :  { %v3795_v6 = vpop.eup %3794 }
 0x495   :  { %v492_v7 = vsel %vm411_vm7, %v3795_v6, 0.0 }
 0x496   :  { %493 = vadd.xlane.f32.xlu0 %v492_v7  ;;  %v604_v7 = vld [vmem:[#allocation5] sm:$0xff] }
 0x497   :  { %626 = vmatpush.msrb.mxu0 %v604_v7  ;;  %1044 = vmatpush.msrb.mxu2 %v604_v7 }
 0x499   :  { %3607 = vmatpush.xpose.msk.msra.mxu0 %vm193_vm1, %v4490_v44 }
 0x49d   :  { %3608 = vmatpush.xpose.msk.msra.mxu0 %vm193_vm1, %v4497_v45 }
 0x4a1   :  { %v525_v11 = vpop.permute.xlu1 %524 }
 0x4cc   :  { %v393_v12 = vpop.xlane.xlu1 %392 }
 0x4cd   :  { %3796 = vrcp.f32 %v393_v12  ;;  %v405_v16 = vand.u32 2147483648, %v393_v12  ;;  %v403_v18 = vand.u32 2147483647, %v393_v12  ;;  %vm399_vm10 = vweird.f32 %v393_v12 }
 0x4cf   :  { %v406_v20 = vor.u32 1.1754944e-38, %v405_v16  ;;  %vm404_vm12 = vcmp.eq.f32.partialorder %v403_v18, 8.507059e+37 }
 0x4d3   :  { %v3797_v13 = vpop.eup %3796 }
 0x4d4   :  { %v395_v14 = vmul.f32 %v3797_v13, %v393_v12  ;;  %vm400_vm9 = vweird.f32 %v3797_v13  ;;  %v605_v12 = vld [vmem:[#allocation5 + $0x8] sm:$0xff] }
 0x4d5   :  { %vm401_vm11 = vmor %vm399_vm10, %vm400_vm9 }
 0x4d6   :  { %v396_v15 = vsub.f32 1.0, %v395_v14 }
 0x4d8   :  { %v397_v17 = vmul.f32 %v3797_v13, %v396_v15 }
 0x4da   :  { %v398_v19 = vadd.f32 %v3797_v13, %v397_v17 }
 0x4dc   :  { %v402_v21 = vsel %vm401_vm11, %v3797_v13, %v398_v19 }
 0x4dd   :  { %v407_v22 = vsel %vm404_vm12, %v406_v20, %v402_v21 }
 0x4de   :  { %v408_v23 = vmul.f32 %v4526_v28, %v407_v22 }
 0x4e0   :  { %555 = vperm.xlu0 %3704, %v408_v23   ;;  %566 = vperm.xlu2 %3703, %v408_v23  }
 0x4e8   :  { %3705 = vset.pattern.permute.xlu2 %v4333_v24  ;;  %3707 = vset.pattern.permute.xlu0 %v4327_v46 }
 0x4e9   :  { %560 = vperm.xlu2 %3705, %v408_v23  }
 0x4f1   :  { %3706 = vset.pattern.permute.xlu2 %v4334_v42 }
 0x509   :  { %v494_v27 = vpop.xlane.xlu0 %493 }
 0x50a   :  { %3798 = vrcp.f32 %v494_v27  ;;  %v506_v31 = vand.u32 2147483648, %v494_v27  ;;  %v504_v33 = vand.u32 2147483647, %v494_v27  ;;  %vm500_vm14 = vweird.f32 %v494_v27 }
 0x50c   :  { %v507_v36 = vor.u32 1.1754944e-38, %v506_v31  ;;  %vm505_vm3 = vcmp.eq.f32.partialorder %v504_v33, 8.507059e+37  ;;  %v3756_v33 = vld [vmem:[#allocation11] ss:$0 sm:$0xff] }
 0x510   :  { %v3799_v28 = vpop.eup %3798 }
 0x511   :  { %v496_v29 = vmul.f32 %v3799_v28, %v494_v27  ;;  %vm501_vm13 = vweird.f32 %v3799_v28  ;;  %v301_v27 = vperm.slane %v4506_v47, 0 }
 0x512   :  { %vm502_vm15 = vmor %vm500_vm14, %vm501_vm13 }
 0x513   :  { %v497_v30 = vsub.f32 1.0, %v496_v29 }
 0x515   :  { %v498_v32 = vmul.f32 %v3799_v28, %v497_v30 }
 0x517   :  { %v499_v34 = vadd.f32 %v3799_v28, %v498_v32 }
 0x519   :  { %v503_v37 = vsel %vm502_vm15, %v3799_v28, %v499_v34  ;;  %v328_v28 = vadd.f32 %v4561_v43, %v301_v27 }
 0x51a   :  { %v508_v38 = vsel %vm505_vm3, %v507_v36, %v503_v37 }
 0x51b   :  { %v509_v41 = vmul.f32 %v3795_v6, %v508_v38  ;;  %v159_v6 = vld [vmem:[%s5062_s0 + $0x8] sm:$0xff]  ;;  %v667_v31 = vrot.slane %v328_v28, 6 }
 0x51c   :  { %3590 = vmatmul.msk.f32.gmra.mxu0 %vm161_vm0, %v159_v6 }
 0x51d   :  { %v515_v39 = vmul.f32 %v4533_v63, %v509_v41 }
 0x51f   :  { %v527_v40 = vadd.f32 %v525_v11, %v515_v39  ;;  %v607_v11 = vld [vmem:[#allocation5 + $0x18] sm:$0xff] }
 0x520   :  { %645 = vmatpush.msra.mxu1 %v607_v11 }
 0x521   :  { %3600 = vmatmul.msk.f32.vlgmr.msrb.gmra.mxu3 %vm193_vm1, %v527_v40 }
 0x522   :  { %646 = vmatpush.msra.mxu1 %v605_v12  ;;  %1063 = vmatpush.msrb.mxu3 %v607_v11 }
 0x524   :  { %965 = vmatpush.msrb.mxu1 %v4545_v25  ;;  %1064 = vmatpush.msrb.mxu3 %v605_v12 }
 0x526   :  { %966 = vmatpush.msrb.mxu1 %v4550_v26 }
 0x53a   :  { %v567_v48 = vpop.permute.xlu2 %566 }
 0x543   :  { %v561_v54 = vpop.permute.xlu2 %560 }
 0x544   :  { %v563_v57 = vmul.f32 %v561_v54, %v527_v40 }
 0x552   :  { %v556_v55 = vpop.permute.xlu0 %555 }
 0x599   :  { %v4583_v45 = vpop.f32.mrf.mxu0 }
 0x5a4   :  { %v550_v50 = vpop.f32.mrf.mxu3 }
 0x5a5   :  { %v569_v52 = vmul.f32 %v567_v48, %v550_v50  ;;  %v558_v56 = vmul.f32 %v556_v55, %v550_v50 }
 0x5a7   :  { %571 = vrot.lane.b32.xlu2 %v569_v52, %s4324_s8  ;;  %v564_v58 = vadd.f32 %v563_v57, %v558_v56 }
 0x5af   :  { %580 = vperm.xlu2 %3706, %v409_v53  }
 0x5b7   :  { %3708 = vset.pattern.permute.xlu2 %v4328_v49 }
 0x601   :  { %v572_v59 = vpop.permute.xlu2 %571 }
 0x602   :  { %v574_v60 = vadd.f32 %v572_v59, %v564_v58  ;;  %v696_v59 = vrot.slane %v4468_v35, 6  ;;  %v4600_v35 = vld [vmem:[#allocation14] sm:$0x3] }
 0x604   :  { %v575_v61 = vadd.f32 1e-08, %v574_v60 }
 0x606   :  { %3800 = vlog2.f32 %v575_v61 }
 0x609   :  { %v581_v1 = vpop.permute.xlu2 %580 }
 0x60c   :  { %v3801_v62 = vpop.eup %3800 }
 0x60d   :  { %v577_v63 = vmul.f32 0.6931472, %v3801_v62 }
 0x60f   :  { %v583_v2 = vmul.f32 %v581_v1, %v577_v63 }
 0x611   :  { %v584_v3 = vmul.f32 1.442695, %v583_v2 }
 0x613   :  { %3802 = vpow2.f32 %v584_v3 }
 0x619   :  { %v3803_v4 = vpop.eup %3802 }
 0x61a   :  { %v586_v8 = vsel %vm411_vm7, %v3803_v4, 0.0 }
 0x61b   :  { %587 = vadd.xlane.f32.xlu2 %v586_v8  ;;  %v726_v8 = vperm.slane %v4600_v35, 1 }
 0x68e   :  { %v588_v13 = vpop.xlane.xlu2 %587 }
 0x68f   :  { %3804 = vrcp.f32 %v588_v13  ;;  %v600_v17 = vand.u32 2147483648, %v588_v13  ;;  %v598_v19 = vand.u32 2147483647, %v588_v13  ;;  %vm594_vm4 = vweird.f32 %v588_v13 }
 0x691   :  { %v601_v20 = vor.u32 1.1754944e-38, %v600_v17  ;;  %vm599_vm9 = vcmp.eq.f32.partialorder %v598_v19, 8.507059e+37 }
 0x695   :  { %v3805_v14 = vpop.eup %3804 }
 0x696   :  { %v590_v15 = vmul.f32 %v3805_v14, %v588_v13  ;;  %vm595_vm0 = vweird.f32 %v3805_v14 }
 0x697   :  { %vm596_vm5 = vmor %vm594_vm4, %vm595_vm0 }
 0x698   :  { %v591_v16 = vsub.f32 1.0, %v590_v15 }
 0x69a   :  { %v592_v18 = vmul.f32 %v3805_v14, %v591_v16 }
 0x69c   :  { %v593_v44 = vadd.f32 %v3805_v14, %v592_v18 }
 0x69e   :  { %v597_v21 = vsel %vm596_vm5, %v3805_v14, %v593_v44 }
 0x69f   :  { %v602_v22 = vsel %vm599_vm9, %v601_v20, %v597_v21 }
 0x6a0   :  { %v4577_v23 = vmul.f32 %v3803_v4, %v602_v22 }
 0x6a2   :  { %3601 = vmatmul.msk.f32.vlgmr.msrb.gmra.mxu0 %vm193_vm1, %v4577_v23  ;;  %3602 = vmatmul.msk.f32.vlgmr.msra.gmra.mxu1 %vm193_vm1, %v4577_v23 }
 0x71f   :  { %v628_v29 = vpop.f32.mrf.mxu0 }
 0x720   :  { %v663_v30 = vrot.slane %v628_v29, 6 }
 0x722   :  { %v665_v32 = vadd.f32 %v663_v30, %v4463_v10 }
 0x724   :  { %v669_v34 = vadd.f32 %v667_v31, %v665_v32 }
 0x726   :  { %v674_v36 = vadd.f32 %v3756_v33, %v669_v34 }
 0x728   :  { %3806 = vtanh.f32 %v674_v36  ;;  %v3603_v38 = vmul.f32 -1.442695, %v674_v36 }
 0x72a   :  { %3808 = vpow2.f32 %v3603_v38 }
 0x72e   :  { %v3807_v37 = vpop.eup %3806 }
 0x72f   :  { %700 = vrot.lane.b32.xlu1 %v3807_v37, %s4325_s23 }
 0x730   :  { %v3809_v41 = vpop.eup %3808 }
 0x731   :  { %v678_v39 = vadd.f32 1.0, %v3809_v41 }
 0x733   :  { %3810 = vrcp.f32 %v678_v39  ;;  %v690_v52 = vand.u32 2147483648, %v678_v39  ;;  %vm684_vm11 = vweird.f32 %v678_v39  ;;  %v688_v53 = vand.u32 2147483647, %v678_v39 }
 0x735   :  { %v691_v55 = vor.u32 1.1754944e-38, %v690_v52  ;;  %vm689_vm13 = vcmp.eq.f32.partialorder %v688_v53, 8.507059e+37 }
 0x739   :  { %v3811_v47 = vpop.eup %3810 }
 0x73a   :  { %v680_v40 = vmul.f32 %v3811_v47, %v678_v39  ;;  %vm685_vm10 = vweird.f32 %v3811_v47 }
 0x73b   :  { %vm686_vm12 = vmor %vm684_vm11, %vm685_vm10 }
 0x73c   :  { %v681_v43 = vsub.f32 1.0, %v680_v40 }
 0x73e   :  { %v682_v48 = vmul.f32 %v3811_v47, %v681_v43 }
 0x740   :  { %v683_v50 = vadd.f32 %v3811_v47, %v682_v48 }
 0x742   :  { %v687_v54 = vsel %vm686_vm12, %v3811_v47, %v683_v50 }
 0x743   :  { %v692_v57 = vsel %vm689_vm13, %v691_v55, %v687_v54 }
 0x744   :  { %v698_v60 = vmul.f32 %v696_v59, %v692_v57 }
 0x7a1   :  { %v701_v56 = vpop.permute.xlu1 %700 }
 0x7a2   :  { %v703_v58 = vmul.f32 %v701_v56, %v692_v57 }
 0x7a4   :  { %705 = vrot.lane.b32.xlu0 %v703_v58, %s4326_s24 }
 0x816   :  { %v706_v61 = vpop.permute.xlu0 %705 }
 0x817   :  { %v4591_v62 = vadd.f32 %v706_v61, %v698_v60 }
 0x819   :  { %3812 = vtanh.f32 %v4591_v62 }
 0x81f   :  { %v3813_v63 = vpop.eup %3812 }
 0x820   :  { %711 = vrot.lane.b32.xlu0 %v3813_v63, %s4325_s23 }
 0x892   :  { %v712_v1 = vpop.permute.xlu0 %711 }
 0x893   :  { %v714_v2 = vmul.f32 %v712_v1, %v692_v57 }
 0x895   :  { %v730_v3 = vrot.slane %v714_v2, 2  ;;  %v3757_v2 = vld [vmem:[#allocation7] ss:$0 sm:$0xff] }
 0x897   :  { %731 = vrot.lane.b32.xlu0 %v730_v3, %s4326_s24 }
 0x909   :  { %v732_v4 = vpop.permute.xlu0 %731 }
 0x90a   :  { %3604 = vmatmul.msk.f32.vlgmr.msra.gmra.mxu2 %vm223_vm2, %v732_v4  ;;  %3605 = vmatmul.msk.f32.vlgmr.msra.gmra.mxu3 %vm223_vm2, %v732_v4 }
 0x90b   :  { %1383 = vmatpush.msra.mxu3 %v4545_v25 }
 0x90d   :  { %1384 = vmatpush.msra.mxu3 %v4550_v26 }
 0x98d   :  { %v772_v5 = vpop.f32.mrf.mxu3 }
 0x98e   :  { %v4603_v6 = vadd.f32 %v772_v5, %v726_v8 }
 0x990   :  { %3814 = vtanh.f32 %v4603_v6  ;;  %v776_v7 = vand.u32 2147483647, %v4603_v6  ;;  %v3606_v11 = vmul.f32 -1.442695, %v4603_v6  ;;  %v783_v27 = vmax.f32 %v4603_v6, 0.0 }
 0x991   :  { %v804_v38 = vsel %vm379_vm8, %v4603_v6, -inf }
 0x992   :  { %v777_v12 = vsub.f32 0.0, %v776_v7  ;;  %3816 = vpow2.f32 %v3606_v11 }
 0x994   :  { %v778_v13 = vmul.f32 1.442695, %v777_v12 }
 0x996   :  { %v3815_v14 = vpop.eup %3814  ;;  %3818 = vpow2.f32 %v778_v13 }
 0x997   :  { %3609 = vmatmul.msk.f32.vlgmr.msra.gmra.mxu0 %vm193_vm1, %v3815_v14  ;;  %v833_v25 = vmul.f32 %v3815_v14, %v3815_v14 }
 0x998   :  { %v3817_v26 = vpop.eup %3816 }
 0x999   :  { %v834_v15 = vsel %vm411_vm7, %v833_v25, 0.0  ;;  %v788_v16 = vadd.f32 1.0, %v3817_v26 }
 0x99a   :  { %835 = vadd.xlane.f32.xlu1 %v834_v15 }
 0x99b   :  { %3820 = vrcp.f32 %v788_v16  ;;  %v800_v30 = vand.u32 2147483648, %v788_v16  ;;  %vm794_vm15 = vweird.f32 %v788_v16  ;;  %v798_v32 = vand.u32 2147483647, %v788_v16 }
 0x99c   :  { %v3819_v17 = vpop.eup %3818 }
 0x99d   :  { %v780_v18 = vadd.f32 1.0, %v3819_v17  ;;  %v801_v34 = vor.u32 1.1754944e-38, %v800_v30  ;;  %vm799_vm0 = vcmp.eq.f32.partialorder %v798_v32, 8.507059e+37 }
 0x99f   :  { %3822 = vlog2.f32 %v780_v18 }
 0x9a1   :  { %v3821_v19 = vpop.eup %3820 }
 0x9a2   :  { %v790_v44 = vmul.f32 %v3821_v19, %v788_v16  ;;  %vm795_vm14 = vweird.f32 %v3821_v19 }
 0x9a3   :  { %vm796_vm3 = vmor %vm794_vm15, %vm795_vm14 }
 0x9a4   :  { %v791_v21 = vsub.f32 1.0, %v790_v44 }
 0x9a5   :  { %v3823_v20 = vpop.eup %3822 }
 0x9a6   :  { %v782_v22 = vmul.f32 0.6931472, %v3823_v20  ;;  %v792_v28 = vmul.f32 %v3821_v19, %v791_v21 }
 0x9a8   :  { %v4611_v29 = vadd.f32 %v783_v27, %v782_v22  ;;  %v793_v31 = vadd.f32 %v3821_v19, %v792_v28 }
 0x9aa   :  { %904 = vperm.xlu0 %3707, %v4611_v29   ;;  %v797_v33 = vsel %vm796_vm3, %v3821_v19, %v793_v31 }
 0x9ab   :  { %v802_v36 = vsel %vm799_vm0, %v801_v34, %v797_v33 }
 0x9ac   :  { %v938_v37 = vsub.f32 1.0, %v802_v36 }
 0x9b2   :  { %3710 = vset.pattern.permute.xlu0 %v4332_v0 }
 0x9b3   :  { %941 = vperm.xlu1 %3709, %v938_v37  }
 0x9bb   :  { %3711 = vset.pattern.permute.xlu1 %v4331_v9 }
 0x9d4   :  { %805 = vmax.xlane.f32.xlu0 %v804_v38 }
 0xa0d   :  { %v836_v41 = vpop.xlane.xlu1 %835 }
 0xa0e   :  { %3824 = vrsqrt.f32 %v836_v41  ;;  %vm844_vm4 = vcmp.eq.f32.partialorder %v836_v41, inf  ;;  %v847_v53 = vand.u32 2147483648, %v836_v41  ;;  %vm846_vm5 = vcmp.eq.f32.partialorder %v836_v41, 0.0 }
 0xa14   :  { %v3825_v39 = vpop.eup %3824  ;;  %v893_v7 = vpop.f32.mrf.mxu0 }
 0xa15   :  { %v838_v47 = vmul.f32 %v3825_v39, %v836_v41 }
 0xa17   :  { %v839_v40 = vmul.f32 %v3825_v39, %v838_v47 }
 0xa19   :  { %v840_v43 = vmul.f32 0.5, %v839_v40 }
 0xa1b   :  { %v841_v48 = vsub.f32 1.5, %v840_v43 }
 0xa1c   :  { %v905_v12 = vpop.permute.xlu0 %904 }
 0xa1d   :  { %v842_v50 = vmul.f32 %v3825_v39, %v841_v48 }
 0xa1f   :  { %v843_v52 = vmul.f32 %v842_v50, %v836_v41 }
 0xa21   :  { %v845_v54 = vsel %vm844_vm4, %v836_v41, %v843_v52 }
 0xa22   :  { %v848_v55 = vsel %vm846_vm5, %v847_v53, %v845_v54 }
 0xa23   :  { %v849_v56 = vadd.f32 1e-08, %v848_v55 }
 0xa25   :  { %3826 = vrcp.f32 %v849_v56  ;;  %v861_v60 = vand.u32 2147483648, %v849_v56  ;;  %v859_v63 = vand.u32 2147483647, %v849_v56  ;;  %vm855_vm10 = vweird.f32 %v849_v56  ;;  %v942_v41 = vpop.permute.xlu1 %941 }
 0xa26   :  { %v944_v43 = vmul.f32 %v942_v41, %v4577_v23  ;;  %v725_v41 = vperm.slane %v4600_v35, 0 }
 0xa27   :  { %v862_v3 = vor.u32 1.1754944e-38, %v861_v60  ;;  %vm860_vm12 = vcmp.eq.f32.partialorder %v859_v63, 8.507059e+37 }
 0xa2b   :  { %v3827_v57 = vpop.eup %3826 }
 0xa2c   :  { %v851_v58 = vmul.f32 %v3827_v57, %v849_v56  ;;  %vm856_vm9 = vweird.f32 %v3827_v57 }
 0xa2d   :  { %vm857_vm11 = vmor %vm855_vm10, %vm856_vm9 }
 0xa2e   :  { %v852_v59 = vsub.f32 1.0, %v851_v58 }
 0xa30   :  { %v853_v61 = vmul.f32 %v3827_v57, %v852_v59 }
 0xa32   :  { %v854_v1 = vadd.f32 %v3827_v57, %v853_v61 }
 0xa34   :  { %v858_v4 = vsel %vm857_vm11, %v3827_v57, %v854_v1  ;;  %v4628_v1 = vpop.f32.mrf.mxu1 }
 0xa35   :  { %v863_v8 = vsel %vm860_vm12, %v862_v3, %v858_v4 }
 0xa36   :  { %v900_v5 = vmul.f32 %v3757_v2, %v863_v8  ;;  %v832_v8 = vadd.f32 1.0, %v4611_v29 }
 0xa38   :  { %v901_v11 = vmul.f32 %v900_v5, %v893_v7 }
 0xa3a   :  { %v907_v13 = vmul.f32 %v905_v12, %v901_v11 }
 0xa3c   :  { %v908_v14 = vsel %vm411_vm7, %v907_v13, -inf }
 0xa3d   :  { %909 = vmax.xlane.f32.xlu2 %v908_v14 }
 0xa47   :  { %v806_v18 = vpop.xlane.xlu0 %805 }
 0xa48   :  { %v807_v19 = vsub.f32 %v4603_v6, %v806_v18 }
 0xa4a   :  { %v808_v44 = vmul.f32 1.442695, %v807_v19 }
 0xab0   :  { %v910_v25 = vpop.xlane.xlu2 %909 }
 0xab1   :  { %v911_v26 = vsub.f32 %v907_v13, %v910_v25 }
 0xab3   :  { %v912_v15 = vmul.f32 1.442695, %v911_v26 }
 0xab5   :  { %3828 = vpow2.f32 %v912_v15 }
 0xab6   :  { %3830 = vpow2.f32 %v808_v44 }
 0xabb   :  { %v3829_v16 = vpop.eup %3828 }
 0xabc   :  { %v914_v17 = vsel %vm411_vm7, %v3829_v16, 0.0  ;;  %v3831_v20 = vpop.eup %3830 }
 0xabd   :  { %915 = vadd.xlane.f32.xlu2 %v914_v17 }
 0xad5   :  { %934 = vperm.xlu2 %3708, %v802_v36  }
 0xadd   :  { %811 = vrot.lane.b32.xlu2 %v3831_v20, %s4329_s28 }
 0xb30   :  { %v916_v21 = vpop.xlane.xlu2 %915 }
 0xb31   :  { %3832 = vrcp.f32 %v916_v21  ;;  %v928_v31 = vand.u32 2147483648, %v916_v21  ;;  %v926_v33 = vand.u32 2147483647, %v916_v21  ;;  %vm922_vm14 = vweird.f32 %v916_v21 }
 0xb33   :  { %v929_v37 = vor.u32 1.1754944e-38, %v928_v31  ;;  %vm927_vm3 = vcmp.eq.f32.partialorder %v926_v33, 8.507059e+37 }
 0xb37   :  { %v3833_v22 = vpop.eup %3832 }
 0xb38   :  { %v918_v27 = vmul.f32 %v3833_v22, %v916_v21  ;;  %v935_v28 = vpop.permute.xlu2 %934  ;;  %vm923_vm13 = vweird.f32 %v3833_v22 }
 0xb39   :  { %vm924_vm15 = vmor %vm922_vm14, %vm923_vm13 }
 0xb3a   :  { %v919_v30 = vsub.f32 1.0, %v918_v27 }
 0xb3c   :  { %v920_v32 = vmul.f32 %v3833_v22, %v919_v30 }
 0xb3e   :  { %v921_v34 = vadd.f32 %v3833_v22, %v920_v32 }
 0xb40   :  { %v925_v38 = vsel %vm924_vm15, %v3833_v22, %v921_v34  ;;  %v812_v36 = vpop.permute.xlu2 %811 }
 0xb41   :  { %v930_v39 = vsel %vm927_vm3, %v929_v37, %v925_v38  ;;  %v814_v47 = vsel %vm390_vm6, %v812_v36, 0.0  ;;  %v752_v36 = vpop.f32.mrf.mxu2 }
 0xb42   :  { %v931_v40 = vmul.f32 %v3829_v16, %v930_v39  ;;  %815 = vadd.xlane.f32.xlu2 %v814_v47  ;;  %v753_v39 = vadd.f32 %v752_v36, %v725_v41 }
 0xb44   :  { %v937_v48 = vmul.f32 %v935_v28, %v931_v40 }
 0xb46   :  { %v945_v50 = vadd.f32 %v944_v43, %v937_v48  ;;  %v1085_v43 = vrot.slane %v753_v39, 4 }
 0xb48   :  { %3610 = vmatmul.msk.f32.vlgmr.msrb.gmra.mxu1 %vm193_vm1, %v945_v50 }
 0xbb5   :  { %v816_v52 = vpop.xlane.xlu2 %815 }
 0xbb6   :  { %3834 = vrcp.f32 %v816_v52  ;;  %v828_v56 = vand.u32 2147483648, %v816_v52  ;;  %v826_v58 = vand.u32 2147483647, %v816_v52  ;;  %vm822_vm4 = vweird.f32 %v816_v52 }
 0xbb8   :  { %v829_v60 = vor.u32 1.1754944e-38, %v828_v56  ;;  %vm827_vm9 = vcmp.eq.f32.partialorder %v826_v58, 8.507059e+37 }
 0xbbc   :  { %v3835_v53 = vpop.eup %3834 }
 0xbbd   :  { %v818_v54 = vmul.f32 %v3835_v53, %v816_v52  ;;  %vm823_vm0 = vweird.f32 %v3835_v53 }
 0xbbe   :  { %vm824_vm5 = vmor %vm822_vm4, %vm823_vm0 }
 0xbbf   :  { %v819_v55 = vsub.f32 1.0, %v818_v54 }
 0xbc1   :  { %v820_v57 = vmul.f32 %v3835_v53, %v819_v55 }
 0xbc3   :  { %v821_v59 = vadd.f32 %v3835_v53, %v820_v57 }
 0xbc5   :  { %v825_v61 = vsel %vm824_vm5, %v3835_v53, %v821_v59  ;;  %v968_v2 = vpop.f32.mrf.mxu1 }
 0xbc6   :  { %v830_v23 = vsel %vm827_vm9, %v829_v60, %v825_v61 }
 0xbc7   :  { %v831_v63 = vmul.f32 %v3831_v20, %v830_v23 }
 0xbc9   :  { %973 = vperm.xlu1 %3711, %v831_v63   ;;  %984 = vperm.xlu0 %3710, %v831_v63  }
 0xbd1   :  { %3712 = vset.pattern.permute.xlu1 %v4333_v24  ;;  %3714 = vset.pattern.permute.xlu0 %v4327_v46 }
 0xbd2   :  { %978 = vperm.xlu1 %3712, %v831_v63  }
 0xbda   :  { %3713 = vset.pattern.permute.xlu1 %v4334_v42 }
 0xc3b   :  { %v985_v3 = vpop.permute.xlu0 %984  ;;  %v974_v5 = vpop.permute.xlu1 %973 }
 0xc3c   :  { %v987_v4 = vmul.f32 %v985_v3, %v968_v2  ;;  %v976_v12 = vmul.f32 %v974_v5, %v968_v2 }
 0xc3e   :  { %989 = vrot.lane.b32.xlu1 %v987_v4, %s4324_s8 }
 0xc44   :  { %v979_v7 = vpop.permute.xlu1 %978 }
 0xc45   :  { %v981_v11 = vmul.f32 %v979_v7, %v945_v50  ;;  %v3758_v50 = vld [vmem:[#allocation11] ss:$0 sm:$0xff]  ;;  %v1114_v7 = vrot.slane %v4591_v62, 6  ;;  %v1134_v62 = vld [vmem:[#allocation13 + $0x8] sm:$0xff] }
 0xc46   :  { %998 = vperm.xlu1 %3713, %v832_v8  }
 0xc47   :  { %v982_v13 = vadd.f32 %v981_v11, %v976_v12 }
 0xc4e   :  { %3715 = vset.pattern.permute.xlu1 %v4328_v49 }
 0xcb0   :  { %v990_v14 = vpop.permute.xlu1 %989 }
 0xcb1   :  { %v992_v25 = vadd.f32 %v990_v14, %v982_v13 }
 0xcb3   :  { %v993_v26 = vadd.f32 1e-08, %v992_v25  ;;  %v1140_v25 = vld [vmem:[#allocation13 + $0x38] sm:$0xff] }
 0xcb4   :  { %1185 = vmatpush.msra.mxu1 %v1140_v25 }
 0xcb5   :  { %3836 = vlog2.f32 %v993_v26  ;;  %v1139_v26 = vld [vmem:[#allocation13 + $0x30] sm:$0xff] }
 0xcb6   :  { %1165 = vmatpush.msrb.mxu0 %v1139_v26 }
 0xcb8   :  { %v999_v17 = vpop.permute.xlu1 %998 }
 0xcbb   :  { %v3837_v15 = vpop.eup %3836 }
 0xcbc   :  { %v995_v16 = vmul.f32 0.6931472, %v3837_v15  ;;  %v1138_v15 = vld [vmem:[#allocation13 + $0x28] sm:$0xff] }
 0xcbd   :  { %1186 = vmatpush.msra.mxu1 %v1138_v15 }
 0xcbe   :  { %v1001_v18 = vmul.f32 %v999_v17, %v995_v16  ;;  %v1137_v16 = vld [vmem:[#allocation13 + $0x20] sm:$0xff]  ;;  %v1136_v17 = vld [vmem:[#allocation13 + $0x18] sm:$0xff] }
 0xcbf   :  { %1166 = vmatpush.msrb.mxu0 %v1137_v16  ;;  %1187 = vmatpush.msra.mxu1 %v1136_v17 }
 0xcc0   :  { %v1002_v19 = vmul.f32 1.442695, %v1001_v18  ;;  %v1135_v18 = vld [vmem:[#allocation13 + $0x10] sm:$0xff] }
 0xcc1   :  { %1167 = vmatpush.msrb.mxu0 %v1135_v18  ;;  %1188 = vmatpush.msra.mxu1 %v1134_v62 }
 0xcc2   :  { %3838 = vpow2.f32 %v1002_v19  ;;  %v1133_v19 = vld [vmem:[#allocation13] sm:$0xff] }
 0xcc3   :  { %1168 = vmatpush.msrb.mxu0 %v1133_v19 }
 0xcc8   :  { %v3839_v44 = vpop.eup %3838 }
 0xcc9   :  { %v1004_v29 = vsel %vm411_vm7, %v3839_v44, 0.0 }
 0xcca   :  { %1005 = vadd.xlane.f32.xlu1 %v1004_v29 }
 0xd3d   :  { %v1006_v20 = vpop.xlane.xlu1 %1005 }
 0xd3e   :  { %3840 = vrcp.f32 %v1006_v20  ;;  %v1018_v28 = vand.u32 2147483648, %v1006_v20  ;;  %v1016_v31 = vand.u32 2147483647, %v1006_v20  ;;  %vm1012_vm11 = vweird.f32 %v1006_v20 }
 0xd40   :  { %v1019_v33 = vor.u32 1.1754944e-38, %v1018_v28  ;;  %vm1017_vm13 = vcmp.eq.f32.partialorder %v1016_v31, 8.507059e+37  ;;  %v4666_v28 = vld [vmem:[#allocation14] sm:$0x3] }
 0xd44   :  { %v3841_v21 = vpop.eup %3840 }
 0xd45   :  { %v1008_v22 = vmul.f32 %v3841_v21, %v1006_v20  ;;  %vm1013_vm10 = vweird.f32 %v3841_v21 }
 0xd46   :  { %vm1014_vm12 = vmor %vm1012_vm11, %vm1013_vm10 }
 0xd47   :  { %v1009_v27 = vsub.f32 1.0, %v1008_v22  ;;  %v4655_v22 = vld [vmem:[%s5064_s2 + $0x8] sm:$0xff] }
 0xd48   :  { %3617 = vmatpush.xpose.msk.msra.mxu2 %vm193_vm1, %v4655_v22 }
 0xd49   :  { %v1010_v30 = vmul.f32 %v3841_v21, %v1009_v27  ;;  %v4662_v27 = vld [vmem:[%s5064_s2] sm:$0xff] }
 0xd4b   :  { %v1011_v32 = vadd.f32 %v3841_v21, %v1010_v30  ;;  %v1144_v30 = vperm.slane %v4666_v28, 1 }
 0xd4c   :  { %3618 = vmatpush.xpose.msk.msra.mxu2 %vm193_vm1, %v4662_v27 }
 0xd4d   :  { %v1015_v34 = vsel %vm1014_vm12, %v3841_v21, %v1011_v32 }
 0xd4e   :  { %v1020_v37 = vsel %vm1017_vm13, %v1019_v33, %v1015_v34 }
 0xd4f   :  { %v4634_v38 = vmul.f32 %v3839_v44, %v1020_v37 }
 0xd51   :  { %3611 = vmatmul.msk.f32.vlgmr.msrb.gmra.mxu2 %vm193_vm1, %v4634_v38  ;;  %3612 = vmatmul.msk.f32.vlgmr.msrb.gmra.mxu3 %vm193_vm1, %v4634_v38 }
 0xd52   :  { %1603 = vmatpush.msrb.mxu3 %v1140_v25  ;;  %1583 = vmatpush.msrb.mxu2 %v1139_v26 }
 0xd54   :  { %1604 = vmatpush.msrb.mxu3 %v1138_v15  ;;  %1584 = vmatpush.msrb.mxu2 %v1137_v16 }
 0xd56   :  { %1605 = vmatpush.msrb.mxu3 %v1136_v17  ;;  %1585 = vmatpush.msrb.mxu2 %v1135_v18 }
 0xd58   :  { %1606 = vmatpush.msrb.mxu3 %v1134_v62  ;;  %1586 = vmatpush.msrb.mxu2 %v1133_v19 }
 0xdd4   :  { %v1046_v47 = vpop.f32.mrf.mxu2 }
 0xdd5   :  { %v1081_v40 = vrot.slane %v1046_v47, 4 }
 0xdd7   :  { %v1083_v48 = vadd.f32 %v1081_v40, %v4463_v10 }
 0xdd9   :  { %v1087_v52 = vadd.f32 %v1085_v43, %v1083_v48 }
 0xddb   :  { %v1092_v53 = vadd.f32 %v3758_v50, %v1087_v52 }
 0xddd   :  { %3842 = vtanh.f32 %v1092_v53  ;;  %v3613_v55 = vmul.f32 -1.442695, %v1092_v53 }
 0xddf   :  { %3844 = vpow2.f32 %v3613_v55 }
 0xde3   :  { %v3843_v54 = vpop.eup %3842 }
 0xde4   :  { %1118 = vrot.lane.b32.xlu2 %v3843_v54, %s4325_s23 }
 0xde5   :  { %v3845_v56 = vpop.eup %3844 }
 0xde6   :  { %v1096_v57 = vadd.f32 1.0, %v3845_v56 }
 0xde8   :  { %3846 = vrcp.f32 %v1096_v57  ;;  %v1108_v23 = vand.u32 2147483648, %v1096_v57  ;;  %vm1102_vm15 = vweird.f32 %v1096_v57  ;;  %v1106_v63 = vand.u32 2147483647, %v1096_v57 }
 0xdea   :  { %v1109_v3 = vor.u32 1.1754944e-38, %v1108_v23  ;;  %vm1107_vm0 = vcmp.eq.f32.partialorder %v1106_v63, 8.507059e+37 }
 0xdee   :  { %v3847_v58 = vpop.eup %3846 }
 0xdef   :  { %v1098_v35 = vmul.f32 %v3847_v58, %v1096_v57  ;;  %vm1103_vm14 = vweird.f32 %v3847_v58 }
 0xdf0   :  { %vm1104_vm3 = vmor %vm1102_vm15, %vm1103_vm14 }
 0xdf1   :  { %v1099_v59 = vsub.f32 1.0, %v1098_v35 }
 0xdf3   :  { %v1100_v60 = vmul.f32 %v3847_v58, %v1099_v59 }
 0xdf5   :  { %v1101_v61 = vadd.f32 %v3847_v58, %v1100_v60 }
 0xdf7   :  { %v1105_v2 = vsel %vm1104_vm3, %v3847_v58, %v1101_v61 }
 0xdf8   :  { %v1110_v8 = vsel %vm1107_vm0, %v1109_v3, %v1105_v2 }
 0xdf9   :  { %v1116_v11 = vmul.f32 %v1114_v7, %v1110_v8 }
 0xe3e   :  { %v1119_v4 = vpop.permute.xlu2 %1118 }
 0xe3f   :  { %v1121_v5 = vmul.f32 %v1119_v4, %v1110_v8 }
 0xe41   :  { %1123 = vrot.lane.b32.xlu0 %v1121_v5, %s4326_s24 }
 0xeb3   :  { %v1124_v12 = vpop.permute.xlu0 %1123 }
 0xeb4   :  { %v4645_v13 = vadd.f32 %v1124_v12, %v1116_v11 }
 0xeb6   :  { %3848 = vtanh.f32 %v4645_v13 }
 0xebc   :  { %v3849_v14 = vpop.eup %3848 }
 0xebd   :  { %1129 = vrot.lane.b32.xlu0 %v3849_v14, %s4325_s23 }
 0xf2f   :  { %v1130_v44 = vpop.permute.xlu0 %1129 }
 0xf30   :  { %v1132_v29 = vmul.f32 %v1130_v44, %v1110_v8 }
 0xf32   :  { %v1148_v20 = vrot.slane %v1132_v29, 4 }
 0xf34   :  { %1149 = vrot.lane.b32.xlu0 %v1148_v20, %s4326_s24 }
 0xfa6   :  { %v1150_v21 = vpop.permute.xlu0 %1149 }
 0xfa7   :  { %3614 = vmatmul.msk.f32.vlgmr.msrb.gmra.mxu0 %vm223_vm2, %v1150_v21  ;;  %3615 = vmatmul.msk.f32.vlgmr.msra.gmra.mxu1 %vm223_vm2, %v1150_v21 }
0x1024   :  { %v1190_v31 = vpop.f32.mrf.mxu1 }
0x1025   :  { %v4669_v32 = vadd.f32 %v1190_v31, %v1144_v30  ;;  %v3759_v30 = vld [vmem:[#allocation7] ss:$0 sm:$0xff] }
0x1027   :  { %3850 = vtanh.f32 %v4669_v32  ;;  %v1194_v33 = vand.u32 2147483647, %v4669_v32  ;;  %v3616_v34 = vmul.f32 -1.442695, %v4669_v32  ;;  %v1201_v57 = vmax.f32 %v4669_v32, 0.0 }
0x1029   :  { %v1195_v37 = vsub.f32 0.0, %v1194_v33  ;;  %3852 = vpow2.f32 %v3616_v34 }
0x102b   :  { %v1196_v36 = vmul.f32 1.442695, %v1195_v37 }
0x102d   :  { %v3851_v41 = vpop.eup %3850  ;;  %3854 = vpow2.f32 %v1196_v36 }
0x102e   :  { %3619 = vmatmul.msk.f32.vlgmr.msra.gmra.mxu2 %vm193_vm1, %v3851_v41  ;;  %v1251_v39 = vmul.f32 %v3851_v41, %v3851_v41 }
0x102f   :  { %v3853_v47 = vpop.eup %3852 }
0x1030   :  { %v1252_v40 = vsel %vm411_vm7, %v1251_v39, 0.0  ;;  %v1206_v43 = vadd.f32 1.0, %v3853_v47 }
0x1031   :  { %1253 = vadd.xlane.f32.xlu2 %v1252_v40 }
0x1032   :  { %3856 = vrcp.f32 %v1206_v43  ;;  %v1218_v35 = vand.u32 2147483648, %v1206_v43  ;;  %v1216_v60 = vand.u32 2147483647, %v1206_v43  ;;  %vm1212_vm5 = vweird.f32 %v1206_v43 }
0x1033   :  { %v3855_v48 = vpop.eup %3854 }
0x1034   :  { %v1198_v50 = vadd.f32 1.0, %v3855_v48  ;;  %v1219_v63 = vor.u32 1.1754944e-38, %v1218_v35  ;;  %vm1217_vm10 = vcmp.eq.f32.partialorder %v1216_v60, 8.507059e+37 }
0x1036   :  { %3858 = vlog2.f32 %v1198_v50 }
0x1038   :  { %v3857_v52 = vpop.eup %3856 }
0x1039   :  { %v1208_v53 = vmul.f32 %v3857_v52, %v1206_v43  ;;  %vm1213_vm4 = vweird.f32 %v3857_v52  ;;  %v1222_v43 = vsel %vm379_vm8, %v4669_v32, -inf }
0x103a   :  { %vm1214_vm9 = vmor %vm1212_vm5, %vm1213_vm4 }
0x103b   :  { %v1209_v55 = vsub.f32 1.0, %v1208_v53 }
0x103c   :  { %v3859_v54 = vpop.eup %3858 }
0x103d   :  { %v1200_v56 = vmul.f32 0.6931472, %v3859_v54  ;;  %v1210_v58 = vmul.f32 %v3857_v52, %v1209_v55 }
0x103f   :  { %v4677_v59 = vadd.f32 %v1201_v57, %v1200_v56  ;;  %v1211_v61 = vadd.f32 %v3857_v52, %v1210_v58 }
0x1041   :  { %1322 = vperm.xlu0 %3714, %v4677_v59   ;;  %v1215_v23 = vsel %vm1214_vm9, %v3857_v52, %v1211_v61 }
0x1042   :  { %v1220_v2 = vsel %vm1217_vm10, %v1219_v63, %v1215_v23 }
0x1043   :  { %v1356_v3 = vsub.f32 1.0, %v1220_v2 }
0x1049   :  { %1359 = vperm.xlu2 %3708, %v1356_v3   ;;  %3718 = vset.pattern.permute.xlu0 %v4333_v24 }
0x1051   :  { %3717 = vset.pattern.permute.xlu2 %v4331_v9 }
0x10a4   :  { %v1254_v4 = vpop.xlane.xlu2 %1253 }
0x10a5   :  { %3860 = vrsqrt.f32 %v1254_v4  ;;  %vm1262_vm11 = vcmp.eq.f32.partialorder %v1254_v4, inf  ;;  %v1265_v26 = vand.u32 2147483648, %v1254_v4  ;;  %vm1264_vm12 = vcmp.eq.f32.partialorder %v1254_v4, 0.0 }
0x10ab   :  { %v3861_v8 = vpop.eup %3860 }
0x10ac   :  { %v1256_v5 = vmul.f32 %v3861_v8, %v1254_v4 }
0x10ae   :  { %v1257_v7 = vmul.f32 %v3861_v8, %v1256_v5 }
0x10b0   :  { %v1258_v11 = vmul.f32 0.5, %v1257_v7 }
0x10b1   :  { %v1311_v36 = vpop.f32.mrf.mxu2 }
0x10b2   :  { %v1259_v12 = vsub.f32 1.5, %v1258_v11 }
0x10b3   :  { %v1323_v39 = vpop.permute.xlu0 %1322 }
0x10b4   :  { %v1260_v14 = vmul.f32 %v3861_v8, %v1259_v12 }
0x10b6   :  { %v1261_v25 = vmul.f32 %v1260_v14, %v1254_v4  ;;  %v1360_v14 = vpop.permute.xlu2 %1359 }
0x10b8   :  { %v1263_v15 = vsel %vm1262_vm11, %v1254_v4, %v1261_v25 }
0x10b9   :  { %v1266_v16 = vsel %vm1264_vm12, %v1265_v26, %v1263_v15  ;;  %v1362_v15 = vmul.f32 %v1360_v14, %v4634_v38 }
0x10ba   :  { %v1267_v17 = vadd.f32 1e-08, %v1266_v16 }
0x10bc   :  { %3862 = vrcp.f32 %v1267_v17  ;;  %v1279_v44 = vand.u32 2147483648, %v1267_v17  ;;  %v1277_v20 = vand.u32 2147483647, %v1267_v17  ;;  %vm1273_vm14 = vweird.f32 %v1267_v17 }
0x10be   :  { %v1280_v31 = vor.u32 1.1754944e-38, %v1279_v44  ;;  %vm1278_vm3 = vcmp.eq.f32.partialorder %v1277_v20, 8.507059e+37 }
0x10c2   :  { %v3863_v18 = vpop.eup %3862 }
0x10c3   :  { %v1269_v62 = vmul.f32 %v3863_v18, %v1267_v17  ;;  %vm1274_vm13 = vweird.f32 %v3863_v18 }
0x10c4   :  { %vm1275_vm15 = vmor %vm1273_vm14, %vm1274_vm13 }
0x10c5   :  { %v1270_v19 = vsub.f32 1.0, %v1269_v62 }
0x10c7   :  { %v1271_v29 = vmul.f32 %v3863_v18, %v1270_v19 }
0x10c9   :  { %v1272_v21 = vadd.f32 %v3863_v18, %v1271_v29 }
0x10cb   :  { %v1276_v33 = vsel %vm1275_vm15, %v3863_v18, %v1272_v21 }
0x10cc   :  { %v1281_v34 = vsel %vm1278_vm3, %v1280_v31, %v1276_v33 }
0x10cd   :  { %v1318_v37 = vmul.f32 %v3759_v30, %v1281_v34 }
0x10cf   :  { %v1319_v41 = vmul.f32 %v1318_v37, %v1311_v36  ;;  %v1250_v37 = vadd.f32 1.0, %v4677_v59  ;;  %v4697_v36 = vpop.f32.mrf.mxu3 }
0x10d1   :  { %v1325_v47 = vmul.f32 %v1323_v39, %v1319_v41 }
0x10d3   :  { %v1326_v40 = vsel %vm411_vm7, %v1325_v47, -inf }
0x10d4   :  { %1327 = vmax.xlane.f32.xlu1 %v1326_v40 }
0x10dc   :  { %1223 = vmax.xlane.f32.xlu1 %v1222_v43 }
0x10f5   :  { %1352 = vperm.xlu1 %3715, %v1220_v2  }
0x10fd   :  { %3716 = vset.pattern.permute.xlu1 %v4332_v0 }
0x1147   :  { %v1328_v48 = vpop.xlane.xlu1 %1327 }
0x1148   :  { %v1329_v50 = vsub.f32 %v1325_v47, %v1328_v48 }
0x114a   :  { %v1330_v52 = vmul.f32 1.442695, %v1329_v50 }
0x114c   :  { %3864 = vpow2.f32 %v1330_v52 }
0x114f   :  { %v1224_v53 = vpop.xlane.xlu1 %1223 }
0x1150   :  { %v1225_v54 = vsub.f32 %v4669_v32, %v1224_v53 }
0x1152   :  { %v3865_v55 = vpop.eup %3864  ;;  %v1226_v56 = vmul.f32 1.442695, %v1225_v54 }
0x1153   :  { %v1332_v57 = vsel %vm411_vm7, %v3865_v55, 0.0 }
0x1154   :  { %3866 = vpow2.f32 %v1226_v56  ;;  %1333 = vadd.xlane.f32.xlu0 %v1332_v57 }
0x115a   :  { %v3867_v58 = vpop.eup %3866 }
0x115b   :  { %1229 = vrot.lane.b32.xlu1 %v3867_v58, %s4329_s28 }
0x1167   :  { %v1353_v35 = vpop.permute.xlu1 %1352 }
0x11c7   :  { %v1334_v60 = vpop.xlane.xlu0 %1333 }
0x11c8   :  { %3868 = vrcp.f32 %v1334_v60  ;;  %v1346_v4 = vand.u32 2147483648, %v1334_v60  ;;  %v1344_v5 = vand.u32 2147483647, %v1334_v60  ;;  %vm1340_vm4 = vweird.f32 %v1334_v60 }
0x11ca   :  { %v1347_v11 = vor.u32 1.1754944e-38, %v1346_v4  ;;  %vm1345_vm9 = vcmp.eq.f32.partialorder %v1344_v5, 8.507059e+37 }
0x11cd   :  { %v1230_v61 = vpop.permute.xlu1 %1229 }
0x11ce   :  { %v3869_v23 = vpop.eup %3868  ;;  %v1232_v63 = vsel %vm390_vm6, %v1230_v61, 0.0 }
0x11cf   :  { %v1336_v2 = vmul.f32 %v3869_v23, %v1334_v60  ;;  %1233 = vadd.xlane.f32.xlu0 %v1232_v63  ;;  %vm1341_vm0 = vweird.f32 %v3869_v23  ;;  %v1443_v63 = vld [vmem:[#allocation5 + $0x18] sm:$0xff] }
0x11d0   :  { %vm1342_vm5 = vmor %vm1340_vm4, %vm1341_vm0  ;;  %1481 = vmatpush.msrb.mxu1 %v1443_v63 }
0x11d1   :  { %v1337_v3 = vsub.f32 1.0, %v1336_v2  ;;  %v1440_v2 = vld [vmem:[#allocation5] sm:$0xff] }
0x11d3   :  { %v1338_v8 = vmul.f32 %v3869_v23, %v1337_v3  ;;  %v1441_v3 = vld [vmem:[#allocation5 + $0x8] sm:$0xff] }
0x11d4   :  { %1482 = vmatpush.msrb.mxu1 %v1441_v3 }
0x11d5   :  { %v1339_v7 = vadd.f32 %v3869_v23, %v1338_v8 }
0x11d7   :  { %v1343_v12 = vsel %vm1342_vm5, %v3869_v23, %v1339_v7  ;;  %v1442_v23 = vld [vmem:[#allocation5 + $0x10] sm:$0xff] }
0x11d8   :  { %v1348_v25 = vsel %vm1345_vm9, %v1347_v11, %v1343_v12  ;;  %1461 = vmatpush.msra.mxu0 %v1442_v23  ;;  %1879 = vmatpush.msra.mxu2 %v1442_v23 }
0x11d9   :  { %v1349_v26 = vmul.f32 %v3865_v55, %v1348_v25 }
0x11da   :  { %1462 = vmatpush.msra.mxu0 %v1440_v2  ;;  %1880 = vmatpush.msra.mxu2 %v1440_v2 }
0x11db   :  { %v1355_v16 = vmul.f32 %v1353_v35, %v1349_v26 }
0x11dc   :  { %3627 = vmatpush.xpose.msk.msrb.mxu0 %vm193_vm1, %v4655_v22 }
0x11dd   :  { %v1363_v17 = vadd.f32 %v1362_v15, %v1355_v16 }
0x11df   :  { %3620 = vmatmul.msk.f32.vlgmr.msra.gmra.mxu3 %vm193_vm1, %v1363_v17 }
0x11e0   :  { %1899 = vmatpush.msra.mxu3 %v1443_v63  ;;  %3628 = vmatpush.xpose.msk.msrb.mxu0 %vm193_vm1, %v4662_v27  ;;  %v1170_v27 = vpop.f32.mrf.mxu0 }
0x11e2   :  { %1900 = vmatpush.msra.mxu3 %v1441_v3 }
0x1242   :  { %v1234_v18 = vpop.xlane.xlu0 %1233 }
0x1243   :  { %3870 = vrcp.f32 %v1234_v18  ;;  %v1246_v29 = vand.u32 2147483648, %v1234_v18  ;;  %v1244_v21 = vand.u32 2147483647, %v1234_v18  ;;  %vm1240_vm11 = vweird.f32 %v1234_v18 }
0x1245   :  { %v1247_v31 = vor.u32 1.1754944e-38, %v1246_v29  ;;  %vm1245_vm13 = vcmp.eq.f32.partialorder %v1244_v21, 8.507059e+37 }
0x1249   :  { %v3871_v62 = vpop.eup %3870 }
0x124a   :  { %v1236_v19 = vmul.f32 %v3871_v62, %v1234_v18  ;;  %vm1241_vm10 = vweird.f32 %v3871_v62 }
0x124b   :  { %vm1242_vm12 = vmor %vm1240_vm11, %vm1241_vm10 }
0x124c   :  { %v1237_v44 = vsub.f32 1.0, %v1236_v19 }
0x124e   :  { %v1238_v20 = vmul.f32 %v3871_v62, %v1237_v44 }
0x1250   :  { %v1239_v30 = vadd.f32 %v3871_v62, %v1238_v20  ;;  %v3760_v20 = vld [vmem:[#allocation11] ss:$0 sm:$0xff] }
0x1252   :  { %v1243_v33 = vsel %vm1242_vm12, %v3871_v62, %v1239_v30 }
0x1253   :  { %v1248_v38 = vsel %vm1245_vm13, %v1247_v31, %v1243_v33 }
0x1254   :  { %v1249_v34 = vmul.f32 %v3867_v58, %v1248_v38 }
0x1256   :  { %1396 = vperm.xlu0 %3718, %v1249_v34   ;;  %1391 = vperm.xlu2 %3717, %v1249_v34  }
0x1257   :  { %1402 = vperm.xlu1 %3716, %v1249_v34  }
0x125e   :  { %3719 = vset.pattern.permute.xlu2 %v4334_v42  ;;  %3722 = vset.pattern.permute.xlu0 %v4328_v49 }
0x125f   :  { %1416 = vperm.xlu2 %3719, %v1250_v37   ;;  %3721 = vset.pattern.permute.xlu1 %v4328_v49 }
0x1262   :  { %v1386_v41 = vpop.f32.mrf.mxu3 }
0x1267   :  { %3720 = vset.pattern.permute.xlu2 %v4327_v46 }
0x12b0   :  { %v1392_v43 = vpop.permute.xlu2 %1391 }
0x12b1   :  { %v1394_v59 = vmul.f32 %v1392_v43, %v1386_v41 }
0x12b9   :  { %v1417_v57 = vpop.permute.xlu2 %1416 }
0x12c8   :  { %v1397_v40 = vpop.permute.xlu0 %1396 }
0x12c9   :  { %v1403_v39 = vpop.permute.xlu1 %1402  ;;  %v1399_v48 = vmul.f32 %v1397_v40, %v1363_v17  ;;  %v1143_v17 = vperm.slane %v4666_v28, 0 }
0x12ca   :  { %v1405_v47 = vmul.f32 %v1403_v39, %v1386_v41 }
0x12cb   :  { %v1400_v50 = vadd.f32 %v1399_v48, %v1394_v59  ;;  %v1171_v18 = vadd.f32 %v1170_v27, %v1143_v17 }
0x12cc   :  { %1407 = vrot.lane.b32.xlu1 %v1405_v47, %s4324_s8 }
0x12cd   :  { %v1503_v44 = vrot.slane %v1171_v18, 2 }
0x133e   :  { %v1408_v52 = vpop.permute.xlu1 %1407 }
0x133f   :  { %v1410_v53 = vadd.f32 %v1408_v52, %v1400_v50 }
0x1341   :  { %v1411_v54 = vadd.f32 1e-08, %v1410_v53  ;;  %v1532_v53 = vrot.slane %v4645_v13, 6  ;;  %v4723_v13 = vld [vmem:[#allocation14] sm:$0x3] }
0x1342   :  { %v1562_v23 = vperm.slane %v4723_v13, 1 }
0x1343   :  { %3872 = vlog2.f32 %v1411_v54 }
0x1349   :  { %v3873_v55 = vpop.eup %3872 }
0x134a   :  { %v1413_v56 = vmul.f32 0.6931472, %v3873_v55 }
0x134c   :  { %v1419_v58 = vmul.f32 %v1417_v57, %v1413_v56 }
0x134e   :  { %v1420_v35 = vmul.f32 1.442695, %v1419_v58 }
0x1350   :  { %3874 = vpow2.f32 %v1420_v35 }
0x1356   :  { %v3875_v60 = vpop.eup %3874 }
0x1357   :  { %v1422_v61 = vsel %vm411_vm7, %v3875_v60, 0.0 }
0x1358   :  { %1423 = vadd.xlane.f32.xlu1 %v1422_v61 }
0x13cb   :  { %v1424_v4 = vpop.xlane.xlu1 %1423 }
0x13cc   :  { %3876 = vrcp.f32 %v1424_v4  ;;  %v1436_v11 = vand.u32 2147483648, %v1424_v4  ;;  %v1434_v14 = vand.u32 2147483647, %v1424_v4  ;;  %vm1430_vm15 = vweird.f32 %v1424_v4 }
0x13ce   :  { %v1437_v26 = vor.u32 1.1754944e-38, %v1436_v11  ;;  %vm1435_vm0 = vcmp.eq.f32.partialorder %v1434_v14, 8.507059e+37 }
0x13d2   :  { %v3877_v8 = vpop.eup %3876 }
0x13d3   :  { %v1426_v5 = vmul.f32 %v3877_v8, %v1424_v4  ;;  %vm1431_vm14 = vweird.f32 %v3877_v8 }
0x13d4   :  { %vm1432_vm3 = vmor %vm1430_vm15, %vm1431_vm14 }
0x13d5   :  { %v1427_v7 = vsub.f32 1.0, %v1426_v5 }
0x13d7   :  { %v1428_v12 = vmul.f32 %v3877_v8, %v1427_v7 }
0x13d9   :  { %v1429_v25 = vadd.f32 %v3877_v8, %v1428_v12 }
0x13db   :  { %v1433_v15 = vsel %vm1432_vm3, %v3877_v8, %v1429_v25 }
0x13dc   :  { %v1438_v22 = vsel %vm1435_vm0, %v1437_v26, %v1433_v15 }
0x13dd   :  { %v4705_v16 = vmul.f32 %v3875_v60, %v1438_v22 }
0x13df   :  { %3621 = vmatmul.msk.f32.vlgmr.msra.gmra.mxu0 %vm193_vm1, %v4705_v16  ;;  %3622 = vmatmul.msk.f32.vlgmr.msrb.gmra.mxu1 %vm193_vm1, %v4705_v16 }
0x145c   :  { %v1464_v62 = vpop.f32.mrf.mxu0 }
0x145d   :  { %v1499_v19 = vrot.slane %v1464_v62, 2 }
0x145f   :  { %v1501_v29 = vadd.f32 %v1499_v19, %v4463_v10 }
0x1461   :  { %v1505_v21 = vadd.f32 %v1503_v44, %v1501_v29 }
0x1463   :  { %v1510_v30 = vadd.f32 %v3760_v20, %v1505_v21 }
0x1465   :  { %3878 = vtanh.f32 %v1510_v30  ;;  %v3623_v33 = vmul.f32 -1.442695, %v1510_v30 }
0x1467   :  { %3880 = vpow2.f32 %v3623_v33 }
0x146b   :  { %v3879_v31 = vpop.eup %3878 }
0x146c   :  { %1536 = vrot.lane.b32.xlu2 %v3879_v31, %s4325_s23 }
0x146d   :  { %v3881_v38 = vpop.eup %3880 }
0x146e   :  { %v1514_v34 = vadd.f32 1.0, %v3881_v38 }
0x1470   :  { %3882 = vrcp.f32 %v1514_v34  ;;  %v1526_v40 = vand.u32 2147483648, %v1514_v34  ;;  %vm1520_vm5 = vweird.f32 %v1514_v34  ;;  %v1524_v10 = vand.u32 2147483647, %v1514_v34 }
0x1472   :  { %v1527_v48 = vor.u32 1.1754944e-38, %v1526_v40  ;;  %vm1525_vm10 = vcmp.eq.f32.partialorder %v1524_v10, 8.507059e+37 }
0x1476   :  { %v3883_v37 = vpop.eup %3882 }
0x1477   :  { %v1516_v28 = vmul.f32 %v3883_v37, %v1514_v34  ;;  %vm1521_vm4 = vweird.f32 %v3883_v37 }
0x1478   :  { %vm1522_vm9 = vmor %vm1520_vm5, %vm1521_vm4 }
0x1479   :  { %v1517_v41 = vsub.f32 1.0, %v1516_v28 }
0x147b   :  { %v1518_v39 = vmul.f32 %v3883_v37, %v1517_v41 }
0x147d   :  { %v1519_v47 = vadd.f32 %v3883_v37, %v1518_v39 }
0x147f   :  { %v1523_v43 = vsel %vm1522_vm9, %v3883_v37, %v1519_v47 }
0x1480   :  { %v1528_v50 = vsel %vm1525_vm10, %v1527_v48, %v1523_v43 }
0x1481   :  { %v1534_v54 = vmul.f32 %v1532_v53, %v1528_v50 }
0x14c6   :  { %v1537_v59 = vpop.permute.xlu2 %1536 }
0x14c7   :  { %v1539_v52 = vmul.f32 %v1537_v59, %v1528_v50 }
0x14c9   :  { %1541 = vrot.lane.b32.xlu2 %v1539_v52, %s4326_s24 }
0x1523   :  { %v1542_v55 = vpop.permute.xlu2 %1541 }
0x1524   :  { %v4716_v56 = vadd.f32 %v1542_v55, %v1534_v54 }
0x1526   :  { %3884 = vtanh.f32 %v4716_v56 }
0x152c   :  { %v3885_v57 = vpop.eup %3884 }
0x152d   :  { %1547 = vrot.lane.b32.xlu2 %v3885_v57, %s4325_s23 }
0x1587   :  { %v1548_v58 = vpop.permute.xlu2 %1547 }
0x1588   :  { %v1550_v35 = vmul.f32 %v1548_v58, %v1528_v50 }
0x158a   :  { %v1566_v60 = vrot.slane %v1550_v35, 6 }
0x158c   :  { %1567 = vrot.lane.b32.xlu2 %v1566_v60, %s4326_s24 }
0x15e6   :  { %v1568_v61 = vpop.permute.xlu2 %1567 }
0x15e7   :  { %3624 = vmatmul.msk.f32.vlgmr.msrb.gmra.mxu2 %vm223_vm2, %v1568_v61  ;;  %3625 = vmatmul.msk.f32.vlgmr.msrb.gmra.mxu3 %vm223_vm2, %v1568_v61 }
0x166a   :  { %v1608_v63 = vpop.f32.mrf.mxu3 }
0x166b   :  { %v4726_v2 = vadd.f32 %v1608_v63, %v1562_v23  ;;  %v3761_v23 = vld [vmem:[#allocation7] ss:$0 sm:$0xff] }
0x166d   :  { %3886 = vtanh.f32 %v4726_v2  ;;  %v1640_v3 = vsel %vm379_vm8, %v4726_v2, -inf  ;;  %v1612_v4 = vand.u32 2147483647, %v4726_v2  ;;  %v3626_v8 = vmul.f32 -1.442695, %v4726_v2 }
0x166e   :  { %1641 = vmax.xlane.f32.xlu1 %v1640_v3  ;;  %v1619_v44 = vmax.f32 %v4726_v2, 0.0 }
0x166f   :  { %v1613_v5 = vsub.f32 0.0, %v1612_v4  ;;  %3888 = vpow2.f32 %v3626_v8 }
0x1671   :  { %v1614_v7 = vmul.f32 1.442695, %v1613_v5 }
0x1673   :  { %v3887_v11 = vpop.eup %3886  ;;  %3890 = vpow2.f32 %v1614_v7 }
0x1674   :  { %3629 = vmatmul.msk.f32.vlgmr.msrb.gmra.mxu0 %vm193_vm1, %v3887_v11  ;;  %v1669_v12 = vmul.f32 %v3887_v11, %v3887_v11 }
0x1675   :  { %v3889_v14 = vpop.eup %3888 }
0x1676   :  { %v1670_v25 = vsel %vm411_vm7, %v1669_v12, 0.0  ;;  %v1624_v26 = vadd.f32 1.0, %v3889_v14 }
0x1677   :  { %1671 = vadd.xlane.f32.xlu0 %v1670_v25 }
0x1678   :  { %3892 = vrcp.f32 %v1624_v26  ;;  %v1636_v29 = vand.u32 2147483648, %v1624_v26  ;;  %v1634_v21 = vand.u32 2147483647, %v1624_v26  ;;  %vm1630_vm12 = vweird.f32 %v1624_v26 }
0x1679   :  { %v3891_v15 = vpop.eup %3890 }
0x167a   :  { %v1616_v22 = vadd.f32 1.0, %v3891_v15  ;;  %v1637_v33 = vor.u32 1.1754944e-38, %v1636_v29  ;;  %vm1635_vm14 = vcmp.eq.f32.partialorder %v1634_v21, 8.507059e+37  ;;  %v1782_v21 = vld [vmem:[%s5072_s10] sm:$0xff] }
0x167c   :  { %3894 = vlog2.f32 %v1616_v22 }
0x167e   :  { %v3893_v27 = vpop.eup %3892 }
0x167f   :  { %v1626_v17 = vmul.f32 %v3893_v27, %v1624_v26  ;;  %vm1631_vm11 = vweird.f32 %v3893_v27 }
0x1680   :  { %vm1632_vm13 = vmor %vm1630_vm12, %vm1631_vm11 }
0x1681   :  { %v1627_v62 = vsub.f32 1.0, %v1626_v17 }
0x1682   :  { %v3895_v18 = vpop.eup %3894 }
0x1683   :  { %v1618_v19 = vmul.f32 0.6931472, %v3895_v18  ;;  %v1628_v20 = vmul.f32 %v3893_v27, %v1627_v62 }
0x1685   :  { %v4736_v30 = vadd.f32 %v1619_v44, %v1618_v19  ;;  %v1629_v31 = vadd.f32 %v3893_v27, %v1628_v20  ;;  %v1783_v20 = vld [vmem:[%s5072_s10 + $0x8] sm:$0xff] }
0x1686   :  { %1801 = vmatpush.msra.mxu1 %v1783_v20  ;;  %2212 = vmatpush.msrb.mxu3 %v1783_v20 }
0x1687   :  { %1740 = vperm.xlu2 %3720, %v4736_v30   ;;  %v1633_v38 = vsel %vm1632_vm13, %v3893_v27, %v1629_v31 }
0x1688   :  { %v1638_v34 = vsel %vm1635_vm14, %v1637_v33, %v1633_v38  ;;  %1802 = vmatpush.msra.mxu1 %v1782_v21  ;;  %2213 = vmatpush.msrb.mxu3 %v1782_v21 }
0x1689   :  { %v1774_v37 = vsub.f32 1.0, %v1638_v34 }
0x168b   :  { %1777 = vperm.xlu0 %3722, %v1774_v37  }
0x168f   :  { %3723 = vset.pattern.permute.xlu2 %v4332_v0 }
0x1693   :  { %3724 = vset.pattern.permute.xlu0 %v4331_v9 }
0x16e1   :  { %v1741_v11 = vpop.permute.xlu2 %1740  ;;  %v1642_v25 = vpop.xlane.xlu1 %1641 }
0x16e2   :  { %v1643_v26 = vsub.f32 %v4726_v2, %v1642_v25 }
0x16e4   :  { %v1644_v15 = vmul.f32 1.442695, %v1643_v26 }
0x16ea   :  { %v1672_v28 = vpop.xlane.xlu0 %1671 }
0x16eb   :  { %3896 = vrsqrt.f32 %v1672_v28  ;;  %vm1680_vm15 = vcmp.eq.f32.partialorder %v1672_v28, inf  ;;  %v1683_v59 = vand.u32 2147483648, %v1672_v28  ;;  %vm1682_vm3 = vcmp.eq.f32.partialorder %v1672_v28, 0.0 }
0x16f1   :  { %v3897_v41 = vpop.eup %3896  ;;  %v1729_v5 = vpop.f32.mrf.mxu0 }
0x16f2   :  { %v1674_v39 = vmul.f32 %v3897_v41, %v1672_v28 }
0x16f4   :  { %v1675_v47 = vmul.f32 %v3897_v41, %v1674_v39 }
0x16f6   :  { %v1676_v40 = vmul.f32 0.5, %v1675_v47 }
0x16f8   :  { %v1677_v10 = vsub.f32 1.5, %v1676_v40 }
0x16fa   :  { %v1678_v43 = vmul.f32 %v3897_v41, %v1677_v10 }
0x16fc   :  { %v1679_v48 = vmul.f32 %v1678_v43, %v1672_v28 }
0x16fd   :  { %v1778_v43 = vpop.permute.xlu0 %1777 }
0x16fe   :  { %v1681_v50 = vsel %vm1680_vm15, %v1672_v28, %v1679_v48 }
0x16ff   :  { %v1684_v52 = vsel %vm1682_vm3, %v1683_v59, %v1681_v50  ;;  %v1780_v50 = vmul.f32 %v1778_v43, %v4705_v16 }
0x1700   :  { %v1685_v53 = vadd.f32 1e-08, %v1684_v52 }
0x1702   :  { %3898 = vrcp.f32 %v1685_v53  ;;  %v1697_v58 = vand.u32 2147483648, %v1685_v53  ;;  %v1695_v60 = vand.u32 2147483647, %v1685_v53  ;;  %vm1691_vm4 = vweird.f32 %v1685_v53 }
0x1703   :  { %3900 = vpow2.f32 %v1644_v15 }
0x1704   :  { %v1698_v63 = vor.u32 1.1754944e-38, %v1697_v58  ;;  %vm1696_vm9 = vcmp.eq.f32.partialorder %v1695_v60, 8.507059e+37 }
0x1708   :  { %v3899_v54 = vpop.eup %3898 }
0x1709   :  { %v1687_v55 = vmul.f32 %v3899_v54, %v1685_v53  ;;  %vm1692_vm0 = vweird.f32 %v3899_v54  ;;  %v3901_v22 = vpop.eup %3900 }
0x170a   :  { %vm1693_vm5 = vmor %vm1691_vm4, %vm1692_vm0 }
0x170b   :  { %v1688_v57 = vsub.f32 1.0, %v1687_v55 }
0x170d   :  { %v1689_v35 = vmul.f32 %v3899_v54, %v1688_v57 }
0x170f   :  { %v1690_v61 = vadd.f32 %v3899_v54, %v1689_v35 }
0x1711   :  { %v1694_v3 = vsel %vm1693_vm5, %v3899_v54, %v1690_v61 }
0x1712   :  { %v1699_v4 = vsel %vm1696_vm9, %v1698_v63, %v1694_v3 }
0x1713   :  { %v1736_v8 = vmul.f32 %v3761_v23, %v1699_v4 }
0x1715   :  { %v1737_v7 = vmul.f32 %v1736_v8, %v1729_v5  ;;  %v1668_v8 = vadd.f32 1.0, %v4736_v30  ;;  %v4759_v5 = vpop.f32.mrf.mxu1 }
0x1717   :  { %v1743_v12 = vmul.f32 %v1741_v11, %v1737_v7 }
0x1719   :  { %v1744_v14 = vsel %vm411_vm7, %v1743_v12, -inf }
0x171a   :  { %1745 = vmax.xlane.f32.xlu2 %v1744_v14 }
0x1732   :  { %1647 = vrot.lane.b32.xlu2 %v3901_v22, %s4329_s28 }
0x178d   :  { %v1746_v27 = vpop.xlane.xlu2 %1745 }
0x178e   :  { %v1747_v17 = vsub.f32 %v1743_v12, %v1746_v27 }
0x1790   :  { %v1748_v18 = vmul.f32 1.442695, %v1747_v17 }
0x1792   :  { %3902 = vpow2.f32 %v1748_v18 }
0x1795   :  { %v1648_v44 = vpop.permute.xlu2 %1647 }
0x1796   :  { %v1650_v29 = vsel %vm390_vm6, %v1648_v44, 0.0 }
0x1798   :  { %v3903_v62 = vpop.eup %3902 }
0x1799   :  { %v1750_v19 = vsel %vm411_vm7, %v3903_v62, 0.0 }
0x179a   :  { %1751 = vadd.xlane.f32.xlu1 %v1750_v19 }
0x17b3   :  { %1770 = vperm.xlu1 %3721, %v1638_v34  }
0x17dd   :  { %1651 = vadd.xlane.f32.xlu1 %v1650_v29 }
0x180d   :  { %v1752_v31 = vpop.xlane.xlu1 %1751 }
0x180e   :  { %3904 = vrcp.f32 %v1752_v31  ;;  %v1764_v41 = vand.u32 2147483648, %v1752_v31  ;;  %vm1758_vm11 = vweird.f32 %v1752_v31  ;;  %v1762_v39 = vand.u32 2147483647, %v1752_v31 }
0x1810   :  { %v1765_v40 = vor.u32 1.1754944e-38, %v1764_v41  ;;  %vm1763_vm13 = vcmp.eq.f32.partialorder %v1762_v39, 8.507059e+37 }
0x1814   :  { %v3905_v33 = vpop.eup %3904 }
0x1815   :  { %v1754_v38 = vmul.f32 %v3905_v33, %v1752_v31  ;;  %vm1759_vm10 = vweird.f32 %v3905_v33 }
0x1816   :  { %vm1760_vm12 = vmor %vm1758_vm11, %vm1759_vm10 }
0x1817   :  { %v1755_v34 = vsub.f32 1.0, %v1754_v38 }
0x1819   :  { %v1756_v37 = vmul.f32 %v3905_v33, %v1755_v34 }
0x181b   :  { %v1757_v28 = vadd.f32 %v3905_v33, %v1756_v37 }
0x181d   :  { %v1761_v47 = vsel %vm1760_vm12, %v3905_v33, %v1757_v28 }
0x181e   :  { %v1766_v10 = vsel %vm1763_vm13, %v1765_v40, %v1761_v47 }
0x181f   :  { %v1767_v48 = vmul.f32 %v3903_v62, %v1766_v10 }
0x1825   :  { %v1771_v59 = vpop.permute.xlu1 %1770 }
0x1826   :  { %v1773_v52 = vmul.f32 %v1771_v59, %v1767_v48  ;;  %v1588_v48 = vpop.f32.mrf.mxu2  ;;  %v1561_v59 = vperm.slane %v4723_v13, 0 }
0x1828   :  { %v1781_v53 = vadd.f32 %v1780_v50, %v1773_v52  ;;  %v1589_v52 = vadd.f32 %v1588_v48, %v1561_v59 }
0x182a   :  { %3630 = vmatmul.msk.f32.vlgmr.msra.gmra.mxu1 %vm193_vm1, %v1781_v53 }
0x1850   :  { %v1652_v54 = vpop.xlane.xlu1 %1651 }
0x1851   :  { %3906 = vrcp.f32 %v1652_v54  ;;  %v1664_v35 = vand.u32 2147483648, %v1652_v54  ;;  %v1662_v61 = vand.u32 2147483647, %v1652_v54  ;;  %vm1658_vm15 = vweird.f32 %v1652_v54 }
0x1853   :  { %v1665_v63 = vor.u32 1.1754944e-38, %v1664_v35  ;;  %vm1663_vm0 = vcmp.eq.f32.partialorder %v1662_v61, 8.507059e+37 }
0x1857   :  { %v3907_v55 = vpop.eup %3906 }
0x1858   :  { %v1654_v57 = vmul.f32 %v3907_v55, %v1652_v54  ;;  %vm1659_vm14 = vweird.f32 %v3907_v55  ;;  %v3762_v54 = vld [vmem:[#allocation11] ss:$0 sm:$0xff] }
0x1859   :  { %vm1660_vm3 = vmor %vm1658_vm15, %vm1659_vm14 }
0x185a   :  { %v1655_v58 = vsub.f32 1.0, %v1654_v57 }
0x185c   :  { %v1656_v60 = vmul.f32 %v3907_v55, %v1655_v58 }
0x185e   :  { %v1657_v23 = vadd.f32 %v3907_v55, %v1656_v60 }
0x1860   :  { %v1661_v3 = vsel %vm1660_vm3, %v3907_v55, %v1657_v23 }
0x1861   :  { %v1666_v16 = vsel %vm1663_vm0, %v1665_v63, %v1661_v3 }
0x1862   :  { %v1667_v4 = vmul.f32 %v3901_v22, %v1666_v16 }
0x1864   :  { %1809 = vperm.xlu0 %3724, %v1667_v4   ;;  %1820 = vperm.xlu2 %3723, %v1667_v4  }
0x186c   :  { %3726 = vset.pattern.permute.xlu0 %v4334_v42  ;;  %3725 = vset.pattern.permute.xlu2 %v4333_v24 }
0x186d   :  { %1834 = vperm.xlu0 %3726, %v1668_v8   ;;  %1814 = vperm.xlu2 %3725, %v1667_v4  }
0x1875   :  { %3727 = vset.pattern.permute.xlu0 %v4327_v46  ;;  %3728 = vset.pattern.permute.xlu2 %v4328_v49 }
0x18a7   :  { %v1804_v7 = vpop.f32.mrf.mxu1 }
0x18be   :  { %v1821_v11 = vpop.permute.xlu2 %1820 }
0x18bf   :  { %v1823_v12 = vmul.f32 %v1821_v11, %v1804_v7 }
0x18c1   :  { %1825 = vrot.lane.b32.xlu2 %v1823_v12, %s4324_s8 }
0x18c7   :  { %v1815_v14 = vpop.permute.xlu2 %1814 }
0x18c8   :  { %v1817_v26 = vmul.f32 %v1815_v14, %v1781_v53 }
0x18d6   :  { %v1810_v25 = vpop.permute.xlu0 %1809 }
0x18d7   :  { %v1812_v30 = vmul.f32 %v1810_v25, %v1804_v7 }
0x18d9   :  { %v1818_v15 = vadd.f32 %v1817_v26, %v1812_v30  ;;  %v1944_v30 = vrot.slane %v4716_v56, 6  ;;  %v1964_v56 = vld [vmem:[#allocation13 + $0x8] sm:$0xff] }
0x18df   :  { %v1835_v19 = vpop.permute.xlu0 %1834 }
0x191b   :  { %v1826_v22 = vpop.permute.xlu2 %1825 }
0x191c   :  { %v1828_v27 = vadd.f32 %v1826_v22, %v1818_v15 }
0x191e   :  { %v1829_v17 = vadd.f32 1e-08, %v1828_v27 }
0x1920   :  { %3908 = vlog2.f32 %v1829_v17  ;;  %v1970_v17 = vld [vmem:[#allocation13 + $0x38] sm:$0xff] }
0x1921   :  { %2014 = vmatpush.msrb.mxu1 %v1970_v17 }
0x1926   :  { %v3909_v18 = vpop.eup %3908 }
0x1927   :  { %v1831_v62 = vmul.f32 0.6931472, %v3909_v18  ;;  %v1969_v18 = vld [vmem:[#allocation13 + $0x30] sm:$0xff] }
0x1928   :  { %1994 = vmatpush.msra.mxu0 %v1969_v18 }
0x1929   :  { %v1837_v44 = vmul.f32 %v1835_v19, %v1831_v62  ;;  %v1968_v62 = vld [vmem:[#allocation13 + $0x28] sm:$0xff]  ;;  %v1967_v19 = vld [vmem:[#allocation13 + $0x20] sm:$0xff] }
0x192a   :  { %2015 = vmatpush.msrb.mxu1 %v1968_v62  ;;  %1995 = vmatpush.msra.mxu0 %v1967_v19 }
0x192b   :  { %v1838_v29 = vmul.f32 1.442695, %v1837_v44  ;;  %v1966_v44 = vld [vmem:[#allocation13 + $0x18] sm:$0xff] }
0x192c   :  { %2016 = vmatpush.msrb.mxu1 %v1966_v44 }
0x192d   :  { %3910 = vpow2.f32 %v1838_v29  ;;  %v1965_v29 = vld [vmem:[#allocation13 + $0x10] sm:$0xff] }
0x192e   :  { %1996 = vmatpush.msra.mxu0 %v1965_v29  ;;  %2017 = vmatpush.msrb.mxu1 %v1964_v56 }
0x1933   :  { %v3911_v20 = vpop.eup %3910 }
0x1934   :  { %v1840_v21 = vsel %vm411_vm7, %v3911_v20, 0.0 }
0x1935   :  { %1841 = vadd.xlane.f32.xlu1 %v1840_v21 }
0x19a8   :  { %v1842_v31 = vpop.xlane.xlu1 %1841 }
0x19a9   :  { %3912 = vrcp.f32 %v1842_v31  ;;  %v1854_v37 = vand.u32 2147483648, %v1842_v31  ;;  %v1852_v41 = vand.u32 2147483647, %v1842_v31  ;;  %vm1848_vm5 = vweird.f32 %v1842_v31 }
0x19ab   :  { %v1855_v47 = vor.u32 1.1754944e-38, %v1854_v37  ;;  %vm1853_vm10 = vcmp.eq.f32.partialorder %v1852_v41, 8.507059e+37  ;;  %v4795_v37 = vld [vmem:[#allocation14] sm:$0x3] }
0x19af   :  { %v3913_v33 = vpop.eup %3912 }
0x19b0   :  { %v1844_v38 = vmul.f32 %v3913_v33, %v1842_v31  ;;  %vm1849_vm4 = vweird.f32 %v3913_v33 }
0x19b1   :  { %vm1850_vm9 = vmor %vm1848_vm5, %vm1849_vm4 }
0x19b2   :  { %v1845_v34 = vsub.f32 1.0, %v1844_v38  ;;  %v4784_v38 = vld [vmem:[%s5064_s2 + $0x8] sm:$0xff] }
0x19b3   :  { %3637 = vmatpush.xpose.msk.msrb.mxu2 %vm193_vm1, %v4784_v38 }
0x19b4   :  { %v1846_v28 = vmul.f32 %v3913_v33, %v1845_v34  ;;  %v4791_v34 = vld [vmem:[%s5064_s2] sm:$0xff] }
0x19b6   :  { %v1847_v39 = vadd.f32 %v3913_v33, %v1846_v28  ;;  %v1974_v28 = vperm.slane %v4795_v37, 1 }
0x19b7   :  { %3638 = vmatpush.xpose.msk.msrb.mxu2 %vm193_vm1, %v4791_v34 }
0x19b8   :  { %v1851_v40 = vsel %vm1850_vm9, %v3913_v33, %v1847_v39 }
0x19b9   :  { %v1856_v10 = vsel %vm1853_vm10, %v1855_v47, %v1851_v40 }
0x19ba   :  { %v4763_v43 = vmul.f32 %v3911_v20, %v1856_v10  ;;  %v1963_v20 = vld [vmem:[#allocation13] sm:$0xff] }
0x19bb   :  { %1997 = vmatpush.msra.mxu0 %v1963_v20 }
0x19bc   :  { %3631 = vmatmul.msk.f32.vlgmr.msra.gmra.mxu2 %vm193_vm1, %v4763_v43  ;;  %3632 = vmatmul.msk.f32.vlgmr.msra.gmra.mxu3 %vm193_vm1, %v4763_v43 }
0x19bd   :  { %2432 = vmatpush.msra.mxu3 %v1970_v17  ;;  %2412 = vmatpush.msra.mxu2 %v1969_v18 }
0x19bf   :  { %2433 = vmatpush.msra.mxu3 %v1968_v62  ;;  %2413 = vmatpush.msra.mxu2 %v1967_v19 }
0x19c1   :  { %2434 = vmatpush.msra.mxu3 %v1966_v44  ;;  %2414 = vmatpush.msra.mxu2 %v1965_v29 }
0x19c3   :  { %2435 = vmatpush.msra.mxu3 %v1964_v56  ;;  %2415 = vmatpush.msra.mxu2 %v1963_v20 }
0x1a3f   :  { %v1882_v50 = vpop.f32.mrf.mxu2 }
0x1a40   :  { %v1916_v53 = vadd.f32 %v1882_v50, %v4583_v45 }
0x1a42   :  { %v1917_v55 = vadd.f32 %v1916_v53, %v1589_v52 }
0x1a44   :  { %v1922_v57 = vadd.f32 %v3762_v54, %v1917_v55 }
0x1a46   :  { %3914 = vtanh.f32 %v1922_v57  ;;  %v3633_v35 = vmul.f32 -1.442695, %v1922_v57 }
0x1a48   :  { %3916 = vpow2.f32 %v3633_v35 }
0x1a4c   :  { %v3915_v58 = vpop.eup %3914 }
0x1a4d   :  { %1948 = vrot.lane.b32.xlu2 %v3915_v58, %s4325_s23 }
0x1a4e   :  { %v3917_v60 = vpop.eup %3916 }
0x1a4f   :  { %v1926_v61 = vadd.f32 1.0, %v3917_v60 }
0x1a51   :  { %3918 = vrcp.f32 %v1926_v61  ;;  %v1938_v4 = vand.u32 2147483648, %v1926_v61  ;;  %vm1932_vm12 = vweird.f32 %v1926_v61  ;;  %v1936_v8 = vand.u32 2147483647, %v1926_v61 }
0x1a53   :  { %v1939_v11 = vor.u32 1.1754944e-38, %v1938_v4  ;;  %vm1937_vm14 = vcmp.eq.f32.partialorder %v1936_v8, 8.507059e+37 }
0x1a57   :  { %v3919_v23 = vpop.eup %3918 }
0x1a58   :  { %v1928_v63 = vmul.f32 %v3919_v23, %v1926_v61  ;;  %vm1933_vm11 = vweird.f32 %v3919_v23 }
0x1a59   :  { %vm1934_vm13 = vmor %vm1932_vm12, %vm1933_vm11 }
0x1a5a   :  { %v1929_v3 = vsub.f32 1.0, %v1928_v63 }
0x1a5c   :  { %v1930_v13 = vmul.f32 %v3919_v23, %v1929_v3 }
0x1a5e   :  { %v1931_v16 = vadd.f32 %v3919_v23, %v1930_v13 }
0x1a60   :  { %v1935_v7 = vsel %vm1934_vm13, %v3919_v23, %v1931_v16 }
0x1a61   :  { %v1940_v14 = vsel %vm1937_vm14, %v1939_v11, %v1935_v7 }
0x1a62   :  { %v1946_v26 = vmul.f32 %v1944_v30, %v1940_v14 }
0x1aa7   :  { %v1949_v12 = vpop.permute.xlu2 %1948 }
0x1aa8   :  { %v1951_v25 = vmul.f32 %v1949_v12, %v1940_v14 }
0x1aaa   :  { %1953 = vrot.lane.b32.xlu1 %v1951_v25, %s4326_s24 }
0x1b1c   :  { %v1954_v15 = vpop.permute.xlu1 %1953 }
0x1b1d   :  { %v4774_v22 = vadd.f32 %v1954_v15, %v1946_v26 }
0x1b1f   :  { %3920 = vtanh.f32 %v4774_v22 }
0x1b25   :  { %v3921_v27 = vpop.eup %3920 }
0x1b26   :  { %1959 = vrot.lane.b32.xlu2 %v3921_v27, %s4325_s23 }
0x1b80   :  { %v1960_v21 = vpop.permute.xlu2 %1959 }
0x1b81   :  { %v1962_v31 = vmul.f32 %v1960_v21, %v1940_v14 }
0x1b83   :  { %1978 = vrot.lane.b32.xlu0 %v1962_v31, %s4326_s24 }
0x1bf5   :  { %v1979_v33 = vpop.permute.xlu0 %1978 }
0x1bf6   :  { %3634 = vmatmul.msk.f32.vlgmr.msra.gmra.mxu0 %vm223_vm2, %v1979_v33  ;;  %3635 = vmatmul.msk.f32.vlgmr.msrb.gmra.mxu1 %vm223_vm2, %v1979_v33 }
0x1c73   :  { %v2019_v41 = vpop.f32.mrf.mxu1 }
0x1c74   :  { %v4798_v39 = vadd.f32 %v2019_v41, %v1974_v28 }
0x1c76   :  { %3922 = vtanh.f32 %v4798_v39  ;;  %v2023_v47 = vand.u32 2147483647, %v4798_v39  ;;  %v3636_v40 = vmul.f32 -1.442695, %v4798_v39  ;;  %v2051_v58 = vsel %vm379_vm8, %v4798_v39, -inf }
0x1c77   :  { %v2030_v23 = vmax.f32 %v4798_v39, 0.0 }
0x1c78   :  { %v2024_v10 = vsub.f32 0.0, %v2023_v47  ;;  %3924 = vpow2.f32 %v3636_v40  ;;  %v3763_v40 = vld [vmem:[#allocation7] ss:$0 sm:$0xff] }
0x1c7a   :  { %v2025_v48 = vmul.f32 1.442695, %v2024_v10 }
0x1c7c   :  { %v3923_v59 = vpop.eup %3922  ;;  %3926 = vpow2.f32 %v2025_v48 }
0x1c7d   :  { %3639 = vmatmul.msk.f32.vlgmr.msrb.gmra.mxu2 %vm193_vm1, %v3923_v59  ;;  %v2080_v50 = vmul.f32 %v3923_v59, %v3923_v59 }
0x1c7e   :  { %v3925_v52 = vpop.eup %3924 }
0x1c7f   :  { %v2081_v53 = vsel %vm411_vm7, %v2080_v50, 0.0  ;;  %v2035_v54 = vadd.f32 1.0, %v3925_v52 }
0x1c80   :  { %2082 = vadd.xlane.f32.xlu2 %v2081_v53 }
0x1c81   :  { %3928 = vrcp.f32 %v2035_v54  ;;  %v2047_v8 = vand.u32 2147483648, %v2035_v54  ;;  %vm2041_vm3 = vweird.f32 %v2035_v54  ;;  %v2045_v7 = vand.u32 2147483647, %v2035_v54 }
0x1c82   :  { %v3927_v55 = vpop.eup %3926 }
0x1c83   :  { %v2027_v57 = vadd.f32 1.0, %v3927_v55  ;;  %v2048_v12 = vor.u32 1.1754944e-38, %v2047_v8  ;;  %vm2046_vm4 = vcmp.eq.f32.partialorder %v2045_v7, 8.507059e+37 }
0x1c85   :  { %3930 = vlog2.f32 %v2027_v57 }
0x1c87   :  { %v3929_v35 = vpop.eup %3928 }
0x1c88   :  { %2052 = vmax.xlane.f32.xlu2 %v2051_v58  ;;  %v2037_v63 = vmul.f32 %v3929_v35, %v2035_v54  ;;  %vm2042_vm15 = vweird.f32 %v3929_v35 }
0x1c89   :  { %vm2043_vm0 = vmor %vm2041_vm3, %vm2042_vm15 }
0x1c8a   :  { %v2038_v13 = vsub.f32 1.0, %v2037_v63 }
0x1c8b   :  { %v3931_v60 = vpop.eup %3930 }
0x1c8c   :  { %v2029_v61 = vmul.f32 0.6931472, %v3931_v60  ;;  %v2039_v16 = vmul.f32 %v3929_v35, %v2038_v13 }
0x1c8e   :  { %v4808_v3 = vadd.f32 %v2030_v23, %v2029_v61  ;;  %v2040_v4 = vadd.f32 %v3929_v35, %v2039_v16 }
0x1c90   :  { %2151 = vperm.xlu0 %3727, %v4808_v3   ;;  %v2044_v11 = vsel %vm2043_vm0, %v3929_v35, %v2040_v4 }
0x1c91   :  { %v2049_v14 = vsel %vm2046_vm4, %v2048_v12, %v2044_v11 }
0x1c92   :  { %v2185_v58 = vsub.f32 1.0, %v2049_v14 }
0x1c98   :  { %3730 = vset.pattern.permute.xlu0 %v4331_v9 }
0x1ca0   :  { %2181 = vperm.xlu2 %3728, %v2049_v14  }
0x1ca8   :  { %3733 = vset.pattern.permute.xlu2 %v4327_v46 }
0x1cf3   :  { %v2083_v25 = vpop.xlane.xlu2 %2082 }
0x1cf4   :  { %3932 = vrsqrt.f32 %v2083_v25  ;;  %vm2091_vm5 = vcmp.eq.f32.partialorder %v2083_v25, inf  ;;  %v2094_v19 = vand.u32 2147483648, %v2083_v25  ;;  %vm2093_vm9 = vcmp.eq.f32.partialorder %v2083_v25, 0.0 }
0x1cfa   :  { %v3933_v30 = vpop.eup %3932 }
0x1cfb   :  { %v2085_v26 = vmul.f32 %v3933_v30, %v2083_v25  ;;  %v2053_v13 = vpop.xlane.xlu2 %2052 }
0x1cfc   :  { %v2054_v16 = vsub.f32 %v4798_v39, %v2053_v13 }
0x1cfd   :  { %v2086_v15 = vmul.f32 %v3933_v30, %v2085_v26 }
0x1cfe   :  { %v2055_v4 = vmul.f32 1.442695, %v2054_v16 }
0x1cff   :  { %v2087_v27 = vmul.f32 0.5, %v2086_v15 }
0x1d00   :  { %v2140_v52 = vpop.f32.mrf.mxu2 }
0x1d01   :  { %v2088_v17 = vsub.f32 1.5, %v2087_v27 }
0x1d02   :  { %v2152_v54 = vpop.permute.xlu0 %2151 }
0x1d03   :  { %v2089_v18 = vmul.f32 %v3933_v30, %v2088_v17 }
0x1d05   :  { %v2090_v62 = vmul.f32 %v2089_v18, %v2083_v25 }
0x1d07   :  { %v2092_v44 = vsel %vm2091_vm5, %v2083_v25, %v2090_v62 }
0x1d08   :  { %v2095_v29 = vsel %vm2093_vm9, %v2094_v19, %v2092_v44  ;;  %v2182_v44 = vpop.permute.xlu2 %2181 }
0x1d09   :  { %v2096_v56 = vadd.f32 1e-08, %v2095_v29 }
0x1d0b   :  { %3934 = vrcp.f32 %v2096_v56  ;;  %v2108_v33 = vand.u32 2147483648, %v2096_v56  ;;  %v2106_v41 = vand.u32 2147483647, %v2096_v56  ;;  %vm2102_vm11 = vweird.f32 %v2096_v56 }
0x1d0d   :  { %v2109_v10 = vor.u32 1.1754944e-38, %v2108_v33  ;;  %vm2107_vm13 = vcmp.eq.f32.partialorder %v2106_v41, 8.507059e+37 }
0x1d11   :  { %v3935_v20 = vpop.eup %3934 }
0x1d12   :  { %v2098_v21 = vmul.f32 %v3935_v20, %v2096_v56  ;;  %vm2103_vm10 = vweird.f32 %v3935_v20 }
0x1d13   :  { %vm2104_vm12 = vmor %vm2102_vm11, %vm2103_vm10 }
0x1d14   :  { %v2099_v31 = vsub.f32 1.0, %v2098_v21 }
0x1d16   :  { %v2100_v28 = vmul.f32 %v3935_v20, %v2099_v31 }
0x1d18   :  { %v2101_v47 = vadd.f32 %v3935_v20, %v2100_v28 }
0x1d1a   :  { %v2105_v48 = vsel %vm2104_vm12, %v3935_v20, %v2101_v47 }
0x1d1b   :  { %v2110_v59 = vsel %vm2107_vm13, %v2109_v10, %v2105_v48 }
0x1d1c   :  { %v2147_v50 = vmul.f32 %v3763_v40, %v2110_v59 }
0x1d1e   :  { %v2148_v53 = vmul.f32 %v2147_v50, %v2140_v52 }
0x1d20   :  { %v2154_v55 = vmul.f32 %v2152_v54, %v2148_v53  ;;  %v2079_v54 = vadd.f32 1.0, %v4808_v3 }
0x1d22   :  { %v2155_v57 = vsel %vm411_vm7, %v2154_v55, -inf }
0x1d23   :  { %2156 = vmax.xlane.f32.xlu1 %v2155_v57 }
0x1d3c   :  { %2188 = vperm.xlu1 %3721, %v2185_v58  }
0x1d44   :  { %3729 = vset.pattern.permute.xlu1 %v4332_v0 }
0x1d96   :  { %v2157_v35 = vpop.xlane.xlu1 %2156 }
0x1d97   :  { %v2158_v60 = vsub.f32 %v2154_v55, %v2157_v35  ;;  %v4826_v55 = vpop.f32.mrf.mxu3 }
0x1d99   :  { %v2159_v61 = vmul.f32 1.442695, %v2158_v60 }
0x1d9b   :  { %3936 = vpow2.f32 %v2159_v61 }
0x1d9c   :  { %3938 = vpow2.f32 %v2055_v4 }
0x1da1   :  { %v3937_v23 = vpop.eup %3936 }
0x1da2   :  { %v2161_v63 = vsel %vm411_vm7, %v3937_v23, 0.0  ;;  %v3939_v8 = vpop.eup %3938 }
0x1da3   :  { %2162 = vadd.xlane.f32.xlu0 %v2161_v63 }
0x1dae   :  { %v2189_v18 = vpop.permute.xlu1 %2188 }
0x1daf   :  { %v2191_v56 = vmul.f32 %v2189_v18, %v4763_v43 }
0x1db7   :  { %2058 = vrot.lane.b32.xlu0 %v3939_v8, %s4329_s28 }
0x1e16   :  { %v2163_v7 = vpop.xlane.xlu0 %2162 }
0x1e17   :  { %3940 = vrcp.f32 %v2163_v7  ;;  %v2175_v25 = vand.u32 2147483648, %v2163_v7  ;;  %v2173_v26 = vand.u32 2147483647, %v2163_v7  ;;  %vm2169_vm15 = vweird.f32 %v2163_v7 }
0x1e19   :  { %v2176_v27 = vor.u32 1.1754944e-38, %v2175_v25  ;;  %vm2174_vm0 = vcmp.eq.f32.partialorder %v2173_v26, 8.507059e+37  ;;  %v2271_v26 = vld [vmem:[#allocation5 + $0x10] sm:$0xff] }
0x1e1a   :  { %2290 = vmatpush.msrb.mxu0 %v2271_v26  ;;  %2708 = vmatpush.msrb.mxu2 %v2271_v26 }
0x1e1d   :  { %v3941_v11 = vpop.eup %3940 }
0x1e1e   :  { %v2165_v12 = vmul.f32 %v3941_v11, %v2163_v7  ;;  %vm2170_vm14 = vweird.f32 %v3941_v11 }
0x1e1f   :  { %vm2171_vm3 = vmor %vm2169_vm15, %vm2170_vm14 }
0x1e20   :  { %v2166_v14 = vsub.f32 1.0, %v2165_v12 }
0x1e22   :  { %v2167_v30 = vmul.f32 %v3941_v11, %v2166_v14 }
0x1e24   :  { %v2168_v15 = vadd.f32 %v3941_v11, %v2167_v30 }
0x1e26   :  { %v2172_v17 = vsel %vm2171_vm3, %v3941_v11, %v2168_v15  ;;  %v2269_v15 = vld [vmem:[#allocation5] sm:$0xff] }
0x1e27   :  { %v2177_v62 = vsel %vm2174_vm0, %v2176_v27, %v2172_v17  ;;  %v2272_v27 = vld [vmem:[#allocation5 + $0x18] sm:$0xff]  ;;  %v2270_v17 = vld [vmem:[#allocation5 + $0x8] sm:$0xff]  ;;  %2291 = vmatpush.msrb.mxu0 %v2269_v15  ;;  %2709 = vmatpush.msrb.mxu2 %v2269_v15 }
0x1e28   :  { %v2178_v19 = vmul.f32 %v3937_v23, %v2177_v62  ;;  %2310 = vmatpush.msra.mxu1 %v2272_v27 }
0x1e29   :  { %v2059_v29 = vpop.permute.xlu0 %2058  ;;  %3647 = vmatpush.xpose.msk.msra.mxu0 %vm193_vm1, %v4784_v38 }
0x1e2a   :  { %v2061_v20 = vsel %vm390_vm6, %v2059_v29, 0.0  ;;  %v2184_v21 = vmul.f32 %v2182_v44, %v2178_v19  ;;  %2311 = vmatpush.msra.mxu1 %v2270_v17 }
0x1e2b   :  { %2062 = vadd.xlane.f32.xlu2 %v2061_v20 }
0x1e2c   :  { %v2192_v31 = vadd.f32 %v2191_v56, %v2184_v21 }
0x1e2d   :  { %3648 = vmatpush.xpose.msk.msra.mxu0 %vm193_vm1, %v4791_v34  ;;  %v1999_v34 = vpop.f32.mrf.mxu0 }
0x1e2e   :  { %3640 = vmatmul.msk.f32.vlgmr.msrb.gmra.mxu3 %vm193_vm1, %v2192_v31 }
0x1e2f   :  { %2728 = vmatpush.msrb.mxu3 %v2272_v27 }
0x1e31   :  { %2729 = vmatpush.msrb.mxu3 %v2270_v17 }
0x1e9e   :  { %v2063_v33 = vpop.xlane.xlu2 %2062 }
0x1e9f   :  { %3942 = vrcp.f32 %v2063_v33  ;;  %v2075_v40 = vand.u32 2147483648, %v2063_v33  ;;  %v2073_v48 = vand.u32 2147483647, %v2063_v33  ;;  %vm2069_vm5 = vweird.f32 %v2063_v33 }
0x1ea1   :  { %v2076_v50 = vor.u32 1.1754944e-38, %v2075_v40  ;;  %vm2074_vm10 = vcmp.eq.f32.partialorder %v2073_v48, 8.507059e+37 }
0x1ea5   :  { %v3943_v28 = vpop.eup %3942 }
0x1ea6   :  { %v2065_v41 = vmul.f32 %v3943_v28, %v2063_v33  ;;  %vm2070_vm4 = vweird.f32 %v3943_v28 }
0x1ea7   :  { %vm2071_vm9 = vmor %vm2069_vm5, %vm2070_vm4 }
0x1ea8   :  { %v2066_v47 = vsub.f32 1.0, %v2065_v41  ;;  %v1973_v41 = vperm.slane %v4795_v37, 0 }
0x1eaa   :  { %v2067_v10 = vmul.f32 %v3943_v28, %v2066_v47  ;;  %v2000_v47 = vadd.f32 %v1999_v34, %v1973_v41 }
0x1eac   :  { %v2068_v59 = vadd.f32 %v3943_v28, %v2067_v10  ;;  %v2332_v48 = vrot.slane %v2000_v47, 6 }
0x1eae   :  { %v2072_v43 = vsel %vm2071_vm9, %v3943_v28, %v2068_v59 }
0x1eaf   :  { %v2077_v52 = vsel %vm2074_vm10, %v2076_v50, %v2072_v43  ;;  %v3764_v50 = vld [vmem:[#allocation11] ss:$0 sm:$0xff] }
0x1eb0   :  { %v2078_v53 = vmul.f32 %v3939_v8, %v2077_v52 }
0x1eb1   :  { %v2215_v57 = vpop.f32.mrf.mxu3 }
0x1eb2   :  { %2220 = vperm.xlu0 %3730, %v2078_v53   ;;  %2231 = vperm.xlu1 %3729, %v2078_v53  }
0x1eba   :  { %3732 = vset.pattern.permute.xlu0 %v4334_v42  ;;  %3731 = vset.pattern.permute.xlu1 %v4333_v24 }
0x1ebb   :  { %2245 = vperm.xlu0 %3732, %v2079_v54   ;;  %2225 = vperm.xlu1 %3731, %v2078_v53  }
0x1ec3   :  { %3735 = vset.pattern.permute.xlu0 %v4328_v49  ;;  %3734 = vset.pattern.permute.xlu1 %v4328_v49 }
0x1f24   :  { %v2232_v58 = vpop.permute.xlu1 %2231  ;;  %v2221_v61 = vpop.permute.xlu0 %2220 }
0x1f25   :  { %v2234_v35 = vmul.f32 %v2232_v58, %v2215_v57  ;;  %v2223_v23 = vmul.f32 %v2221_v61, %v2215_v57 }
0x1f27   :  { %2236 = vrot.lane.b32.xlu1 %v2234_v35, %s4324_s8 }
0x1f2d   :  { %v2226_v60 = vpop.permute.xlu1 %2225  ;;  %v2246_v11 = vpop.permute.xlu0 %2245 }
0x1f2e   :  { %v2228_v3 = vmul.f32 %v2226_v60, %v2192_v31 }
0x1f30   :  { %v2229_v63 = vadd.f32 %v2228_v3, %v2223_v23 }
0x1f99   :  { %v2237_v13 = vpop.permute.xlu1 %2236 }
0x1f9a   :  { %v2239_v16 = vadd.f32 %v2237_v13, %v2229_v63 }
0x1f9c   :  { %v2240_v4 = vadd.f32 1e-08, %v2239_v16 }
0x1f9e   :  { %3944 = vlog2.f32 %v2240_v4 }
0x1fa4   :  { %v3945_v8 = vpop.eup %3944 }
0x1fa5   :  { %v2242_v7 = vmul.f32 0.6931472, %v3945_v8 }
0x1fa7   :  { %v2248_v12 = vmul.f32 %v2246_v11, %v2242_v7  ;;  %v2361_v11 = vrot.slane %v4774_v22, 6  ;;  %v4852_v22 = vld [vmem:[#allocation14] sm:$0x3] }
0x1fa9   :  { %v2249_v14 = vmul.f32 1.442695, %v2248_v12 }
0x1fab   :  { %3946 = vpow2.f32 %v2249_v14 }
0x1fb1   :  { %v3947_v25 = vpop.eup %3946 }
0x1fb2   :  { %v2251_v30 = vsel %vm411_vm7, %v3947_v25, 0.0 }
0x1fb3   :  { %2252 = vadd.xlane.f32.xlu1 %v2251_v30 }
0x2026   :  { %v2253_v18 = vpop.xlane.xlu1 %2252 }
0x2027   :  { %3948 = vrcp.f32 %v2253_v18  ;;  %v2265_v29 = vand.u32 2147483648, %v2253_v18  ;;  %v2263_v20 = vand.u32 2147483647, %v2253_v18  ;;  %vm2259_vm12 = vweird.f32 %v2253_v18 }
0x2029   :  { %v2266_v31 = vor.u32 1.1754944e-38, %v2265_v29  ;;  %vm2264_vm14 = vcmp.eq.f32.partialorder %v2263_v20, 8.507059e+37 }
0x202d   :  { %v3949_v62 = vpop.eup %3948 }
0x202e   :  { %v2255_v19 = vmul.f32 %v3949_v62, %v2253_v18  ;;  %vm2260_vm11 = vweird.f32 %v3949_v62  ;;  %v2391_v18 = vperm.slane %v4852_v22, 1 }
0x202f   :  { %vm2261_vm13 = vmor %vm2259_vm12, %vm2260_vm11 }
0x2030   :  { %v2256_v44 = vsub.f32 1.0, %v2255_v19 }
0x2032   :  { %v2257_v56 = vmul.f32 %v3949_v62, %v2256_v44 }
0x2034   :  { %v2258_v21 = vadd.f32 %v3949_v62, %v2257_v56 }
0x2036   :  { %v2262_v33 = vsel %vm2261_vm13, %v3949_v62, %v2258_v21 }
0x2037   :  { %v2267_v38 = vsel %vm2264_vm14, %v2266_v31, %v2262_v33 }
0x2038   :  { %v4834_v28 = vmul.f32 %v3947_v25, %v2267_v38 }
0x203a   :  { %3641 = vmatmul.msk.f32.vlgmr.msrb.gmra.mxu0 %vm193_vm1, %v4834_v28  ;;  %3642 = vmatmul.msk.f32.vlgmr.msra.gmra.mxu1 %vm193_vm1, %v4834_v28 }
0x20b7   :  { %v2293_v40 = vpop.f32.mrf.mxu0 }
0x20b8   :  { %v2328_v10 = vrot.slane %v2293_v40, 6 }
0x20ba   :  { %v2330_v59 = vadd.f32 %v2328_v10, %v4583_v45 }
0x20bc   :  { %v2334_v43 = vadd.f32 %v2332_v48, %v2330_v59 }
0x20be   :  { %v2339_v52 = vadd.f32 %v3764_v50, %v2334_v43 }
0x20c0   :  { %3950 = vtanh.f32 %v2339_v52  ;;  %v3643_v54 = vmul.f32 -1.442695, %v2339_v52 }
0x20c2   :  { %3952 = vpow2.f32 %v3643_v54 }
0x20c6   :  { %v3951_v53 = vpop.eup %3950 }
0x20c7   :  { %2365 = vrot.lane.b32.xlu0 %v3951_v53, %s4325_s23 }
0x20c8   :  { %v3953_v57 = vpop.eup %3952 }
0x20c9   :  { %v2343_v58 = vadd.f32 1.0, %v3953_v57 }
0x20cb   :  { %3954 = vrcp.f32 %v2343_v58  ;;  %v2355_v23 = vand.u32 2147483648, %v2343_v58  ;;  %vm2349_vm3 = vweird.f32 %v2343_v58  ;;  %v2353_v63 = vand.u32 2147483647, %v2343_v58 }
0x20cd   :  { %v2356_v16 = vor.u32 1.1754944e-38, %v2355_v23  ;;  %vm2354_vm4 = vcmp.eq.f32.partialorder %v2353_v63, 8.507059e+37 }
0x20d1   :  { %v3955_v35 = vpop.eup %3954 }
0x20d2   :  { %v2345_v37 = vmul.f32 %v3955_v35, %v2343_v58  ;;  %vm2350_vm15 = vweird.f32 %v3955_v35 }
0x20d3   :  { %vm2351_vm0 = vmor %vm2349_vm3, %vm2350_vm15 }
0x20d4   :  { %v2346_v60 = vsub.f32 1.0, %v2345_v37 }
0x20d6   :  { %v2347_v61 = vmul.f32 %v3955_v35, %v2346_v60 }
0x20d8   :  { %v2348_v3 = vadd.f32 %v3955_v35, %v2347_v61 }
0x20da   :  { %v2352_v13 = vsel %vm2351_vm0, %v3955_v35, %v2348_v3 }
0x20db   :  { %v2357_v8 = vsel %vm2354_vm4, %v2356_v16, %v2352_v13 }
0x20dc   :  { %v2363_v12 = vmul.f32 %v2361_v11, %v2357_v8 }
0x2139   :  { %v2366_v4 = vpop.permute.xlu0 %2365 }
0x213a   :  { %v2368_v7 = vmul.f32 %v2366_v4, %v2357_v8 }
0x213c   :  { %2370 = vrot.lane.b32.xlu2 %v2368_v7, %s4326_s24 }
0x2196   :  { %v2371_v14 = vpop.permute.xlu2 %2370 }
0x2197   :  { %v4845_v25 = vadd.f32 %v2371_v14, %v2363_v12 }
0x2199   :  { %3956 = vtanh.f32 %v4845_v25 }
0x219f   :  { %v3957_v30 = vpop.eup %3956 }
0x21a0   :  { %2376 = vrot.lane.b32.xlu0 %v3957_v30, %s4325_s23 }
0x2212   :  { %v2377_v26 = vpop.permute.xlu0 %2376 }
0x2213   :  { %v2379_v15 = vmul.f32 %v2377_v26, %v2357_v8 }
0x2215   :  { %v2395_v27 = vrot.slane %v2379_v15, 2 }
0x2217   :  { %2396 = vrot.lane.b32.xlu0 %v2395_v27, %s4326_s24 }
0x2289   :  { %v2397_v17 = vpop.permute.xlu0 %2396 }
0x228a   :  { %3644 = vmatmul.msk.f32.vlgmr.msra.gmra.mxu2 %vm223_vm2, %v2397_v17  ;;  %3645 = vmatmul.msk.f32.vlgmr.msra.gmra.mxu3 %vm223_vm2, %v2397_v17 }
0x230d   :  { %v2437_v62 = vpop.f32.mrf.mxu3 }
0x230e   :  { %v4855_v19 = vadd.f32 %v2437_v62, %v2391_v18 }
0x2310   :  { %3958 = vtanh.f32 %v4855_v19  ;;  %v2441_v44 = vand.u32 2147483647, %v4855_v19  ;;  %v3646_v29 = vmul.f32 -1.442695, %v4855_v19  ;;  %v2448_v43 = vmax.f32 %v4855_v19, 0.0 }
0x2311   :  { %v2469_v23 = vsel %vm379_vm8, %v4855_v19, -inf }
0x2312   :  { %v2442_v56 = vsub.f32 0.0, %v2441_v44  ;;  %3960 = vpow2.f32 %v3646_v29 }
0x2314   :  { %v2443_v20 = vmul.f32 1.442695, %v2442_v56 }
0x2316   :  { %v3959_v21 = vpop.eup %3958  ;;  %3962 = vpow2.f32 %v2443_v20  ;;  %v3765_v20 = vld [vmem:[#allocation7] ss:$0 sm:$0xff] }
0x2317   :  { %3649 = vmatmul.msk.f32.vlgmr.msra.gmra.mxu0 %vm193_vm1, %v3959_v21  ;;  %v2498_v31 = vmul.f32 %v3959_v21, %v3959_v21 }
0x2318   :  { %v3961_v33 = vpop.eup %3960 }
0x2319   :  { %v2499_v38 = vsel %vm411_vm7, %v2498_v31, 0.0  ;;  %v2453_v34 = vadd.f32 1.0, %v3961_v33 }
0x231a   :  { %2500 = vadd.xlane.f32.xlu0 %v2499_v38 }
0x231b   :  { %3964 = vrcp.f32 %v2453_v34  ;;  %v2465_v52 = vand.u32 2147483648, %v2453_v34  ;;  %v2463_v54 = vand.u32 2147483647, %v2453_v34  ;;  %vm2459_vm9 = vweird.f32 %v2453_v34 }
0x231c   :  { %v3963_v41 = vpop.eup %3962 }
0x231d   :  { %v2445_v47 = vadd.f32 1.0, %v3963_v41  ;;  %v2466_v35 = vor.u32 1.1754944e-38, %v2465_v52  ;;  %vm2464_vm11 = vcmp.eq.f32.partialorder %v2463_v54, 8.507059e+37 }
0x231f   :  { %3966 = vlog2.f32 %v2445_v47 }
0x2321   :  { %v3965_v40 = vpop.eup %3964 }
0x2322   :  { %v2455_v10 = vmul.f32 %v3965_v40, %v2453_v34  ;;  %vm2460_vm5 = vweird.f32 %v3965_v40 }
0x2323   :  { %vm2461_vm10 = vmor %vm2459_vm9, %vm2460_vm5 }
0x2324   :  { %v2456_v59 = vsub.f32 1.0, %v2455_v10 }
0x2325   :  { %v3967_v48 = vpop.eup %3966 }
0x2326   :  { %v2447_v50 = vmul.f32 0.6931472, %v3967_v48  ;;  %v2457_v53 = vmul.f32 %v3965_v40, %v2456_v59 }
0x2328   :  { %v2449_v57 = vadd.f32 %v2448_v43, %v2447_v50  ;;  %v2458_v58 = vadd.f32 %v3965_v40, %v2457_v53 }
0x232a   :  { %2569 = vperm.xlu2 %3733, %v2449_v57   ;;  %v2462_v37 = vsel %vm2461_vm10, %v3965_v40, %v2458_v58  ;;  %v2497_v3 = vadd.f32 1.0, %v2449_v57 }
0x232b   :  { %v2467_v60 = vsel %vm2464_vm11, %v2466_v35, %v2462_v37  ;;  %v4876_v35 = vld [vmem:[%s5072_s10 + $0x8] sm:$0xff]  ;;  %v2611_v37 = vld [vmem:[%s5072_s10] sm:$0xff] }
0x232c   :  { %v2603_v61 = vsub.f32 1.0, %v2467_v60  ;;  %2630 = vmatpush.msrb.mxu1 %v4876_v35  ;;  %3048 = vmatpush.msra.mxu3 %v4876_v35 }
0x232e   :  { %2606 = vperm.xlu0 %3735, %v2603_v61   ;;  %2631 = vmatpush.msrb.mxu1 %v2611_v37 }
0x232f   :  { %3049 = vmatpush.msra.mxu3 %v2611_v37 }
0x2332   :  { %3737 = vset.pattern.permute.xlu2 %v4331_v9 }
0x2336   :  { %3739 = vset.pattern.permute.xlu0 %v4334_v42 }
0x2337   :  { %2663 = vperm.xlu0 %3739, %v2497_v3  }
0x233f   :  { %3742 = vset.pattern.permute.xlu0 %v4328_v49 }
0x2353   :  { %2470 = vmax.xlane.f32.xlu2 %v2469_v23 }
0x2384   :  { %v2570_v47 = vpop.permute.xlu2 %2569 }
0x238d   :  { %v2501_v63 = vpop.xlane.xlu0 %2500 }
0x238e   :  { %3968 = vrsqrt.f32 %v2501_v63  ;;  %vm2509_vm12 = vcmp.eq.f32.partialorder %v2501_v63, inf  ;;  %v2512_v14 = vand.u32 2147483648, %v2501_v63  ;;  %vm2511_vm13 = vcmp.eq.f32.partialorder %v2501_v63, 0.0 }
0x2394   :  { %v3969_v13 = vpop.eup %3968  ;;  %v2558_v34 = vpop.f32.mrf.mxu0 }
0x2395   :  { %v2503_v16 = vmul.f32 %v3969_v13, %v2501_v63 }
0x2397   :  { %v2504_v4 = vmul.f32 %v3969_v13, %v2503_v16 }
0x2399   :  { %v2505_v8 = vmul.f32 0.5, %v2504_v4 }
0x239b   :  { %v2506_v7 = vsub.f32 1.5, %v2505_v8 }
0x239d   :  { %v2507_v11 = vmul.f32 %v3969_v13, %v2506_v7 }
0x239f   :  { %v2508_v12 = vmul.f32 %v2507_v11, %v2501_v63 }
0x23a1   :  { %v2510_v30 = vsel %vm2509_vm12, %v2501_v63, %v2508_v12  ;;  %v2607_v12 = vpop.permute.xlu0 %2606 }
0x23a2   :  { %v2513_v26 = vsel %vm2511_vm13, %v2512_v14, %v2510_v30 }
0x23a3   :  { %v2514_v15 = vadd.f32 1e-08, %v2513_v26  ;;  %v2609_v26 = vmul.f32 %v2607_v12, %v4834_v28 }
0x23a5   :  { %3970 = vrcp.f32 %v2514_v15  ;;  %v2526_v62 = vand.u32 2147483648, %v2514_v15  ;;  %v2524_v29 = vand.u32 2147483647, %v2514_v15  ;;  %vm2520_vm15 = vweird.f32 %v2514_v15 }
0x23a7   :  { %v2527_v21 = vor.u32 1.1754944e-38, %v2526_v62  ;;  %vm2525_vm0 = vcmp.eq.f32.partialorder %v2524_v29, 8.507059e+37 }
0x23ab   :  { %v3971_v27 = vpop.eup %3970 }
0x23ac   :  { %v2516_v17 = vmul.f32 %v3971_v27, %v2514_v15  ;;  %vm2521_vm14 = vweird.f32 %v3971_v27 }
0x23ad   :  { %vm2522_vm3 = vmor %vm2520_vm15, %vm2521_vm14 }
0x23ae   :  { %v2517_v18 = vsub.f32 1.0, %v2516_v17 }
0x23b0   :  { %v2518_v44 = vmul.f32 %v3971_v27, %v2517_v18 }
0x23b2   :  { %v2519_v56 = vadd.f32 %v3971_v27, %v2518_v44 }
0x23b4   :  { %v2523_v31 = vsel %vm2522_vm3, %v3971_v27, %v2519_v56 }
0x23b5   :  { %v2528_v33 = vsel %vm2525_vm0, %v2527_v21, %v2523_v31 }
0x23b6   :  { %v2565_v38 = vmul.f32 %v3765_v20, %v2528_v33 }
0x23b8   :  { %v2566_v41 = vmul.f32 %v2565_v38, %v2558_v34 }
0x23ba   :  { %v2572_v40 = vmul.f32 %v2570_v47, %v2566_v41  ;;  %v4889_v47 = vpop.f32.mrf.mxu1 }
0x23bc   :  { %v2573_v10 = vsel %vm411_vm7, %v2572_v40, -inf }
0x23bd   :  { %2574 = vmax.xlane.f32.xlu1 %v2573_v10 }
0x23c6   :  { %v2471_v53 = vpop.xlane.xlu2 %2470 }
0x23c7   :  { %v2472_v54 = vsub.f32 %v4855_v19, %v2471_v53 }
0x23c9   :  { %v2473_v57 = vmul.f32 1.442695, %v2472_v54 }
0x2430   :  { %v2575_v48 = vpop.xlane.xlu1 %2574 }
0x2431   :  { %v2576_v59 = vsub.f32 %v2572_v40, %v2575_v48 }
0x2433   :  { %v2577_v50 = vmul.f32 1.442695, %v2576_v59 }
0x2435   :  { %3972 = vpow2.f32 %v2577_v50 }
0x2436   :  { %3974 = vpow2.f32 %v2473_v57 }
0x243b   :  { %v3973_v43 = vpop.eup %3972 }
0x243c   :  { %v2579_v52 = vsel %vm411_vm7, %v3973_v43, 0.0  ;;  %v3975_v58 = vpop.eup %3974 }
0x243d   :  { %2580 = vadd.xlane.f32.xlu1 %v2579_v52 }
0x2456   :  { %2599 = vperm.xlu1 %3734, %v2467_v60  }
0x245e   :  { %2476 = vrot.lane.b32.xlu1 %v3975_v58, %s4329_s28 }
0x245f   :  { %3736 = vset.pattern.permute.xlu1 %v4332_v0 }
0x24b0   :  { %v2581_v60 = vpop.xlane.xlu1 %2580 }
0x24b1   :  { %3976 = vrcp.f32 %v2581_v60  ;;  %v2593_v16 = vand.u32 2147483648, %v2581_v60  ;;  %vm2587_vm5 = vweird.f32 %v2581_v60  ;;  %v2591_v4 = vand.u32 2147483647, %v2581_v60 }
0x24b3   :  { %v2594_v7 = vor.u32 1.1754944e-38, %v2593_v16  ;;  %vm2592_vm10 = vcmp.eq.f32.partialorder %v2591_v4, 8.507059e+37 }
0x24b7   :  { %v3977_v61 = vpop.eup %3976 }
0x24b8   :  { %v2583_v3 = vmul.f32 %v3977_v61, %v2581_v60  ;;  %vm2588_vm4 = vweird.f32 %v3977_v61 }
0x24b9   :  { %vm2589_vm9 = vmor %vm2587_vm5, %vm2588_vm4 }
0x24ba   :  { %v2584_v23 = vsub.f32 1.0, %v2583_v3 }
0x24bc   :  { %v2585_v63 = vmul.f32 %v3977_v61, %v2584_v23 }
0x24be   :  { %v2586_v13 = vadd.f32 %v3977_v61, %v2585_v63 }
0x24c0   :  { %v2590_v8 = vsel %vm2589_vm9, %v3977_v61, %v2586_v13  ;;  %v2664_v61 = vpop.permute.xlu0 %2663 }
0x24c1   :  { %v2595_v11 = vsel %vm2592_vm10, %v2594_v7, %v2590_v8 }
0x24c2   :  { %v2596_v14 = vmul.f32 %v3973_v43, %v2595_v11 }
0x24c8   :  { %v2600_v30 = vpop.permute.xlu1 %2599 }
0x24c9   :  { %v2602_v15 = vmul.f32 %v2600_v30, %v2596_v14 }
0x24cb   :  { %v2610_v27 = vadd.f32 %v2609_v26, %v2602_v15 }
0x24cd   :  { %3650 = vmatmul.msk.f32.vlgmr.msrb.gmra.mxu1 %vm193_vm1, %v2610_v27 }
0x24d0   :  { %v2477_v17 = vpop.permute.xlu1 %2476 }
0x24d1   :  { %v2479_v18 = vsel %vm390_vm6, %v2477_v17, 0.0 }
0x24d2   :  { %2480 = vadd.xlane.f32.xlu2 %v2479_v18  ;;  %v2417_v18 = vpop.f32.mrf.mxu2 }
0x2545   :  { %v2481_v62 = vpop.xlane.xlu2 %2480 }
0x2546   :  { %3978 = vrcp.f32 %v2481_v62  ;;  %v2493_v20 = vand.u32 2147483648, %v2481_v62  ;;  %v2491_v31 = vand.u32 2147483647, %v2481_v62  ;;  %vm2487_vm12 = vweird.f32 %v2481_v62 }
0x2548   :  { %v2494_v28 = vor.u32 1.1754944e-38, %v2493_v20  ;;  %vm2492_vm14 = vcmp.eq.f32.partialorder %v2491_v31, 8.507059e+37  ;;  %v3766_v31 = vld [vmem:[#allocation11] ss:$0 sm:$0xff] }
0x254a   :  { %v2633_v40 = vpop.f32.mrf.mxu1 }
0x254c   :  { %v3979_v44 = vpop.eup %3978 }
0x254d   :  { %v2483_v29 = vmul.f32 %v3979_v44, %v2481_v62  ;;  %vm2488_vm11 = vweird.f32 %v3979_v44  ;;  %v2390_v62 = vperm.slane %v4852_v22, 0 }
0x254e   :  { %vm2489_vm13 = vmor %vm2487_vm12, %vm2488_vm11 }
0x254f   :  { %v2484_v56 = vsub.f32 1.0, %v2483_v29 }
0x2551   :  { %v2485_v21 = vmul.f32 %v3979_v44, %v2484_v56 }
0x2553   :  { %v2486_v33 = vadd.f32 %v3979_v44, %v2485_v21 }
0x2555   :  { %v2490_v38 = vsel %vm2489_vm13, %v3979_v44, %v2486_v33  ;;  %v2418_v44 = vadd.f32 %v2417_v18, %v2390_v62  ;;  %v2948_v18 = vld [vmem:[%s5064_s2] sm:$0xff]  ;;  %v4921_v62 = vld [vmem:[#allocation14] sm:$0x3] }
0x2556   :  { %v2495_v34 = vsel %vm2492_vm14, %v2494_v28, %v2490_v38 }
0x2557   :  { %v2496_v41 = vmul.f32 %v3975_v58, %v2495_v34  ;;  %v2750_v20 = vrot.slane %v2418_v44, 4  ;;  %v2809_v44 = vperm.slane %v4921_v62, 1 }
0x2559   :  { %2638 = vperm.xlu2 %3737, %v2496_v41   ;;  %2649 = vperm.xlu1 %3736, %v2496_v41  }
0x2561   :  { %3738 = vset.pattern.permute.xlu1 %v4333_v24  ;;  %3740 = vset.pattern.permute.xlu2 %v4327_v46 }
0x2562   :  { %2643 = vperm.xlu1 %3738, %v2496_v41  }
0x256a   :  { %3741 = vset.pattern.permute.xlu1 %v4328_v49 }
0x25b3   :  { %v2639_v50 = vpop.permute.xlu2 %2638 }
0x25b4   :  { %v2641_v52 = vmul.f32 %v2639_v50, %v2633_v40 }
0x25cb   :  { %v2650_v10 = vpop.permute.xlu1 %2649 }
0x25cc   :  { %v2652_v48 = vmul.f32 %v2650_v10, %v2633_v40 }
0x25ce   :  { %2654 = vrot.lane.b32.xlu1 %v2652_v48, %s4324_s8 }
0x25d4   :  { %v2644_v59 = vpop.permute.xlu1 %2643 }
0x25d5   :  { %v2646_v43 = vmul.f32 %v2644_v59, %v2610_v27 }
0x25d7   :  { %v2647_v53 = vadd.f32 %v2646_v43, %v2641_v52 }
0x2640   :  { %v2655_v54 = vpop.permute.xlu1 %2654 }
0x2641   :  { %v2657_v57 = vadd.f32 %v2655_v54, %v2647_v53 }
0x2643   :  { %v2658_v58 = vadd.f32 1e-08, %v2657_v57 }
0x2645   :  { %3980 = vlog2.f32 %v2658_v58 }
0x264b   :  { %v3981_v37 = vpop.eup %3980 }
0x264c   :  { %v2660_v60 = vmul.f32 0.6931472, %v3981_v37 }
0x264e   :  { %v2666_v3 = vmul.f32 %v2664_v61, %v2660_v60  ;;  %v2779_v60 = vrot.slane %v4845_v25, 6  ;;  %v2799_v25 = vld [vmem:[#allocation13 + $0x8] sm:$0xff] }
0x2650   :  { %v2667_v23 = vmul.f32 1.442695, %v2666_v3 }
0x2652   :  { %3982 = vpow2.f32 %v2667_v23 }
0x2658   :  { %v3983_v63 = vpop.eup %3982 }
0x2659   :  { %v2669_v13 = vsel %vm411_vm7, %v3983_v63, 0.0 }
0x265a   :  { %2670 = vadd.xlane.f32.xlu1 %v2669_v13  ;;  %v2805_v13 = vld [vmem:[#allocation13 + $0x38] sm:$0xff] }
0x265b   :  { %2850 = vmatpush.msra.mxu1 %v2805_v13 }
0x26cd   :  { %v2671_v16 = vpop.xlane.xlu1 %2670 }
0x26ce   :  { %3984 = vrcp.f32 %v2671_v16  ;;  %v2683_v11 = vand.u32 2147483648, %v2671_v16  ;;  %v2681_v14 = vand.u32 2147483647, %v2671_v16  ;;  %vm2677_vm3 = vweird.f32 %v2671_v16 }
0x26d0   :  { %v2684_v26 = vor.u32 1.1754944e-38, %v2683_v11  ;;  %vm2682_vm4 = vcmp.eq.f32.partialorder %v2681_v14, 8.507059e+37  ;;  %v2800_v11 = vld [vmem:[#allocation13 + $0x10] sm:$0xff] }
0x26d4   :  { %v3985_v4 = vpop.eup %3984 }
0x26d5   :  { %v2673_v8 = vmul.f32 %v3985_v4, %v2671_v16  ;;  %vm2678_vm15 = vweird.f32 %v3985_v4  ;;  %v2804_v16 = vld [vmem:[#allocation13 + $0x30] sm:$0xff] }
0x26d6   :  { %vm2679_vm0 = vmor %vm2677_vm3, %vm2678_vm15  ;;  %2830 = vmatpush.msrb.mxu0 %v2804_v16 }
0x26d7   :  { %v2674_v7 = vsub.f32 1.0, %v2673_v8  ;;  %v2802_v8 = vld [vmem:[#allocation13 + $0x20] sm:$0xff] }
0x26d8   :  { %2831 = vmatpush.msrb.mxu0 %v2802_v8 }
0x26d9   :  { %v2675_v12 = vmul.f32 %v3985_v4, %v2674_v7  ;;  %v2801_v7 = vld [vmem:[#allocation13 + $0x18] sm:$0xff] }
0x26da   :  { %2832 = vmatpush.msrb.mxu0 %v2800_v11 }
0x26db   :  { %v2676_v30 = vadd.f32 %v3985_v4, %v2675_v12  ;;  %v2798_v12 = vld [vmem:[#allocation13] sm:$0xff] }
0x26dc   :  { %2833 = vmatpush.msrb.mxu0 %v2798_v12 }
0x26dd   :  { %v2680_v15 = vsel %vm2679_vm0, %v3985_v4, %v2676_v30  ;;  %v2803_v4 = vld [vmem:[#allocation13 + $0x28] sm:$0xff] }
0x26de   :  { %v2685_v27 = vsel %vm2682_vm4, %v2684_v26, %v2680_v15  ;;  %2851 = vmatpush.msra.mxu1 %v2803_v4 }
0x26df   :  { %v4893_v17 = vmul.f32 %v3983_v63, %v2685_v27  ;;  %v2949_v27 = vld [vmem:[%s5064_s2 + $0x8] sm:$0xff]  ;;  %s4335_s2 = smov 6  }
0x26e0   :  { %2852 = vmatpush.msra.mxu1 %v2801_v7  ;;  %3657 = vmatpush.xpose.msk.msra.mxu2 %vm193_vm1, %v2949_v27 }
0x26e1   :  { %3651 = vmatmul.msk.f32.vlgmr.msrb.gmra.mxu2 %vm193_vm1, %v4893_v17  ;;  %3652 = vmatmul.msk.f32.vlgmr.msrb.gmra.mxu3 %vm193_vm1, %v4893_v17 }
0x26e2   :  { %2853 = vmatpush.msra.mxu1 %v2799_v25  ;;  %3666 = vmatpush.xpose.msk.msrb.mxu3 %vm193_vm1, %v2949_v27 }
0x26e4   :  { %3658 = vmatpush.xpose.msk.msra.mxu2 %vm193_vm1, %v2948_v18 }
0x26e6   :  { %3667 = vmatpush.xpose.msk.msrb.mxu3 %vm193_vm1, %v2948_v18 }
0x26e8   :  { %3242 = vmatpush.msrb.mxu2 %v2805_v13 }
0x26ea   :  { %3243 = vmatpush.msrb.mxu2 %v2803_v4 }
0x26ec   :  { %3244 = vmatpush.msrb.mxu2 %v2801_v7 }
0x26ee   :  { %3245 = vmatpush.msrb.mxu2 %v2799_v25 }
0x2764   :  { %v2711_v29 = vpop.f32.mrf.mxu2 }
0x2765   :  { %v2746_v56 = vrot.slane %v2711_v29, 4 }
0x2767   :  { %v2748_v21 = vadd.f32 %v2746_v56, %v4583_v45 }
0x2769   :  { %v2752_v33 = vadd.f32 %v2750_v20, %v2748_v21 }
0x276b   :  { %v2757_v28 = vadd.f32 %v3766_v31, %v2752_v33 }
0x276d   :  { %3986 = vtanh.f32 %v2757_v28  ;;  %v3653_v34 = vmul.f32 -1.442695, %v2757_v28 }
0x276f   :  { %3988 = vpow2.f32 %v3653_v34 }
0x2773   :  { %v3987_v38 = vpop.eup %3986 }
0x2774   :  { %2783 = vrot.lane.b32.xlu2 %v3987_v38, %s4325_s23 }
0x2775   :  { %v3989_v41 = vpop.eup %3988 }
0x2776   :  { %v2761_v40 = vadd.f32 1.0, %v3989_v41 }
0x2778   :  { %3990 = vrcp.f32 %v2761_v40  ;;  %v2773_v43 = vand.u32 2147483648, %v2761_v40  ;;  %vm2767_vm9 = vweird.f32 %v2761_v40  ;;  %v2771_v52 = vand.u32 2147483647, %v2761_v40 }
0x277a   :  { %v2774_v54 = vor.u32 1.1754944e-38, %v2773_v43  ;;  %vm2772_vm11 = vcmp.eq.f32.partialorder %v2771_v52, 8.507059e+37 }
0x277e   :  { %v3991_v10 = vpop.eup %3990 }
0x277f   :  { %v2763_v22 = vmul.f32 %v3991_v10, %v2761_v40  ;;  %vm2768_vm5 = vweird.f32 %v3991_v10 }
0x2780   :  { %vm2769_vm10 = vmor %vm2767_vm9, %vm2768_vm5 }
0x2781   :  { %v2764_v48 = vsub.f32 1.0, %v2763_v22 }
0x2783   :  { %v2765_v59 = vmul.f32 %v3991_v10, %v2764_v48 }
0x2785   :  { %v2766_v50 = vadd.f32 %v3991_v10, %v2765_v59 }
0x2787   :  { %v2770_v53 = vsel %vm2769_vm10, %v3991_v10, %v2766_v50 }
0x2788   :  { %v2775_v58 = vsel %vm2772_vm11, %v2774_v54, %v2770_v53 }
0x2789   :  { %v2781_v61 = vmul.f32 %v2779_v60, %v2775_v58 }
0x27ce   :  { %v2784_v57 = vpop.permute.xlu2 %2783 }
0x27cf   :  { %v2786_v37 = vmul.f32 %v2784_v57, %v2775_v58 }
0x27d1   :  { %2788 = vrot.lane.b32.xlu2 %v2786_v37, %s4326_s24 }
0x282b   :  { %v2789_v3 = vpop.permute.xlu2 %2788 }
0x282c   :  { %v4904_v23 = vadd.f32 %v2789_v3, %v2781_v61 }
0x282e   :  { %3992 = vtanh.f32 %v4904_v23 }
0x2834   :  { %v3993_v63 = vpop.eup %3992 }
0x2835   :  { %2794 = vrot.lane.b32.xlu0 %v3993_v63, %s4325_s23 }
0x28a7   :  { %v2795_v14 = vpop.permute.xlu0 %2794 }
0x28a8   :  { %v2797_v30 = vmul.f32 %v2795_v14, %v2775_v58 }
0x28aa   :  { %v2813_v26 = vrot.slane %v2797_v30, 4 }
0x28ac   :  { %2814 = vrot.lane.b32.xlu2 %v2813_v26, %s4326_s24 }
0x2906   :  { %v2815_v15 = vpop.permute.xlu2 %2814 }
0x2907   :  { %3654 = vmatmul.msk.f32.vlgmr.msrb.gmra.mxu0 %vm223_vm2, %v2815_v15  ;;  %3655 = vmatmul.msk.f32.vlgmr.msra.gmra.mxu1 %vm223_vm2, %v2815_v15 }
0x2984   :  { %v2855_v29 = vpop.f32.mrf.mxu1 }
0x2985   :  { %v4924_v56 = vadd.f32 %v2855_v29, %v2809_v44 }
0x2987   :  { %3994 = vtanh.f32 %v4924_v56  ;;  %v2887_v20 = vsel %vm379_vm8, %v4924_v56, -inf  ;;  %v2859_v21 = vand.u32 2147483647, %v4924_v56  ;;  %v3656_v31 = vmul.f32 -1.442695, %v4924_v56 }
0x2988   :  { %2888 = vmax.xlane.f32.xlu1 %v2887_v20  ;;  %v2866_v54 = vmax.f32 %v4924_v56, 0.0 }
0x2989   :  { %v2860_v33 = vsub.f32 0.0, %v2859_v21  ;;  %3996 = vpow2.f32 %v3656_v31 }
0x298b   :  { %v2861_v28 = vmul.f32 1.442695, %v2860_v33 }
0x298d   :  { %v3995_v38 = vpop.eup %3994  ;;  %3998 = vpow2.f32 %v2861_v28 }
0x298e   :  { %3659 = vmatmul.msk.f32.vlgmr.msra.gmra.mxu2 %vm193_vm1, %v3995_v38  ;;  %v2916_v34 = vmul.f32 %v3995_v38, %v3995_v38  ;;  %v3767_v38 = vld [vmem:[#allocation7] ss:$0 sm:$0xff] }
0x298f   :  { %v3997_v41 = vpop.eup %3996 }
0x2990   :  { %v2917_v40 = vsel %vm411_vm7, %v2916_v34, 0.0  ;;  %v2871_v10 = vadd.f32 1.0, %v3997_v41 }
0x2991   :  { %2918 = vadd.xlane.f32.xlu0 %v2917_v40 }
0x2992   :  { %4000 = vrcp.f32 %v2871_v10  ;;  %v2883_v57 = vand.u32 2147483648, %v2871_v10  ;;  %v2881_v37 = vand.u32 2147483647, %v2871_v10  ;;  %vm2877_vm13 = vweird.f32 %v2871_v10 }
0x2993   :  { %v3999_v22 = vpop.eup %3998 }
0x2994   :  { %v2863_v48 = vadd.f32 1.0, %v3999_v22  ;;  %v2884_v3 = vor.u32 1.1754944e-38, %v2883_v57  ;;  %vm2882_vm15 = vcmp.eq.f32.partialorder %v2881_v37, 8.507059e+37 }
0x2996   :  { %4002 = vlog2.f32 %v2863_v48 }
0x2998   :  { %v4001_v59 = vpop.eup %4000 }
0x2999   :  { %v2873_v50 = vmul.f32 %v4001_v59, %v2871_v10  ;;  %vm2878_vm12 = vweird.f32 %v4001_v59 }
0x299a   :  { %vm2879_vm14 = vmor %vm2877_vm13, %vm2878_vm12 }
0x299b   :  { %v2874_v52 = vsub.f32 1.0, %v2873_v50 }
0x299c   :  { %v4003_v43 = vpop.eup %4002 }
0x299d   :  { %v2865_v53 = vmul.f32 0.6931472, %v4003_v43  ;;  %v2875_v58 = vmul.f32 %v4001_v59, %v2874_v52 }
0x299f   :  { %v4934_v60 = vadd.f32 %v2866_v54, %v2865_v53  ;;  %v2876_v61 = vadd.f32 %v4001_v59, %v2875_v58 }
0x29a1   :  { %2987 = vperm.xlu2 %3740, %v4934_v60   ;;  %v2880_v63 = vsel %vm2879_vm14, %v4001_v59, %v2876_v61 }
0x29a2   :  { %v2885_v13 = vsel %vm2882_vm15, %v2884_v3, %v2880_v63 }
0x29a3   :  { %v3021_v16 = vsub.f32 1.0, %v2885_v13 }
0x29a5   :  { %3024 = vperm.xlu0 %3742, %v3021_v16  }
0x29a9   :  { %3743 = vset.pattern.permute.xlu2 %v4332_v0 }
0x29ad   :  { %3745 = vset.pattern.permute.xlu0 %v4333_v24 }
0x29fb   :  { %v2988_v59 = vpop.permute.xlu2 %2987  ;;  %v2889_v52 = vpop.xlane.xlu1 %2888 }
0x29fc   :  { %v2890_v53 = vsub.f32 %v4924_v56, %v2889_v52 }
0x29fe   :  { %v2891_v54 = vmul.f32 1.442695, %v2890_v53 }
0x2a04   :  { %v2919_v4 = vpop.xlane.xlu0 %2918 }
0x2a05   :  { %4004 = vrsqrt.f32 %v2919_v4  ;;  %vm2927_vm3 = vcmp.eq.f32.partialorder %v2919_v4, inf  ;;  %v2930_v26 = vand.u32 2147483648, %v2919_v4  ;;  %vm2929_vm0 = vcmp.eq.f32.partialorder %v2919_v4, 0.0 }
0x2a0b   :  { %v4005_v8 = vpop.eup %4004 }
0x2a0c   :  { %v2921_v7 = vmul.f32 %v4005_v8, %v2919_v4 }
0x2a0e   :  { %v2922_v11 = vmul.f32 %v4005_v8, %v2921_v7 }
0x2a10   :  { %v2923_v25 = vmul.f32 0.5, %v2922_v11 }
0x2a11   :  { %v2976_v22 = vpop.f32.mrf.mxu2 }
0x2a12   :  { %v2924_v12 = vsub.f32 1.5, %v2923_v25 }
0x2a14   :  { %v2925_v14 = vmul.f32 %v4005_v8, %v2924_v12 }
0x2a16   :  { %v2926_v30 = vmul.f32 %v2925_v14, %v2919_v4 }
0x2a18   :  { %v2928_v15 = vsel %vm2927_vm3, %v2919_v4, %v2926_v30 }
0x2a19   :  { %v2931_v27 = vsel %vm2929_vm0, %v2930_v26, %v2928_v15 }
0x2a1a   :  { %v2932_v18 = vadd.f32 1e-08, %v2931_v27 }
0x2a1c   :  { %4006 = vrcp.f32 %v2932_v18  ;;  %v2944_v21 = vand.u32 2147483648, %v2932_v18  ;;  %v2942_v33 = vand.u32 2147483647, %v2932_v18  ;;  %vm2938_vm5 = vweird.f32 %v2932_v18 }
0x2a1d   :  { %4008 = vpow2.f32 %v2891_v54 }
0x2a1e   :  { %v2945_v34 = vor.u32 1.1754944e-38, %v2944_v21  ;;  %vm2943_vm10 = vcmp.eq.f32.partialorder %v2942_v33, 8.507059e+37 }
0x2a22   :  { %v4007_v44 = vpop.eup %4006 }
0x2a23   :  { %v2934_v29 = vmul.f32 %v4007_v44, %v2932_v18  ;;  %vm2939_vm4 = vweird.f32 %v4007_v44  ;;  %v4009_v57 = vpop.eup %4008  ;;  %v3025_v18 = vpop.permute.xlu0 %3024 }
0x2a24   :  { %vm2940_vm9 = vmor %vm2938_vm5, %vm2939_vm4 }
0x2a25   :  { %v2935_v20 = vsub.f32 1.0, %v2934_v29 }
0x2a27   :  { %v2936_v31 = vmul.f32 %v4007_v44, %v2935_v20  ;;  %v3027_v20 = vmul.f32 %v3025_v18, %v4893_v17 }
0x2a29   :  { %v2937_v28 = vadd.f32 %v4007_v44, %v2936_v31 }
0x2a2b   :  { %v2941_v41 = vsel %vm2940_vm9, %v4007_v44, %v2937_v28 }
0x2a2c   :  { %v2946_v40 = vsel %vm2943_vm10, %v2945_v34, %v2941_v41 }
0x2a2d   :  { %v2983_v10 = vmul.f32 %v3767_v38, %v2946_v40 }
0x2a2f   :  { %v2984_v48 = vmul.f32 %v2983_v10, %v2976_v22 }
0x2a31   :  { %v2990_v50 = vmul.f32 %v2988_v59, %v2984_v48 }
0x2a33   :  { %v2991_v43 = vsel %vm411_vm7, %v2990_v50, -inf }
0x2a34   :  { %2992 = vmax.xlane.f32.xlu2 %v2991_v43  ;;  %v4949_v43 = vpop.f32.mrf.mxu3 }
0x2a4c   :  { %2894 = vrot.lane.b32.xlu2 %v4009_v57, %s4329_s28 }
0x2aa7   :  { %v2993_v58 = vpop.xlane.xlu2 %2992 }
0x2aa8   :  { %v2994_v37 = vsub.f32 %v2990_v50, %v2993_v58  ;;  %v2915_v58 = vadd.f32 1.0, %v4934_v60 }
0x2aaa   :  { %v2995_v61 = vmul.f32 1.442695, %v2994_v37 }
0x2aac   :  { %4010 = vpow2.f32 %v2995_v61 }
0x2aaf   :  { %v2895_v16 = vpop.permute.xlu2 %2894 }
0x2ab0   :  { %v2897_v4 = vsel %vm390_vm6, %v2895_v16, 0.0 }
0x2ab2   :  { %v4011_v3 = vpop.eup %4010 }
0x2ab3   :  { %v2997_v63 = vsel %vm411_vm7, %v4011_v3, 0.0 }
0x2ab4   :  { %2998 = vadd.xlane.f32.xlu1 %v2997_v63 }
0x2acd   :  { %3017 = vperm.xlu1 %3741, %v2885_v13  }
0x2af7   :  { %2898 = vadd.xlane.f32.xlu1 %v2897_v4 }
0x2b27   :  { %v2999_v8 = vpop.xlane.xlu1 %2998 }
0x2b28   :  { %4012 = vrcp.f32 %v2999_v8  ;;  %v3011_v30 = vand.u32 2147483648, %v2999_v8  ;;  %vm3005_vm12 = vweird.f32 %v2999_v8  ;;  %v3009_v26 = vand.u32 2147483647, %v2999_v8 }
0x2b2a   :  { %v3012_v27 = vor.u32 1.1754944e-38, %v3011_v30  ;;  %vm3010_vm14 = vcmp.eq.f32.partialorder %v3009_v26, 8.507059e+37  ;;  %v3105_v30 = vld [vmem:[#allocation5] sm:$0xff]  ;;  %v3108_v26 = vld [vmem:[#allocation5 + $0x18] sm:$0xff] }
0x2b2b   :  { %3146 = vmatpush.msrb.mxu1 %v3108_v26 }
0x2b2e   :  { %v4013_v7 = vpop.eup %4012 }
0x2b2f   :  { %v3001_v11 = vmul.f32 %v4013_v7, %v2999_v8  ;;  %vm3006_vm11 = vweird.f32 %v4013_v7 }
0x2b30   :  { %vm3007_vm13 = vmor %vm3005_vm12, %vm3006_vm11 }
0x2b31   :  { %v3002_v25 = vsub.f32 1.0, %v3001_v11 }
0x2b33   :  { %v3003_v12 = vmul.f32 %v4013_v7, %v3002_v25 }
0x2b35   :  { %v3004_v14 = vadd.f32 %v4013_v7, %v3003_v12 }
0x2b37   :  { %v3008_v15 = vsel %vm3007_vm13, %v4013_v7, %v3004_v14 }
0x2b38   :  { %v3013_v13 = vsel %vm3010_vm14, %v3012_v27, %v3008_v15  ;;  %v3106_v15 = vld [vmem:[#allocation5 + $0x8] sm:$0xff] }
0x2b39   :  { %v3014_v44 = vmul.f32 %v4011_v3, %v3013_v13  ;;  %3147 = vmatpush.msrb.mxu1 %v3106_v15 }
0x2b3b   :  { %3516 = vmatpush.msra.mxu1 %v3108_v26 }
0x2b3d   :  { %3517 = vmatpush.msra.mxu1 %v3106_v15 }
0x2b3f   :  { %v3018_v29 = vpop.permute.xlu1 %3017 }
0x2b40   :  { %v3020_v21 = vmul.f32 %v3018_v29, %v3014_v44 }
0x2b42   :  { %v3028_v31 = vadd.f32 %v3027_v20, %v3020_v21 }
0x2b44   :  { %3660 = vmatmul.msk.f32.vlgmr.msra.gmra.mxu3 %vm193_vm1, %v3028_v31 }
0x2b6a   :  { %v2899_v33 = vpop.xlane.xlu1 %2898 }
0x2b6b   :  { %4014 = vrcp.f32 %v2899_v33  ;;  %v2911_v41 = vand.u32 2147483648, %v2899_v33  ;;  %v2909_v10 = vand.u32 2147483647, %v2899_v33  ;;  %vm2905_vm3 = vweird.f32 %v2899_v33 }
0x2b6d   :  { %v2912_v48 = vor.u32 1.1754944e-38, %v2911_v41  ;;  %vm2910_vm4 = vcmp.eq.f32.partialorder %v2909_v10, 8.507059e+37  ;;  %v2808_v41 = vperm.slane %v4921_v62, 0 }
0x2b71   :  { %v4015_v28 = vpop.eup %4014 }
0x2b72   :  { %v2901_v38 = vmul.f32 %v4015_v28, %v2899_v33  ;;  %vm2906_vm15 = vweird.f32 %v4015_v28 }
0x2b73   :  { %vm2907_vm0 = vmor %vm2905_vm3, %vm2906_vm15 }
0x2b74   :  { %v2902_v34 = vsub.f32 1.0, %v2901_v38 }
0x2b76   :  { %v2903_v40 = vmul.f32 %v4015_v28, %v2902_v34 }
0x2b78   :  { %v2904_v22 = vadd.f32 %v4015_v28, %v2903_v40 }
0x2b7a   :  { %v2908_v59 = vsel %vm2907_vm0, %v4015_v28, %v2904_v22 }
0x2b7b   :  { %v2913_v17 = vsel %vm2910_vm4, %v2912_v48, %v2908_v59 }
0x2b7c   :  { %v2914_v50 = vmul.f32 %v4009_v57, %v2913_v17  ;;  %v3768_v17 = vld [vmem:[#allocation11] ss:$0 sm:$0xff] }
0x2b7e   :  { %3061 = vperm.xlu0 %3745, %v2914_v50   ;;  %3067 = vperm.xlu2 %3743, %v2914_v50  }
0x2b86   :  { %3744 = vset.pattern.permute.xlu2 %v4331_v9  ;;  %3748 = vset.pattern.permute.xlu0 %v4328_v49 }
0x2b87   :  { %3056 = vperm.xlu2 %3744, %v2914_v50  }
0x2b8f   :  { %3746 = vset.pattern.permute.xlu2 %v4334_v42 }
0x2bc7   :  { %v3051_v52 = vpop.f32.mrf.mxu3 }
0x2bd8   :  { %v3068_v53 = vpop.permute.xlu2 %3067 }
0x2bd9   :  { %v3070_v54 = vmul.f32 %v3068_v53, %v3051_v52 }
0x2bdb   :  { %3072 = vrot.lane.b32.xlu2 %v3070_v54, %s4324_s8 }
0x2be1   :  { %v3057_v57 = vpop.permute.xlu2 %3056 }
0x2be2   :  { %v3059_v3 = vmul.f32 %v3057_v57, %v3051_v52 }
0x2be3   :  { %3081 = vperm.xlu2 %3746, %v2915_v58  }
0x2beb   :  { %3747 = vset.pattern.permute.xlu2 %v4327_v46  ;;  %v3107_v46 = vld [vmem:[#allocation5 + $0x10] sm:$0xff] }
0x2bec   :  { %3126 = vmatpush.msra.mxu0 %v3107_v46 }
0x2bee   :  { %3127 = vmatpush.msra.mxu0 %v3105_v30 }
0x2bf0   :  { %v3062_v37 = vpop.permute.xlu0 %3061  ;;  %3440 = vmatpush.msrb.mxu0 %v4876_v35  ;;  %v2835_v35 = vpop.f32.mrf.mxu0 }
0x2bf1   :  { %v3064_v61 = vmul.f32 %v3062_v37, %v3028_v31  ;;  %v2836_v40 = vadd.f32 %v2835_v35, %v2808_v41 }
0x2bf3   :  { %v3065_v49 = vadd.f32 %v3064_v61, %v3059_v3  ;;  %v3168_v48 = vrot.slane %v2836_v40, 2 }
0x2c35   :  { %v3073_v63 = vpop.permute.xlu2 %3072 }
0x2c36   :  { %v3075_v16 = vadd.f32 %v3073_v63, %v3065_v49 }
0x2c38   :  { %v3076_v4 = vadd.f32 1e-08, %v3075_v16 }
0x2c3a   :  { %4016 = vlog2.f32 %v3076_v4 }
0x2c3d   :  { %v3082_v11 = vpop.permute.xlu2 %3081 }
0x2c40   :  { %v4017_v8 = vpop.eup %4016 }
0x2c41   :  { %v3078_v7 = vmul.f32 0.6931472, %v4017_v8 }
0x2c43   :  { %v3084_v25 = vmul.f32 %v3082_v11, %v3078_v7 }
0x2c45   :  { %v3085_v12 = vmul.f32 1.442695, %v3084_v25  ;;  %v3197_v25 = vrot.slane %v4904_v23, 6  ;;  %v3220_v23 = vld [vmem:[#allocation14] sm:$0x3] }
0x2c47   :  { %4018 = vpow2.f32 %v3085_v12 }
0x2c4d   :  { %v4019_v14 = vpop.eup %4018 }
0x2c4e   :  { %v3087_v60 = vsel %vm411_vm7, %v4019_v14, 0.0 }
0x2c4f   :  { %3088 = vadd.xlane.f32.xlu0 %v3087_v60 }
0x2cc2   :  { %v3089_v27 = vpop.xlane.xlu0 %3088 }
0x2cc3   :  { %4020 = vrcp.f32 %v3089_v27  ;;  %v3101_v29 = vand.u32 2147483648, %v3089_v27  ;;  %v3099_v21 = vand.u32 2147483647, %v3089_v27  ;;  %vm3095_vm9 = vweird.f32 %v3089_v27 }
0x2cc5   :  { %v3102_v33 = vor.u32 1.1754944e-38, %v3101_v29  ;;  %vm3100_vm11 = vcmp.eq.f32.partialorder %v3099_v21, 8.507059e+37 }
0x2cc9   :  { %v4021_v13 = vpop.eup %4020 }
0x2cca   :  { %v3091_v18 = vmul.f32 %v4021_v13, %v3089_v27  ;;  %vm3096_vm5 = vweird.f32 %v4021_v13 }
0x2ccb   :  { %vm3097_vm10 = vmor %vm3095_vm9, %vm3096_vm5 }
0x2ccc   :  { %v3092_v44 = vsub.f32 1.0, %v3091_v18 }
0x2cce   :  { %v3093_v20 = vmul.f32 %v4021_v13, %v3092_v44 }
0x2cd0   :  { %v3094_v31 = vadd.f32 %v4021_v13, %v3093_v20 }
0x2cd2   :  { %v3098_v28 = vsel %vm3097_vm10, %v4021_v13, %v3094_v31  ;;  %v3222_v13 = vperm.slane %v3220_v23, 1 }
0x2cd3   :  { %v3103_v38 = vsel %vm3100_vm11, %v3102_v33, %v3098_v28 }
0x2cd4   :  { %v4956_v34 = vmul.f32 %v4019_v14, %v3103_v38 }
0x2cd6   :  { %3661 = vmatmul.msk.f32.vlgmr.msra.gmra.mxu0 %vm193_vm1, %v4956_v34  ;;  %3662 = vmatmul.msk.f32.vlgmr.msrb.gmra.mxu1 %vm193_vm1, %v4956_v34 }
0x2d53   :  { %v3129_v10 = vpop.f32.mrf.mxu0 }
0x2d54   :  { %v3164_v22 = vrot.slane %v3129_v10, 2 }
0x2d56   :  { %v3166_v59 = vadd.f32 %v3164_v22, %v4583_v45 }
0x2d58   :  { %v3170_v50 = vadd.f32 %v3168_v48, %v3166_v59 }
0x2d5a   :  { %v3175_v52 = vadd.f32 %v3768_v17, %v3170_v50 }
0x2d5c   :  { %4022 = vtanh.f32 %v3175_v52  ;;  %v3663_v54 = vmul.f32 -1.442695, %v3175_v52 }
0x2d5e   :  { %4024 = vpow2.f32 %v3663_v54 }
0x2d62   :  { %v4023_v53 = vpop.eup %4022 }
0x2d63   :  { %3201 = vrot.lane.b32.xlu1 %v4023_v53, %s4325_s23 }
0x2d64   :  { %v4025_v58 = vpop.eup %4024 }
0x2d65   :  { %v3179_v57 = vadd.f32 1.0, %v4025_v58 }
0x2d67   :  { %4026 = vrcp.f32 %v3179_v57  ;;  %v3191_v63 = vand.u32 2147483648, %v3179_v57  ;;  %vm3185_vm13 = vweird.f32 %v3179_v57  ;;  %v3189_v45 = vand.u32 2147483647, %v3179_v57 }
0x2d69   :  { %v3192_v4 = vor.u32 1.1754944e-38, %v3191_v63  ;;  %vm3190_vm15 = vcmp.eq.f32.partialorder %v3189_v45, 8.507059e+37 }
0x2d6d   :  { %v4027_v37 = vpop.eup %4026 }
0x2d6e   :  { %v3181_v62 = vmul.f32 %v4027_v37, %v3179_v57  ;;  %vm3186_vm12 = vweird.f32 %v4027_v37 }
0x2d6f   :  { %vm3187_vm14 = vmor %vm3185_vm13, %vm3186_vm12 }
0x2d70   :  { %v3182_v61 = vsub.f32 1.0, %v3181_v62 }
0x2d72   :  { %v3183_v3 = vmul.f32 %v4027_v37, %v3182_v61 }
0x2d74   :  { %v3184_v49 = vadd.f32 %v4027_v37, %v3183_v3 }
0x2d76   :  { %v3188_v16 = vsel %vm3187_vm14, %v4027_v37, %v3184_v49 }
0x2d77   :  { %v3193_v7 = vsel %vm3190_vm15, %v3192_v4, %v3188_v16 }
0x2d78   :  { %v3199_v12 = vmul.f32 %v3197_v25, %v3193_v7 }
0x2dd5   :  { %v3202_v8 = vpop.permute.xlu1 %3201 }
0x2dd6   :  { %v3204_v11 = vmul.f32 %v3202_v8, %v3193_v7 }
0x2dd8   :  { %3206 = vrot.lane.b32.xlu2 %v3204_v11, %s4326_s24 }
0x2e32   :  { %v3207_v14 = vpop.permute.xlu2 %3206 }
0x2e33   :  { %v4967_v60 = vadd.f32 %v3207_v14, %v3199_v12 }
0x2e35   :  { %4028 = vtanh.f32 %v4967_v60 }
0x2e3b   :  { %v4029_v46 = vpop.eup %4028 }
0x2e3c   :  { %3212 = vrot.lane.b32.xlu2 %v4029_v46, %s4325_s23 }
0x2e96   :  { %v3213_v30 = vpop.permute.xlu2 %3212 }
0x2e97   :  { %v4971_v26 = vmul.f32 %v3213_v30, %v3193_v7 }
0x2e99   :  { %v3225_v15 = vrot.slane %v4971_v26, 6 }
0x2e9b   :  { %3226 = vrot.lane.b32.xlu2 %v3225_v15, %s4326_s24 }
0x2ef5   :  { %v3227_v27 = vpop.permute.xlu2 %3226 }
0x2ef6   :  { %3664 = vmatmul.msk.f32.vlgmr.msrb.gmra.mxu2 %vm223_vm2, %v3227_v27 }
0x2f79   :  { %v3247_v18 = vpop.f32.mrf.mxu2 }
0x2f7a   :  { %v4976_v44 = vadd.f32 %v3247_v18, %v3222_v13 }
0x2f7c   :  { %4030 = vtanh.f32 %v4976_v44  ;;  %v3279_v29 = vsel %vm379_vm8, %v4976_v44, -inf  ;;  %v3251_v20 = vand.u32 2147483647, %v4976_v44  ;;  %v3665_v21 = vmul.f32 -1.442695, %v4976_v44 }
0x2f7d   :  { %3280 = vmax.xlane.f32.xlu0 %v3279_v29  ;;  %v3258_v53 = vmax.f32 %v4976_v44, 0.0 }
0x2f7e   :  { %v3252_v31 = vsub.f32 0.0, %v3251_v20  ;;  %4032 = vpow2.f32 %v3665_v21  ;;  %v3769_v21 = vld [vmem:[#allocation7] ss:$0 sm:$0xff] }
0x2f80   :  { %v3253_v33 = vmul.f32 1.442695, %v3252_v31 }
0x2f82   :  { %v4031_v28 = vpop.eup %4030  ;;  %4034 = vpow2.f32 %v3253_v33 }
0x2f83   :  { %3668 = vmatmul.msk.f32.vlgmr.msrb.gmra.mxu3 %vm193_vm1, %v4031_v28  ;;  %v3308_v38 = vmul.f32 %v4031_v28, %v4031_v28 }
0x2f84   :  { %v4033_v35 = vpop.eup %4032 }
0x2f85   :  { %v3309_v41 = vsel %vm411_vm7, %v3308_v38, 0.0  ;;  %v3263_v40 = vadd.f32 1.0, %v4033_v35 }
0x2f86   :  { %3310 = vadd.xlane.f32.xlu1 %v3309_v41 }
0x2f87   :  { %4036 = vrcp.f32 %v3263_v40  ;;  %v3275_v57 = vand.u32 2147483648, %v3263_v40  ;;  %vm3269_vm8 = vweird.f32 %v3263_v40  ;;  %v3273_v62 = vand.u32 2147483647, %v3263_v40 }
0x2f88   :  { %v4035_v10 = vpop.eup %4034 }
0x2f89   :  { %v3255_v22 = vadd.f32 1.0, %v4035_v10  ;;  %v3276_v3 = vor.u32 1.1754944e-38, %v3275_v57  ;;  %vm3274_vm0 = vcmp.eq.f32.partialorder %v3273_v62, 8.507059e+37 }
0x2f8b   :  { %4038 = vlog2.f32 %v3255_v22 }
0x2f8d   :  { %v4037_v48 = vpop.eup %4036 }
0x2f8e   :  { %v3265_v59 = vmul.f32 %v4037_v48, %v3263_v40  ;;  %vm3270_vm2 = vweird.f32 %v4037_v48 }
0x2f8f   :  { %vm3271_vm3 = vmor %vm3269_vm8, %vm3270_vm2 }
0x2f90   :  { %v3266_v50 = vsub.f32 1.0, %v3265_v59 }
0x2f91   :  { %v4039_v17 = vpop.eup %4038 }
0x2f92   :  { %v3257_v52 = vmul.f32 0.6931472, %v4039_v17  ;;  %v3267_v54 = vmul.f32 %v4037_v48, %v3266_v50 }
0x2f94   :  { %v4986_v58 = vadd.f32 %v3258_v53, %v3257_v52  ;;  %v3268_v37 = vadd.f32 %v4037_v48, %v3267_v54 }
0x2f96   :  { %3379 = vperm.xlu2 %3747, %v4986_v58   ;;  %v3272_v61 = vsel %vm3271_vm3, %v4037_v48, %v3268_v37 }
0x2f97   :  { %v3277_v49 = vsel %vm3274_vm0, %v3276_v3, %v3272_v61  ;;  %v3149_v3 = vpop.f32.mrf.mxu1 }
0x2f98   :  { %v3413_v63 = vsub.f32 1.0, %v3277_v49 }
0x2f9e   :  { %3750 = vset.pattern.permute.xlu2 %v4331_v9 }
0x2f9f   :  { %3416 = vperm.xlu1 %3741, %v3413_v63  }
0x2ff0   :  { %v3380_v40 = vpop.permute.xlu2 %3379  ;;  %v3281_v48 = vpop.xlane.xlu0 %3280 }
0x2ff1   :  { %v3282_v59 = vsub.f32 %v4976_v44, %v3281_v48 }
0x2ff3   :  { %v3283_v17 = vmul.f32 1.442695, %v3282_v59 }
0x2ff9   :  { %v3311_v45 = vpop.xlane.xlu1 %3310 }
0x2ffa   :  { %4040 = vrsqrt.f32 %v3311_v45  ;;  %vm3319_vm4 = vcmp.eq.f32.partialorder %v3311_v45, inf  ;;  %v3322_v14 = vand.u32 2147483648, %v3311_v45  ;;  %vm3321_vm5 = vcmp.eq.f32.partialorder %v3311_v45, 0.0 }
0x3000   :  { %v4041_v16 = vpop.eup %4040 }
0x3001   :  { %v3313_v4 = vmul.f32 %v4041_v16, %v3311_v45 }
0x3003   :  { %v3314_v8 = vmul.f32 %v4041_v16, %v3313_v4 }
0x3005   :  { %v3315_v7 = vmul.f32 0.5, %v3314_v8 }
0x3006   :  { %v3368_v35 = vpop.f32.mrf.mxu3 }
0x3007   :  { %v3316_v11 = vsub.f32 1.5, %v3315_v7 }
0x3009   :  { %v3317_v25 = vmul.f32 %v4041_v16, %v3316_v11 }
0x300b   :  { %v3318_v12 = vmul.f32 %v3317_v25, %v3311_v45 }
0x300d   :  { %v3320_v46 = vsel %vm3319_vm4, %v3311_v45, %v3318_v12  ;;  %v3421_v45 = vld [vmem:[%s5072_s10] sm:$0xff]  ;;  %s4336_s10 = smov 106   ;;  %vm660_vm4 = vcmask 58368  }
0x300e   :  { %v3323_v30 = vsel %vm3321_vm5, %v3322_v14, %v3320_v46  ;;  %3441 = vmatpush.msrb.mxu0 %v3421_v45 }
0x300f   :  { %v3324_v15 = vadd.f32 1e-08, %v3323_v30 }
0x3011   :  { %4042 = vrcp.f32 %v3324_v15  ;;  %v3336_v13 = vand.u32 2147483648, %v3324_v15  ;;  %v3334_v29 = vand.u32 2147483647, %v3324_v15  ;;  %vm3330_vm10 = vweird.f32 %v3324_v15  ;;  %v3417_v63 = vpop.permute.xlu1 %3416 }
0x3012   :  { %4044 = vpow2.f32 %v3283_v17 }
0x3013   :  { %v3337_v31 = vor.u32 1.1754944e-38, %v3336_v13  ;;  %vm3335_vm12 = vcmp.eq.f32.partialorder %v3334_v29, 8.507059e+37 }
0x3017   :  { %v4043_v27 = vpop.eup %4042 }
0x3018   :  { %v3326_v23 = vmul.f32 %v4043_v27, %v3324_v15  ;;  %vm3331_vm9 = vweird.f32 %v4043_v27  ;;  %v4045_v50 = vpop.eup %4044 }
0x3019   :  { %vm3332_vm11 = vmor %vm3330_vm10, %vm3331_vm9 }
0x301a   :  { %v3327_v9 = vsub.f32 1.0, %v3326_v23 }
0x301c   :  { %v3328_v18 = vmul.f32 %v4043_v27, %v3327_v9 }
0x301e   :  { %v3329_v20 = vadd.f32 %v4043_v27, %v3328_v18 }
0x3020   :  { %v3333_v33 = vsel %vm3332_vm11, %v4043_v27, %v3329_v20 }
0x3021   :  { %v3338_v28 = vsel %vm3335_vm12, %v3337_v31, %v3333_v33  ;;  %vm3537_vm12 = vcmask 392326  }
0x3022   :  { %v3375_v38 = vmul.f32 %v3769_v21, %v3338_v28  ;;  %v3419_v28 = vmul.f32 %v3417_v63, %v4956_v34 }
0x3024   :  { %v3376_v41 = vmul.f32 %v3375_v38, %v3368_v35 }
0x3026   :  { %v3382_v10 = vmul.f32 %v3380_v40, %v3376_v41  ;;  %v3307_v41 = vadd.f32 1.0, %v4986_v58 }
0x3028   :  { %v3383_v22 = vsel %vm411_vm7, %v3382_v10, -inf }
0x3029   :  { %3384 = vmax.xlane.f32.xlu2 %v3383_v22 }
0x3041   :  { %3286 = vrot.lane.b32.xlu2 %v4045_v50, %s4329_s28 }
0x309c   :  { %v3385_v52 = vpop.xlane.xlu2 %3384 }
0x309d   :  { %v3386_v53 = vsub.f32 %v3382_v10, %v3385_v52 }
0x309f   :  { %v3387_v54 = vmul.f32 1.442695, %v3386_v53 }
0x30a1   :  { %4046 = vpow2.f32 %v3387_v54 }
0x30a4   :  { %v3287_v57 = vpop.permute.xlu2 %3286 }
0x30a5   :  { %v3289_v37 = vsel %vm390_vm6, %v3287_v57, 0.0 }
0x30a6   :  { %3290 = vadd.xlane.f32.xlu1 %v3289_v37 }
0x30a7   :  { %v4047_v62 = vpop.eup %4046 }
0x30a8   :  { %v3389_v61 = vsel %vm411_vm7, %v4047_v62, 0.0 }
0x30a9   :  { %3390 = vadd.xlane.f32.xlu0 %v3389_v61 }
0x30bd   :  { %3409 = vperm.xlu0 %3748, %v3277_v49  }
0x30bf   :  { %1488 = vrot.lane.b32.xlu1 %v4759_v5, %s4335_s2 }
0x30c5   :  { %3749 = vset.pattern.permute.xlu0 %v4332_v0 }
0x30c7   :  { %3153 = vrot.lane.b32.xlu1 %v3149_v3, %s4335_s2 }
0x30cf   :  { %3540 = vrot.lane.b32.xlu1 %v4967_v60, %s4314_s30  ;;  %s4337_s30 = smov 80  }
0x3119   :  { %v3291_v16 = vpop.xlane.xlu1 %3290 }
0x311a   :  { %4048 = vrcp.f32 %v3291_v16  ;;  %v3303_v7 = vand.u32 2147483648, %v3291_v16  ;;  %v3301_v12 = vand.u32 2147483647, %v3291_v16  ;;  %vm3297_vm13 = vweird.f32 %v3291_v16 }
0x311c   :  { %v3391_v49 = vpop.xlane.xlu0 %3390  ;;  %v3304_v30 = vor.u32 1.1754944e-38, %v3303_v7  ;;  %vm3302_vm2 = vcmp.eq.f32.partialorder %v3301_v12, 8.507059e+37 }
0x311d   :  { %4050 = vrcp.f32 %v3391_v49  ;;  %v3403_v46 = vand.u32 2147483648, %v3391_v49  ;;  %v3401_v27 = vand.u32 2147483647, %v3391_v49  ;;  %vm3397_vm8 = vweird.f32 %v3391_v49 }
0x311f   :  { %v3404_v29 = vor.u32 1.1754944e-38, %v3403_v46  ;;  %vm3402_vm0 = vcmp.eq.f32.partialorder %v3401_v27, 8.507059e+37 }
0x3120   :  { %v4049_v4 = vpop.eup %4048 }
0x3121   :  { %v3293_v5 = vmul.f32 %v4049_v4, %v3291_v16  ;;  %vm3298_vm6 = vweird.f32 %v4049_v4 }
0x3122   :  { %vm3299_vm14 = vmor %vm3297_vm13, %vm3298_vm6  ;;  %vm3543_vm6 = vcmask 654726  }
0x3123   :  { %v4051_v8 = vpop.eup %4050  ;;  %v3294_v0 = vsub.f32 1.0, %v3293_v5 }
0x3124   :  { %v3393_v11 = vmul.f32 %v4051_v8, %v3391_v49  ;;  %vm3398_vm15 = vweird.f32 %v4051_v8 }
0x3125   :  { %v3295_v25 = vmul.f32 %v4049_v4, %v3294_v0  ;;  %vm3399_vm3 = vmor %vm3397_vm8, %vm3398_vm15 }
0x3126   :  { %v3394_v60 = vsub.f32 1.0, %v3393_v11 }
0x3127   :  { %v3296_v14 = vadd.f32 %v4049_v4, %v3295_v25 }
0x3128   :  { %v3395_v15 = vmul.f32 %v4051_v8, %v3394_v60 }
0x3129   :  { %v3300_v23 = vsel %vm3299_vm14, %v4049_v4, %v3296_v14 }
0x312a   :  { %v3305_v9 = vsel %vm3302_vm2, %v3304_v30, %v3300_v23  ;;  %v3396_v13 = vadd.f32 %v4051_v8, %v3395_v15 }
0x312b   :  { %v3306_v18 = vmul.f32 %v4045_v50, %v3305_v9 }
0x312c   :  { %v3400_v20 = vsel %vm3399_vm3, %v4051_v8, %v3396_v13 }
0x312d   :  { %3448 = vperm.xlu2 %3750, %v3306_v18   ;;  %3459 = vperm.xlu0 %3749, %v3306_v18   ;;  %v3405_v21 = vsel %vm3402_vm0, %v3404_v29, %v3400_v20 }
0x312e   :  { %v3406_v31 = vmul.f32 %v4047_v62, %v3405_v21 }
0x312f   :  { %v3410_v33 = vpop.permute.xlu0 %3409 }
0x3130   :  { %v3412_v38 = vmul.f32 %v3410_v33, %v3406_v31 }
0x3132   :  { %v3420_v35 = vadd.f32 %v3419_v28, %v3412_v38 }
0x3134   :  { %3669 = vmatmul.msk.f32.vlgmr.msrb.gmra.mxu0 %vm193_vm1, %v3420_v35 }
0x3135   :  { %3751 = vset.pattern.permute.xlu2 %v4333_v24  ;;  %3753 = vset.pattern.permute.xlu0 %v4334_v42 }
0x3136   :  { %3453 = vperm.xlu2 %3751, %v3306_v18  }
0x313e   :  { %3752 = vset.pattern.permute.xlu2 %v4334_v42 }
0x313f   :  { %3473 = vperm.xlu2 %3752, %v3307_v41  }
0x3147   :  { %652 = vrot.lane.b32.xlu2 %v4628_v1, %s4335_s2 }
0x314f   :  { %1070 = vrot.lane.b32.xlu2 %v4697_v36, %s4335_s2 }
0x3157   :  { %1906 = vrot.lane.b32.xlu2 %v4826_v55, %s4335_s2 }
0x315f   :  { %2317 = vrot.lane.b32.xlu2 %v4889_v47, %s4335_s2  ;;  %v5026_v47 = vpop.permute.xlu1 %1488 }
0x3160   :  { %v1491_v13 = vadd.f32 %v5026_v47, %v4669_v32 }
0x3167   :  { %2735 = vrot.lane.b32.xlu2 %v4949_v43, %s4335_s2  ;;  %v3154_v17 = vpop.permute.xlu1 %3153 }
0x316f   :  { %3534 = vrot.lane.b32.xlu2 %v4971_v26, %s4330_s1  ;;  %v3541_v37 = vpop.permute.xlu1 %3540 }
0x3187   :  { %v3449_v24 = vpop.permute.xlu2 %3448 }
0x3190   :  { %v3454_v42 = vpop.permute.xlu2 %3453 }
0x3191   :  { %v3456_v26 = vmul.f32 %v3454_v42, %v3420_v35 }
0x3199   :  { %v3474_v34 = vpop.permute.xlu2 %3473 }
0x319f   :  { %v3460_v43 = vpop.permute.xlu0 %3459 }
0x31a1   :  { %v653_v58 = vpop.permute.xlu2 %652 }
0x31a2   :  { %v655_v1 = vadd.f32 %v653_v58, %v4511_v51 }
0x31a4   :  { %657 = vrot.lane.b32.xlu2 %v655_v1, %s4336_s10 }
0x31a9   :  { %v1071_v36 = vpop.permute.xlu2 %1070 }
0x31aa   :  { %v1073_v55 = vadd.f32 %v1071_v36, %v4603_v6  ;;  %v3156_v6 = vadd.f32 %v3154_v17, %v4924_v56 }
0x31ac   :  { %1075 = vrot.lane.b32.xlu1 %v1073_v55, %s4336_s10 }
0x31b1   :  { %v3443_v40 = vpop.f32.mrf.mxu0  ;;  %v1907_v10 = vpop.permute.xlu2 %1906 }
0x31b2   :  { %v3451_v22 = vmul.f32 %v3449_v24, %v3443_v40  ;;  %v3462_v48 = vmul.f32 %v3460_v43, %v3443_v40  ;;  %v1909_v59 = vadd.f32 %v1907_v10, %v4726_v2 }
0x31b4   :  { %1911 = vrot.lane.b32.xlu2 %v1909_v59, %s4336_s10  ;;  %3464 = vrot.lane.b32.xlu0 %v3462_v48, %s4324_s8  ;;  %v3457_v51 = vadd.f32 %v3456_v26, %v3451_v22  ;;  %s4338_s8 = smov [#allocation17]  }
0x31b5   :  { %s3568_s1 = sshll.u32 %s4338_s8, 4  ;;  %s3569_s1 = int_to_ptr.vmem [resolvable:$true] %s3568_s1 }
0x31b9   :  { %v2318_v50 = vpop.permute.xlu2 %2317 }
0x31ba   :  { %v2320_v52 = vadd.f32 %v2318_v50, %v4798_v39 }
0x31bc   :  { %2322 = vrot.lane.b32.xlu1 %v2320_v52, %s4336_s10  ;;  %3158 = vrot.lane.b32.xlu2 %v3156_v6, %s4336_s10 }
0x31c1   :  { %v2736_v53 = vpop.permute.xlu2 %2735 }
0x31c2   :  { %v2738_v18 = vadd.f32 %v2736_v53, %v4855_v19 }
0x31c9   :  { %v3535_v54 = vpop.permute.xlu2 %3534 }
0x31fe   :  { %v658_v57 = vpop.permute.xlu2 %657 }
0x31ff   :  { %661 = vst.msk [vmem:[#allocation16] sm:$0x3] %vm660_vm4, %v658_v57 }
0x320e   :  { %v1912_v2 = vpop.permute.xlu2 %1911 }
0x320f   :  { %1915 = vst.msk [vmem:[#allocation16 + $0x6] sm:$0x3] %vm660_vm4, %v1912_v2 }
0x3216   :  { %v3159_v62 = vpop.permute.xlu2 %3158 }
0x3217   :  { %3162 = vst.msk [vmem:[#allocation16 + $0xc] sm:$0x3] %vm660_vm4, %v3159_v62 }
0x321e   :  { %v1076_v56 = vpop.permute.xlu1 %1075 }
0x321f   :  { %1079 = vst.msk [vmem:[#allocation16 + $0x2] sm:$0x3] %vm660_vm4, %v1076_v56 }
0x3226   :  { %v3465_v39 = vpop.permute.xlu0 %3464 }
0x3227   :  { %v3467_v61 = vadd.f32 %v3465_v39, %v3457_v51 }
0x3229   :  { %v3468_v3 = vadd.f32 1e-08, %v3467_v61 }
0x322b   :  { %4052 = vlog2.f32 %v3468_v3 }
0x322e   :  { %v2323_v63 = vpop.permute.xlu1 %2322 }
0x322f   :  { %2326 = vst.msk [vmem:[#allocation16 + $0x8] sm:$0x3] %vm660_vm4, %v2323_v63 }
0x3231   :  { %v4053_v45 = vpop.eup %4052 }
0x3232   :  { %v3470_v16 = vmul.f32 0.6931472, %v4053_v45 }
0x3234   :  { %v3476_v49 = vmul.f32 %v3474_v34, %v3470_v16 }
0x3236   :  { %v3477_v4 = vmul.f32 1.442695, %v3476_v49 }
0x3238   :  { %4054 = vpow2.f32 %v3477_v4 }
0x323e   :  { %v4055_v5 = vpop.eup %4054 }
0x323f   :  { %v3479_v8 = vsel %vm411_vm7, %v4055_v5, 0.0 }
0x3240   :  { %3480 = vadd.xlane.f32.xlu0 %v3479_v8 }
0x32b3   :  { %v3481_v0 = vpop.xlane.xlu0 %3480 }
0x32b4   :  { %4056 = vrcp.f32 %v3481_v0  ;;  %v3493_v12 = vand.u32 2147483648, %v3481_v0  ;;  %v3491_v14 = vand.u32 2147483647, %v3481_v0  ;;  %vm3487_vm9 = vweird.f32 %v3481_v0 }
0x32b6   :  { %v3494_v30 = vor.u32 1.1754944e-38, %v3493_v12  ;;  %vm3492_vm11 = vcmp.eq.f32.partialorder %v3491_v14, 8.507059e+37 }
0x32ba   :  { %v4057_v7 = vpop.eup %4056 }
0x32bb   :  { %v3483_v11 = vmul.f32 %v4057_v7, %v3481_v0  ;;  %vm3488_vm5 = vweird.f32 %v4057_v7 }
0x32bc   :  { %vm3489_vm10 = vmor %vm3487_vm9, %vm3488_vm5 }
0x32bd   :  { %v3484_v25 = vsub.f32 1.0, %v3483_v11 }
0x32bf   :  { %v3485_v60 = vmul.f32 %v4057_v7, %v3484_v25 }
0x32c1   :  { %v3486_v46 = vadd.f32 %v4057_v7, %v3485_v60 }
0x32c3   :  { %v3490_v15 = vsel %vm3489_vm10, %v4057_v7, %v3486_v46 }
0x32c4   :  { %v3495_v27 = vsel %vm3492_vm11, %v3494_v30, %v3490_v15 }
0x32c5   :  { %v3496_v23 = vmul.f32 %v4055_v5, %v3495_v27 }
0x32c7   :  { %3670 = vmatmul.msk.f32.vlgmr.msra.gmra.mxu1 %vm193_vm1, %v3496_v23  ;;  %vm3548_vm1 = vcmask 779904  }
0x3344   :  { %v3519_v9 = vpop.f32.mrf.mxu1 }
0x3345   :  { %3533 = vst.msk [vmem:[#allocation17] sm:$0x3] %vm411_vm7, %v3519_v9  ;;  %3523 = vrot.lane.b32.xlu0 %v3519_v9, %s4335_s2 }
0x3346   :  { %3538 = vst.msk [vmem:[#allocation17 - $0x6] sm:$0xc0] %vm3537_vm12, %v3535_v54 }
0x3347   :  { %3544 = vst.msk [vmem:[#allocation17 - $0x6] sm:$0xc0] %vm3543_vm6, %v3541_v37 }
0x334d   :  { %1493 = vrot.lane.b32.xlu0 %v1491_v13, %s4336_s10 }
0x3355   :  { %2740 = vrot.lane.b32.xlu0 %v2738_v18, %s4336_s10 }
0x335d   :  { %3545 = vrot.lane.b32.xlu0 %v3496_v23, %s4337_s30 }
0x33b7   :  { %v3524_v29 = vpop.permute.xlu0 %3523 }
0x33b8   :  { %v3526_v20 = vadd.f32 %v3524_v29, %v4976_v44 }
0x33ba   :  { %3528 = vrot.lane.b32.xlu1 %v3526_v20, %s4336_s10 }
0x33bf   :  { %v1494_v21 = vpop.permute.xlu0 %1493 }
0x33c0   :  { %1497 = vst.msk [vmem:[#allocation16 + $0x4] sm:$0x3] %vm660_vm4, %v1494_v21 }
0x33c7   :  { %v2741_v31 = vpop.permute.xlu0 %2740 }
0x33c8   :  { %2744 = vst.msk [vmem:[#allocation16 + $0xa] sm:$0x3] %vm660_vm4, %v2741_v31 }
0x33cf   :  { %v3546_v32 = vpop.permute.xlu0 %3545 }
0x33d0   :  { %3549 = vst.msk [vmem:[#allocation17] sm:$0x3] %vm3548_vm1, %v3546_v32 }
0x33d1   :  { %3573 = dma.vmem_to_hbm [thread:$0]  %s3569_s1, 32, %s3571_s17, [#allocation18]  }
0x342c   :  { %v3529_v19 = vpop.permute.xlu1 %3528 }
0x342d   :  { %3532 = vst.msk [vmem:[#allocation16 + $0xe] sm:$0x3] %vm660_vm4, %v3529_v19 }
0x342e   :  { %3562 = dma.vmem_to_hbm [thread:$0]  %s3555_s5, 256, %s3557_s20, [#allocation4], %s4326_s24, %s4326_s24, %s4340_s21  }
0x342f   :  { %4308 = dma.done.wait [#allocation4], 256  }
0x3430   :  { %4309 = vsyncadd [#allocation4], 4294967040 }
0x3431   :  { %4310 = dma.done.wait [#allocation18], 32  }
0x3432   :  { %4311 = vsyncadd [#allocation18], 4294967264 }
0x3433   :  { %3582 = vsyncpa [#allocation3], 1 }
0x3434   :  { %3583 = vsyncpa [#allocation6], 1 }
0x3435   :  { %3584 = vsyncpa [#allocation9], 1 }
0x3436   :  { %3585 = vsyncpa [#allocation12], 1 }
0x3437   :  { %3586 = vsyncpa [#allocation15], 1 }
0x3438   :  { %3587 = vsyncpa [#allocation4], 1 }
0x3439   :  { %3588 = vsyncpa [#allocation18], 1 }

</bundles_post_ra>
